<compile_context>
chip_gen: v7x
topology: tpu7x:2x2x1
jax: 0.10.0
libtpu: 0.0.40
codegen_flags: <defaults>
</compile_context>

<pallas_src>
import numpy as np

import jax
import jax.numpy as jnp
from jax.experimental import pallas as pl
from jax.experimental.pallas import tpu as pltpu  # noqa: F401


# ----------------------------------------------------------------------------
# Architecture (synthetic g_extractor_arch(mode='mask'))
# ----------------------------------------------------------------------------

NUM_POINT_DIMS = 3
Z_DIM = 0
BASE_FEATURES = 8
MASK_CHANNELS = 1
RESOLUTION = 16

ARCH = {
    "upsample_input_shape": (BASE_FEATURES, 4, 4),             # (C0, h0, w0)
    "feature_channels": [BASE_FEATURES, 2 * BASE_FEATURES,
                         BASE_FEATURES * 4 * 4],                # last = layout_channels
    "upsample_channels": [BASE_FEATURES, BASE_FEATURES // 2],   # 4 -> 8 -> 16 spatial
    "g_conv": (0,),                                             # block 0 is a PG2DBlock
}


# ----------------------------------------------------------------------------
# Constant spatial "tap" matrices: fold (nearest-2x upsample + zero pad + 3x3
# conv window gather) into a single 0/1 matrix per tap.  Built once with numpy.
# ----------------------------------------------------------------------------

def _build_spatial_tap_matrix(h, w, up):
    """T[t, p, q] = 1 iff output pixel q of a keep-size 3x3 conv applied to the
    `up`x nearest-upsampled (h, w) map reads pre-upsample pixel p for tap t."""
    ho, wo = h * up, w * up
    q = np.arange(ho * wo)
    yq, xq = q // wo, q % wo
    t = np.zeros((9, h * w, ho * wo), np.float32)
    for dy in range(3):
        for dx in range(3):
            yu, xu = yq + dy - 1, xq + dx - 1
            valid = (yu >= 0) & (yu < ho) & (xu >= 0) & (xu < wo)
            p = (np.clip(yu, 0, ho - 1) // up) * w + (np.clip(xu, 0, wo - 1) // up)
            t[dy * 3 + dx, p[valid], q[valid]] = 1.0
    return t


_C0, _H0, _W0 = ARCH["upsample_input_shape"]
_T0 = _build_spatial_tap_matrix(_H0, _W0, 2)            # (9, 16, 64)   block 0
_T1 = _build_spatial_tap_matrix(2 * _H0, 2 * _W0, 2)    # (9, 64, 256)  block 1
_TF = _build_spatial_tap_matrix(4 * _H0, 4 * _W0, 1)    # (9, 256, 256) final conv


# ----------------------------------------------------------------------------
# Kernel A: fused graph_feature_extractor (+ PG2DBlock node aggregation)
# ----------------------------------------------------------------------------

def _make_graph_extractor_kernel(num_layers, has_norm, apply_final_agg):
    """Per layer:  agg = A_norm @ x
                   h   = relu(concat([x, agg, pos], -1) @ [Wx;Wn;Wp] + b1)
                   y   = concat([h, x], -1) @ [Wo;Wskip] + b2         (skip proj)
                   x   = relu(gamma*y + beta)     (all layers but the last)
       Epilogue:   feat = x + A_norm @ x          (PG2DBlock graph aggregation)"""

    def kernel(*refs):
        pos_ref, a_ref = refs[0], refs[1]
        out_ref = refs[-1]
        pos = pos_ref[...]
        a_norm = a_ref[...]
        x = pos
        idx = 2
        for i in range(num_layers):
            w1 = refs[idx][...]
            b1 = refs[idx + 1][...]
            w2 = refs[idx + 2][...]
            b2 = refs[idx + 3][...]
            idx += 4
            agg = jnp.dot(a_norm, x, preferred_element_type=jnp.float32)
            cat1 = jnp.concatenate([x, agg, pos], axis=-1)
            h = jnp.maximum(
                jnp.dot(cat1, w1, preferred_element_type=jnp.float32) + b1, 0.0)
            cat2 = jnp.concatenate([h, x], axis=-1)
            y = jnp.dot(cat2, w2, preferred_element_type=jnp.float32) + b2
            if has_norm[i]:
                gamma = refs[idx][...]
                beta = refs[idx + 1][...]
                idx += 2
                x = jnp.maximum(y * gamma + beta, 0.0)
            else:
                x = y
        if apply_final_agg:
            x = x + jnp.dot(a_norm, x, preferred_element_type=jnp.float32)
        out_ref[...] = x

    return kernel


def pallas_graph_feature_extractor(pos, a_norm, gpose_params, norm_params,
                                   apply_final_agg):
    num_layers = len(gpose_params)
    has_norm = tuple(i < num_layers - 1 for i in range(num_layers))
    n = pos.shape[0]
    cout_last = gpose_params[-1]["Wo"].shape[1]

    args = [pos.astype(jnp.float32), a_norm.astype(jnp.float32)]
    for i, p in enumerate(gpose_params):
        # K-concatenated weights (done once in the wrapper, outside the kernel)
        w1 = jnp.concatenate([p["Wx"], p["Wn"], p["Wp"]], axis=0)    # (2*cin+3, cout)
        w2 = jnp.concatenate([p["Wo"], p["Wskip"]], axis=0)          # (cout+cin, cout)
        args += [w1, p["b1"].reshape(1, -1), w2, p["b2"].reshape(1, -1)]
        if has_norm[i]:
            nm = norm_params[i]
            args += [nm["gamma"].reshape(1, -1), nm["beta"].reshape(1, -1)]

    return pl.pallas_call(
        _make_graph_extractor_kernel(num_layers, has_norm, apply_final_agg),
        out_shape=jax.ShapeDtypeStruct((n, cout_last), jnp.float32),
    )(*args)


# ----------------------------------------------------------------------------
# Kernel B: fused graph2masks head + reduce_by_batch_idx
# ----------------------------------------------------------------------------

def _graph2masks_kernel(feat_ref, m0_ref, b0_ref, g0_ref, be0_ref,
                        m1_ref, b1_ref, g1_ref, be1_ref,
                        mf_ref, bf_ref, gf_ref, bef_ref,
                        bsel_ref, masks_ref, total_ref):
    """Feature maps are carried channel-major as per-channel (N, H*W) tiles
    (spatial in the lane dimension -> every matmul and store is lane-dense).
    m*_ref hold upsample+pad+3x3-conv folded into (P_in, P_out) matrices per
    (out_channel, in_channel) pair."""

    def conv_block(inputs, m_ref, b_ref):
        n_out, n_in = m_ref.shape[0], m_ref.shape[1]
        outs = []
        for co in range(n_out):
            acc = jnp.dot(inputs[0], m_ref[co, 0],
                          preferred_element_type=jnp.float32)
            for ci in range(1, n_in):
                acc = acc + jnp.dot(inputs[ci], m_ref[co, ci],
                                    preferred_element_type=jnp.float32)
            outs.append(acc + b_ref[co])
        return outs

    c0 = feat_ref.shape[0]
    # PG2DBlock: norm2d + ReLU, then fused (upsample + pad + 3x3 conv)
    act0 = [jnp.maximum(feat_ref[c] * g0_ref[c] + be0_ref[c], 0.0)
            for c in range(c0)]
    y0 = conv_block(act0, m0_ref, b0_ref)                      # 4 x (N, 64)

    # GBlock: norm2d + ReLU, then fused (upsample + pad + 3x3 conv)
    act1 = [jnp.maximum(y0[c] * g1_ref[c] + be1_ref[c], 0.0)
            for c in range(len(y0))]
    y1 = conv_block(act1, m1_ref, b1_ref)                      # 4 x (N, 256)

    # final norm2d + ReLU + keep-size 3x3 conv to mask_channels (=1)
    actf = [jnp.maximum(y1[c] * gf_ref[c] + bef_ref[c], 0.0)
            for c in range(len(y1))]
    masks = jnp.dot(actf[0], mf_ref[0], preferred_element_type=jnp.float32)
    for ci in range(1, mf_ref.shape[0]):
        masks = masks + jnp.dot(actf[ci], mf_ref[ci],
                                preferred_element_type=jnp.float32)
    masks = masks + bf_ref[...]
    masks_ref[...] = masks                                     # (N, H*W) lane-dense

    # reduce_by_batch_idx(masks, batch, 'sum') fused as one tiny matmul
    total_ref[...] = jnp.dot(bsel_ref[...], masks,
                             preferred_element_type=jnp.float32)


def pallas_graph2masks(feat, params, bsel):
    n = feat.shape[0]
    c0, h0, w0 = ARCH["upsample_input_shape"]
    blk0, blk1 = params["blocks"]

    # channel-major, spatially flattened view of features.view(N, C0, h0, w0)
    feat_cnp = feat.reshape(n, c0, h0 * w0).transpose(1, 0, 2)   # (C0, N, h0*w0)

    # Fold (upsample + pad + 3x3 conv) into per-(co, ci) spatial matrices.
    m0 = jnp.einsum("tio,tpq->oipq",
                    blk0["w"].reshape(9, *blk0["w"].shape[2:]), _T0)
    m1 = jnp.einsum("tio,tpq->oipq",
                    blk1["w"].reshape(9, *blk1["w"].shape[2:]), _T1)
    mf = jnp.einsum("ti,tpq->ipq",
                    params["final_conv"]["w"][..., 0].reshape(9, -1), _TF)

    res = RESOLUTION * RESOLUTION
    num_graphs = bsel.shape[0]
    masks2d, total2d = pl.pallas_call(
        _graph2masks_kernel,
        out_shape=(
            jax.ShapeDtypeStruct((n, res), jnp.float32),
            jax.ShapeDtypeStruct((num_graphs, res), jnp.float32),
        ),
    )(feat_cnp,
      m0, blk0["b"].reshape(-1, 1, 1),
      blk0["gamma"].reshape(-1, 1, 1), blk0["beta"].reshape(-1, 1, 1),
      m1, blk1["b"].reshape(-1, 1, 1),
      blk1["gamma"].reshape(-1, 1, 1), blk1["beta"].reshape(-1, 1, 1),
      mf, params["final_conv"]["b"].reshape(1, 1),
      params["final_norm"]["gamma"].reshape(-1, 1, 1),
      params["final_norm"]["beta"].reshape(-1, 1, 1),
      bsel)
    return masks2d, total2d


# ----------------------------------------------------------------------------
# Parameter init (synthetic weights)
# ----------------------------------------------------------------------------

def _normal(key, shape, scale=0.1):
    return scale * jax.random.normal(key, shape, dtype=jnp.float32)


def init_params(key):
    keys = iter(jax.random.split(key, 64))
    params = {"gpose": [], "norm1d": [], "blocks": []}

    fchan = ARCH["feature_channels"]
    for i in range(len(fchan)):
        cin = fchan[i - 1] if i > 0 else NUM_POINT_DIMS + Z_DIM
        cout = fchan[i]
        params["gpose"].append({
            "Wx": _normal(next(keys), (cin, cout)),
            "Wn": _normal(next(keys), (cin, cout)),
            "Wp": _normal(next(keys), (NUM_POINT_DIMS, cout)),
            "b1": _normal(next(keys), (cout,), 0.05),
            "Wo": _normal(next(keys), (cout, cout)),
            "b2": _normal(next(keys), (cout,), 0.05),
            "Wskip": _normal(next(keys), (cin, cout)),
        })
        if i < len(fchan) - 1:
            params["norm1d"].append({
                "gamma": 1.0 + _normal(next(keys), (cout,), 0.05),
                "beta": _normal(next(keys), (cout,), 0.05),
            })

    uchan = ARCH["upsample_channels"]
    for i in range(len(uchan)):
        cin = uchan[i]
        cout = uchan[min(i + 1, len(uchan) - 1)]
        params["blocks"].append({
            "gamma": 1.0 + _normal(next(keys), (cin,), 0.05),
            "beta": _normal(next(keys), (cin,), 0.05),
            "w": _normal(next(keys), (3, 3, cin, cout)),
            "b": _normal(next(keys), (cout,), 0.05),
        })

    last = uchan[-1]
    params["final_norm"] = {
        "gamma": 1.0 + _normal(next(keys), (last,), 0.05),
        "beta": _normal(next(keys), (last,), 0.05),
    }
    params["final_conv"] = {
        "w": _normal(next(keys), (3, 3, last, MASK_CHANNELS)),
        "b": _normal(next(keys), (MASK_CHANNELS,), 0.05),
    }
    return params


# ----------------------------------------------------------------------------
# Forward pass
# ----------------------------------------------------------------------------

def build_normalized_adjacency(edge_index, num_nodes):
    """Row-normalized (mean-aggregation) dense adjacency from COO edge_index (2, E)."""
    src, dst = edge_index[0], edge_index[1]
    a = jnp.zeros((num_nodes, num_nodes), jnp.float32).at[dst, src].add(1.0)
    deg = a.sum(axis=1, keepdims=True)
    return a / jnp.maximum(deg, 1.0)


def graph_layout_mask_extractor_forward(params, pos, edge_index, batch, num_graphs):
    n = pos.shape[0]
    a_norm = build_normalized_adjacency(edge_index, n)

    # z is None -> empty tensor; cat((pos, z), dim=1) == pos.
    # Kernel A: fused GPose stack (+ norm1d + ReLU) + PG2DBlock node aggregation.
    feat = pallas_graph_feature_extractor(
        pos, a_norm, params["gpose"], params["norm1d"],
        apply_final_agg=(0 in ARCH["g_conv"]))

    # reduce_by_batch_idx(..., 'sum') selector, fused into Kernel B as a matmul
    bsel = jax.nn.one_hot(batch, num_graphs, dtype=jnp.float32).T    # (G, N)

    # Kernel B: fused graph2masks head + per-graph sum reduction.
    masks2d, total2d = pallas_graph2masks(feat, params, bsel)

    # back to PyTorch NCHW convention
    masks = masks2d.reshape(n, MASK_CHANNELS, RESOLUTION, RESOLUTION)
    total_mask = total2d.reshape(num_graphs, MASK_CHANNELS, RESOLUTION, RESOLUTION)
    return total_mask, masks


# ----------------------------------------------------------------------------
# Main
# ----------------------------------------------------------------------------

if __name__ == "__main__":
    key = jax.random.PRNGKey(0)
    kpos, kparam = jax.random.split(key)

    num_graphs = 2
    nodes_per_graph = 4
    N = num_graphs * nodes_per_graph

    pos = jax.random.normal(kpos, (N, NUM_POINT_DIMS), dtype=jnp.float32)

    # bidirectional ring edges inside each graph (deterministic)
    src, dst = [], []
    for g in range(num_graphs):
        base = g * nodes_per_graph
        for i in range(nodes_per_graph):
            a = base + i
            b = base + (i + 1) % nodes_per_graph
            src += [a, b]
            dst += [b, a]
    edge_index = jnp.array([src, dst], dtype=jnp.int32)
    batch = jnp.array([0] * nodes_per_graph + [1] * nodes_per_graph,
                      dtype=jnp.int32)

    params = init_params(kparam)

    fwd = jax.jit(graph_layout_mask_extractor_forward, static_argnums=(4,))
    total_mask, masks = fwd(params, pos, edge_index, batch, num_graphs)
    jax.block_until_ready((total_mask, masks))

    assert total_mask.shape == (num_graphs, MASK_CHANNELS, RESOLUTION, RESOLUTION)
    assert masks.shape == (N, MASK_CHANNELS, RESOLUTION, RESOLUTION)
    assert jnp.all(jnp.isfinite(total_mask)) and jnp.all(jnp.isfinite(masks))

    # sanity check: fused in-kernel reduce_by_batch_idx == per-graph sum of masks
    ref_total = jnp.stack([
        jnp.sum(masks * (batch == g).astype(jnp.float32)[:, None, None, None],
                axis=0)
        for g in range(num_graphs)])
    assert jnp.allclose(ref_total, total_mask, atol=1e-2, rtol=1e-2)

    print("KERNEL_OK")
</pallas_src>

<mosaic_0001>
module attributes {stable_mosaic.version = 11 : i64} {
  func.func private @main(%arg0: i32) attributes {dimension_semantics = [#tpu.dimension_semantics<core_parallel>], iteration_bounds = array<i64: 2>, tpu.core_type = #tpu.core_type<sc_scalar_subcore>, window_params = []} {
    return
  }
}

module attributes {stable_mosaic.version = 11 : i64} {
  func.func private @main(%arg0: i32) attributes {dimension_semantics = [#tpu.dimension_semantics<core_parallel>], iteration_bounds = array<i64: 2>, tpu.core_type = #tpu.core_type<sc_scalar_subcore>, window_params = []} {
    return
  }
}

module attributes {stable_mosaic.version = 11 : i64} {
  func.func @kernel(%arg0: memref<8x3xf32, #tpu.memory_space<vmem>>, %arg1: memref<8x8xf32, #tpu.memory_space<vmem>>, %arg2: memref<9x8xf32, #tpu.memory_space<vmem>>, %arg3: memref<1x8xf32, #tpu.memory_space<vmem>>, %arg4: memref<11x8xf32, #tpu.memory_space<vmem>>, %arg5: memref<1x8xf32, #tpu.memory_space<vmem>>, %arg6: memref<1x8xf32, #tpu.memory_space<vmem>>, %arg7: memref<1x8xf32, #tpu.memory_space<vmem>>, %arg8: memref<19x16xf32, #tpu.memory_space<vmem>>, %arg9: memref<1x16xf32, #tpu.memory_space<vmem>>, %arg10: memref<24x16xf32, #tpu.memory_space<vmem>>, %arg11: memref<1x16xf32, #tpu.memory_space<vmem>>, %arg12: memref<1x16xf32, #tpu.memory_space<vmem>>, %arg13: memref<1x16xf32, #tpu.memory_space<vmem>>, %arg14: memref<35x128xf32, #tpu.memory_space<vmem>>, %arg15: memref<1x128xf32, #tpu.memory_space<vmem>>, %arg16: memref<144x128xf32, #tpu.memory_space<vmem>>, %arg17: memref<1x128xf32, #tpu.memory_space<vmem>>, %arg18: memref<8x128xf32, #tpu.memory_space<vmem>>) attributes {dimension_semantics = [], scalar_prefetch = 0 : i64, scratch_operands = 0 : i64, tpu.core_type = #tpu.core_type<tc>} {
    %c0 = arith.constant 0 : index
    %c0_0 = arith.constant 0 : index
    %0 = vector.load %arg0[%c0, %c0_0] : memref<8x3xf32, #tpu.memory_space<vmem>>, vector<8x3xf32>
    %c0_1 = arith.constant 0 : index
    %c0_2 = arith.constant 0 : index
    %1 = vector.load %arg1[%c0_1, %c0_2] : memref<8x8xf32, #tpu.memory_space<vmem>>, vector<8x8xf32>
    %c0_3 = arith.constant 0 : index
    %c0_4 = arith.constant 0 : index
    %2 = vector.load %arg2[%c0_3, %c0_4] : memref<9x8xf32, #tpu.memory_space<vmem>>, vector<9x8xf32>
    %c0_5 = arith.constant 0 : index
    %c0_6 = arith.constant 0 : index
    %3 = vector.load %arg3[%c0_5, %c0_6] : memref<1x8xf32, #tpu.memory_space<vmem>>, vector<1x8xf32>
    %c0_7 = arith.constant 0 : index
    %c0_8 = arith.constant 0 : index
    %4 = vector.load %arg4[%c0_7, %c0_8] : memref<11x8xf32, #tpu.memory_space<vmem>>, vector<11x8xf32>
    %c0_9 = arith.constant 0 : index
    %c0_10 = arith.constant 0 : index
    %5 = vector.load %arg5[%c0_9, %c0_10] : memref<1x8xf32, #tpu.memory_space<vmem>>, vector<1x8xf32>
    %cst = arith.constant dense<0.000000e+00> : vector<8x3xf32>
    %6 = tpu.matmul %1, %0, %cst {dimension_numbers = #tpu.dot_dimension_numbers<[1], [0], [0], [1], [0, 0, 1, 1], [], []>} : vector<8x8xf32>, vector<8x3xf32>, vector<8x3xf32> -> vector<8x3xf32>
    %7 = tpu.concatenate %0, %6, %0 in 1 : vector<8x3xf32>, vector<8x3xf32>, vector<8x3xf32> -> vector<8x9xf32>
    %cst_11 = arith.constant dense<0.000000e+00> : vector<8x8xf32>
    %8 = tpu.matmul %7, %2, %cst_11 {dimension_numbers = #tpu.dot_dimension_numbers<[1], [0], [0], [1], [0, 0, 1, 1], [], []>} : vector<8x9xf32>, vector<9x8xf32>, vector<8x8xf32> -> vector<8x8xf32>
    %9 = vector.broadcast %3 : vector<1x8xf32> to vector<8x8xf32>
    %10 = arith.addf %8, %9 : vector<8x8xf32>
    %cst_12 = arith.constant 0.000000e+00 : f32
    %11 = vector.broadcast %cst_12 : f32 to vector<8x8xf32>
    %12 = arith.maximumf %10, %11 : vector<8x8xf32>
    %13 = tpu.concatenate %12, %0 in 1 : vector<8x8xf32>, vector<8x3xf32> -> vector<8x11xf32>
    %cst_13 = arith.constant dense<0.000000e+00> : vector<8x8xf32>
    %14 = tpu.matmul %13, %4, %cst_13 {dimension_numbers = #tpu.dot_dimension_numbers<[1], [0], [0], [1], [0, 0, 1, 1], [], []>} : vector<8x11xf32>, vector<11x8xf32>, vector<8x8xf32> -> vector<8x8xf32>
    %15 = vector.broadcast %5 : vector<1x8xf32> to vector<8x8xf32>
    %16 = arith.addf %14, %15 : vector<8x8xf32>
    %c0_14 = arith.constant 0 : index
    %c0_15 = arith.constant 0 : index
    %17 = vector.load %arg6[%c0_14, %c0_15] : memref<1x8xf32, #tpu.memory_space<vmem>>, vector<1x8xf32>
    %c0_16 = arith.constant 0 : index
    %c0_17 = arith.constant 0 : index
    %18 = vector.load %arg7[%c0_16, %c0_17] : memref<1x8xf32, #tpu.memory_space<vmem>>, vector<1x8xf32>
    %19 = vector.broadcast %17 : vector<1x8xf32> to vector<8x8xf32>
    %20 = arith.mulf %16, %19 : vector<8x8xf32>
    %21 = vector.broadcast %18 : vector<1x8xf32> to vector<8x8xf32>
    %22 = arith.addf %20, %21 : vector<8x8xf32>
    %cst_18 = arith.constant 0.000000e+00 : f32
    %23 = vector.broadcast %cst_18 : f32 to vector<8x8xf32>
    %24 = arith.maximumf %22, %23 : vector<8x8xf32>
    %c0_19 = arith.constant 0 : index
    %c0_20 = arith.constant 0 : index
    %25 = vector.load %arg8[%c0_19, %c0_20] : memref<19x16xf32, #tpu.memory_space<vmem>>, vector<19x16xf32>
    %c0_21 = arith.constant 0 : index
    %c0_22 = arith.constant 0 : index
    %26 = vector.load %arg9[%c0_21, %c0_22] : memref<1x16xf32, #tpu.memory_space<vmem>>, vector<1x16xf32>
    %c0_23 = arith.constant 0 : index
    %c0_24 = arith.constant 0 : index
    %27 = vector.load %arg10[%c0_23, %c0_24] : memref<24x16xf32, #tpu.memory_space<vmem>>, vector<24x16xf32>
    %c0_25 = arith.constant 0 : index
    %c0_26 = arith.constant 0 : index
    %28 = vector.load %arg11[%c0_25, %c0_26] : memref<1x16xf32, #tpu.memory_space<vmem>>, vector<1x16xf32>
    %cst_27 = arith.constant dense<0.000000e+00> : vector<8x8xf32>
    %29 = tpu.matmul %1, %24, %cst_27 {dimension_numbers = #tpu.dot_dimension_numbers<[1], [0], [0], [1], [0, 0, 1, 1], [], []>} : vector<8x8xf32>, vector<8x8xf32>, vector<8x8xf32> -> vector<8x8xf32>
    %30 = tpu.concatenate %24, %29, %0 in 1 : vector<8x8xf32>, vector<8x8xf32>, vector<8x3xf32> -> vector<8x19xf32>
    %cst_28 = arith.constant dense<0.000000e+00> : vector<8x16xf32>
    %31 = tpu.matmul %30, %25, %cst_28 {dimension_numbers = #tpu.dot_dimension_numbers<[1], [0], [0], [1], [0, 0, 1, 1], [], []>} : vector<8x19xf32>, vector<19x16xf32>, vector<8x16xf32> -> vector<8x16xf32>
    %32 = vector.broadcast %26 : vector<1x16xf32> to vector<8x16xf32>
    %33 = arith.addf %31, %32 : vector<8x16xf32>
    %cst_29 = arith.constant 0.000000e+00 : f32
    %34 = vector.broadcast %cst_29 : f32 to vector<8x16xf32>
    %35 = arith.maximumf %33, %34 : vector<8x16xf32>
    %36 = tpu.concatenate %35, %24 in 1 : vector<8x16xf32>, vector<8x8xf32> -> vector<8x24xf32>
    %cst_30 = arith.constant dense<0.000000e+00> : vector<8x16xf32>
    %37 = tpu.matmul %36, %27, %cst_30 {dimension_numbers = #tpu.dot_dimension_numbers<[1], [0], [0], [1], [0, 0, 1, 1], [], []>} : vector<8x24xf32>, vector<24x16xf32>, vector<8x16xf32> -> vector<8x16xf32>
    %38 = vector.broadcast %28 : vector<1x16xf32> to vector<8x16xf32>
    %39 = arith.addf %37, %38 : vector<8x16xf32>
    %c0_31 = arith.constant 0 : index
    %c0_32 = arith.constant 0 : index
    %40 = vector.load %arg12[%c0_31, %c0_32] : memref<1x16xf32, #tpu.memory_space<vmem>>, vector<1x16xf32>
    %c0_33 = arith.constant 0 : index
    %c0_34 = arith.constant 0 : index
    %41 = vector.load %arg13[%c0_33, %c0_34] : memref<1x16xf32, #tpu.memory_space<vmem>>, vector<1x16xf32>
    %42 = vector.broadcast %40 : vector<1x16xf32> to vector<8x16xf32>
    %43 = arith.mulf %39, %42 : vector<8x16xf32>
    %44 = vector.broadcast %41 : vector<1x16xf32> to vector<8x16xf32>
    %45 = arith.addf %43, %44 : vector<8x16xf32>
    %cst_35 = arith.constant 0.000000e+00 : f32
    %46 = vector.broadcast %cst_35 : f32 to vector<8x16xf32>
    %47 = arith.maximumf %45, %46 : vector<8x16xf32>
    %c0_36 = arith.constant 0 : index
    %c0_37 = arith.constant 0 : index
    %48 = vector.load %arg14[%c0_36, %c0_37] : memref<35x128xf32, #tpu.memory_space<vmem>>, vector<35x128xf32>
    %c0_38 = arith.constant 0 : index
    %c0_39 = arith.constant 0 : index
    %49 = vector.load %arg15[%c0_38, %c0_39] : memref<1x128xf32, #tpu.memory_space<vmem>>, vector<1x128xf32>
    %c0_40 = arith.constant 0 : index
    %c0_41 = arith.constant 0 : index
    %50 = vector.load %arg16[%c0_40, %c0_41] : memref<144x128xf32, #tpu.memory_space<vmem>>, vector<144x128xf32>
    %c0_42 = arith.constant 0 : index
    %c0_43 = arith.constant 0 : index
    %51 = vector.load %arg17[%c0_42, %c0_43] : memref<1x128xf32, #tpu.memory_space<vmem>>, vector<1x128xf32>
    %cst_44 = arith.constant dense<0.000000e+00> : vector<8x16xf32>
    %52 = tpu.matmul %1, %47, %cst_44 {dimension_numbers = #tpu.dot_dimension_numbers<[1], [0], [0], [1], [0, 0, 1, 1], [], []>} : vector<8x8xf32>, vector<8x16xf32>, vector<8x16xf32> -> vector<8x16xf32>
    %53 = tpu.concatenate %47, %52, %0 in 1 : vector<8x16xf32>, vector<8x16xf32>, vector<8x3xf32> -> vector<8x35xf32>
    %cst_45 = arith.constant dense<0.000000e+00> : vector<8x128xf32>
    %54 = tpu.matmul %53, %48, %cst_45 {dimension_numbers = #tpu.dot_dimension_numbers<[1], [0], [0], [1], [0, 0, 1, 1], [], []>} : vector<8x35xf32>, vector<35x128xf32>, vector<8x128xf32> -> vector<8x128xf32>
    %55 = vector.broadcast %49 : vector<1x128xf32> to vector<8x128xf32>
    %56 = arith.addf %54, %55 : vector<8x128xf32>
    %cst_46 = arith.constant 0.000000e+00 : f32
    %57 = vector.broadcast %cst_46 : f32 to vector<8x128xf32>
    %58 = arith.maximumf %56, %57 : vector<8x128xf32>
    %59 = tpu.concatenate %58, %47 in 1 : vector<8x128xf32>, vector<8x16xf32> -> vector<8x144xf32>
    %cst_47 = arith.constant dense<0.000000e+00> : vector<8x128xf32>
    %60 = tpu.matmul %59, %50, %cst_47 {dimension_numbers = #tpu.dot_dimension_numbers<[1], [0], [0], [1], [0, 0, 1, 1], [], []>} : vector<8x144xf32>, vector<144x128xf32>, vector<8x128xf32> -> vector<8x128xf32>
    %61 = vector.broadcast %51 : vector<1x128xf32> to vector<8x128xf32>
    %62 = arith.addf %60, %61 : vector<8x128xf32>
    %cst_48 = arith.constant dense<0.000000e+00> : vector<8x128xf32>
    %63 = tpu.matmul %1, %62, %cst_48 {dimension_numbers = #tpu.dot_dimension_numbers<[1], [0], [0], [1], [0, 0, 1, 1], [], []>} : vector<8x8xf32>, vector<8x128xf32>, vector<8x128xf32> -> vector<8x128xf32>
    %64 = arith.addf %62, %63 : vector<8x128xf32>
    %c0_49 = arith.constant 0 : index
    %c0_50 = arith.constant 0 : index
    %65 = vector.load %arg18[%c0_49, %c0_50] : memref<8x128xf32, #tpu.memory_space<vmem>>, vector<8x128xf32>
    tpu.vector_store %arg18[%c0_49, %c0_50], %64 {strides = array<i32>} : memref<8x128xf32, #tpu.memory_space<vmem>>, vector<8x128xf32>,
    return
  }
}

module attributes {stable_mosaic.version = 11 : i64} {
  func.func @_graph2masks_kernel(%arg0: memref<8x8x16xf32, #tpu.memory_space<vmem>>, %arg1: memref<4x8x16x64xf32, #tpu.memory_space<vmem>>, %arg2: memref<4x1x1xf32, #tpu.memory_space<vmem>>, %arg3: memref<8x1x1xf32, #tpu.memory_space<vmem>>, %arg4: memref<8x1x1xf32, #tpu.memory_space<vmem>>, %arg5: memref<4x4x64x256xf32, #tpu.memory_space<vmem>>, %arg6: memref<4x1x1xf32, #tpu.memory_space<vmem>>, %arg7: memref<4x1x1xf32, #tpu.memory_space<vmem>>, %arg8: memref<4x1x1xf32, #tpu.memory_space<vmem>>, %arg9: memref<4x256x256xf32, #tpu.memory_space<vmem>>, %arg10: memref<1x1xf32, #tpu.memory_space<vmem>>, %arg11: memref<4x1x1xf32, #tpu.memory_space<vmem>>, %arg12: memref<4x1x1xf32, #tpu.memory_space<vmem>>, %arg13: memref<2x8xf32, #tpu.memory_space<vmem>>, %arg14: memref<8x256xf32, #tpu.memory_space<vmem>>, %arg15: memref<2x256xf32, #tpu.memory_space<vmem>>) attributes {dimension_semantics = [], scalar_prefetch = 0 : i64, scratch_operands = 0 : i64, tpu.core_type = #tpu.core_type<tc>} {
    %c0 = arith.constant 0 : index
    %c0_0 = arith.constant 0 : index
    %c0_1 = arith.constant 0 : index
    %0 = vector.load %arg0[%c0, %c0_0, %c0_1] : memref<8x8x16xf32, #tpu.memory_space<vmem>>, vector<1x8x16xf32>
    %1 = vector.shape_cast %0 : vector<1x8x16xf32> to vector<8x16xf32>
    %c0_2 = arith.constant 0 : index
    %c0_3 = arith.constant 0 : index
    %c0_4 = arith.constant 0 : index
    %2 = vector.load %arg3[%c0_2, %c0_3, %c0_4] : memref<8x1x1xf32, #tpu.memory_space<vmem>>, vector<1x1x1xf32>
    %3 = vector.shape_cast %2 : vector<1x1x1xf32> to vector<1x1xf32>
    %4 = vector.broadcast %3 : vector<1x1xf32> to vector<8x16xf32>
    %5 = arith.mulf %1, %4 : vector<8x16xf32>
    %c0_5 = arith.constant 0 : index
    %c0_6 = arith.constant 0 : index
    %c0_7 = arith.constant 0 : index
    %6 = vector.load %arg4[%c0_5, %c0_6, %c0_7] : memref<8x1x1xf32, #tpu.memory_space<vmem>>, vector<1x1x1xf32>
    %7 = vector.shape_cast %6 : vector<1x1x1xf32> to vector<1x1xf32>
    %8 = vector.broadcast %7 : vector<1x1xf32> to vector<8x16xf32>
    %9 = arith.addf %5, %8 : vector<8x16xf32>
    %cst = arith.constant 0.000000e+00 : f32
    %10 = vector.broadcast %cst : f32 to vector<8x16xf32>
    %11 = arith.maximumf %9, %10 : vector<8x16xf32>
    %c1 = arith.constant 1 : index
    %c0_8 = arith.constant 0 : index
    %c0_9 = arith.constant 0 : index
    %12 = vector.load %arg0[%c1, %c0_8, %c0_9] : memref<8x8x16xf32, #tpu.memory_space<vmem>>, vector<1x8x16xf32>
    %13 = vector.shape_cast %12 : vector<1x8x16xf32> to vector<8x16xf32>
    %c1_10 = arith.constant 1 : index
    %c0_11 = arith.constant 0 : index
    %c0_12 = arith.constant 0 : index
    %14 = vector.load %arg3[%c1_10, %c0_11, %c0_12] : memref<8x1x1xf32, #tpu.memory_space<vmem>>, vector<1x1x1xf32>
    %15 = vector.shape_cast %14 : vector<1x1x1xf32> to vector<1x1xf32>
    %16 = vector.broadcast %15 : vector<1x1xf32> to vector<8x16xf32>
    %17 = arith.mulf %13, %16 : vector<8x16xf32>
    %c1_13 = arith.constant 1 : index
    %c0_14 = arith.constant 0 : index
    %c0_15 = arith.constant 0 : index
    %18 = vector.load %arg4[%c1_13, %c0_14, %c0_15] : memref<8x1x1xf32, #tpu.memory_space<vmem>>, vector<1x1x1xf32>
    %19 = vector.shape_cast %18 : vector<1x1x1xf32> to vector<1x1xf32>
    %20 = vector.broadcast %19 : vector<1x1xf32> to vector<8x16xf32>
    %21 = arith.addf %17, %20 : vector<8x16xf32>
    %cst_16 = arith.constant 0.000000e+00 : f32
    %22 = vector.broadcast %cst_16 : f32 to vector<8x16xf32>
    %23 = arith.maximumf %21, %22 : vector<8x16xf32>
    %c2 = arith.constant 2 : index
    %c0_17 = arith.constant 0 : index
    %c0_18 = arith.constant 0 : index
    %24 = vector.load %arg0[%c2, %c0_17, %c0_18] : memref<8x8x16xf32, #tpu.memory_space<vmem>>, vector<1x8x16xf32>
    %25 = vector.shape_cast %24 : vector<1x8x16xf32> to vector<8x16xf32>
    %c2_19 = arith.constant 2 : index
    %c0_20 = arith.constant 0 : index
    %c0_21 = arith.constant 0 : index
    %26 = vector.load %arg3[%c2_19, %c0_20, %c0_21] : memref<8x1x1xf32, #tpu.memory_space<vmem>>, vector<1x1x1xf32>
    %27 = vector.shape_cast %26 : vector<1x1x1xf32> to vector<1x1xf32>
    %28 = vector.broadcast %27 : vector<1x1xf32> to vector<8x16xf32>
    %29 = arith.mulf %25, %28 : vector<8x16xf32>
    %c2_22 = arith.constant 2 : index
    %c0_23 = arith.constant 0 : index
    %c0_24 = arith.constant 0 : index
    %30 = vector.load %arg4[%c2_22, %c0_23, %c0_24] : memref<8x1x1xf32, #tpu.memory_space<vmem>>, vector<1x1x1xf32>
    %31 = vector.shape_cast %30 : vector<1x1x1xf32> to vector<1x1xf32>
    %32 = vector.broadcast %31 : vector<1x1xf32> to vector<8x16xf32>
    %33 = arith.addf %29, %32 : vector<8x16xf32>
    %cst_25 = arith.constant 0.000000e+00 : f32
    %34 = vector.broadcast %cst_25 : f32 to vector<8x16xf32>
    %35 = arith.maximumf %33, %34 : vector<8x16xf32>
    %c3 = arith.constant 3 : index
    %c0_26 = arith.constant 0 : index
    %c0_27 = arith.constant 0 : index
    %36 = vector.load %arg0[%c3, %c0_26, %c0_27] : memref<8x8x16xf32, #tpu.memory_space<vmem>>, vector<1x8x16xf32>
    %37 = vector.shape_cast %36 : vector<1x8x16xf32> to vector<8x16xf32>
    %c3_28 = arith.constant 3 : index
    %c0_29 = arith.constant 0 : index
    %c0_30 = arith.constant 0 : index
    %38 = vector.load %arg3[%c3_28, %c0_29, %c0_30] : memref<8x1x1xf32, #tpu.memory_space<vmem>>, vector<1x1x1xf32>
    %39 = vector.shape_cast %38 : vector<1x1x1xf32> to vector<1x1xf32>
    %40 = vector.broadcast %39 : vector<1x1xf32> to vector<8x16xf32>
    %41 = arith.mulf %37, %40 : vector<8x16xf32>
    %c3_31 = arith.constant 3 : index
    %c0_32 = arith.constant 0 : index
    %c0_33 = arith.constant 0 : index
    %42 = vector.load %arg4[%c3_31, %c0_32, %c0_33] : memref<8x1x1xf32, #tpu.memory_space<vmem>>, vector<1x1x1xf32>
    %43 = vector.shape_cast %42 : vector<1x1x1xf32> to vector<1x1xf32>
    %44 = vector.broadcast %43 : vector<1x1xf32> to vector<8x16xf32>
    %45 = arith.addf %41, %44 : vector<8x16xf32>
    %cst_34 = arith.constant 0.000000e+00 : f32
    %46 = vector.broadcast %cst_34 : f32 to vector<8x16xf32>
    %47 = arith.maximumf %45, %46 : vector<8x16xf32>
    %c4 = arith.constant 4 : index
    %c0_35 = arith.constant 0 : index
    %c0_36 = arith.constant 0 : index
    %48 = vector.load %arg0[%c4, %c0_35, %c0_36] : memref<8x8x16xf32, #tpu.memory_space<vmem>>, vector<1x8x16xf32>
    %49 = vector.shape_cast %48 : vector<1x8x16xf32> to vector<8x16xf32>
    %c4_37 = arith.constant 4 : index
    %c0_38 = arith.constant 0 : index
    %c0_39 = arith.constant 0 : index
    %50 = vector.load %arg3[%c4_37, %c0_38, %c0_39] : memref<8x1x1xf32, #tpu.memory_space<vmem>>, vector<1x1x1xf32>
    %51 = vector.shape_cast %50 : vector<1x1x1xf32> to vector<1x1xf32>
    %52 = vector.broadcast %51 : vector<1x1xf32> to vector<8x16xf32>
    %53 = arith.mulf %49, %52 : vector<8x16xf32>
    %c4_40 = arith.constant 4 : index
    %c0_41 = arith.constant 0 : index
    %c0_42 = arith.constant 0 : index
    %54 = vector.load %arg4[%c4_40, %c0_41, %c0_42] : memref<8x1x1xf32, #tpu.memory_space<vmem>>, vector<1x1x1xf32>
    %55 = vector.shape_cast %54 : vector<1x1x1xf32> to vector<1x1xf32>
    %56 = vector.broadcast %55 : vector<1x1xf32> to vector<8x16xf32>
    %57 = arith.addf %53, %56 : vector<8x16xf32>
    %cst_43 = arith.constant 0.000000e+00 : f32
    %58 = vector.broadcast %cst_43 : f32 to vector<8x16xf32>
    %59 = arith.maximumf %57, %58 : vector<8x16xf32>
    %c5 = arith.constant 5 : index
    %c0_44 = arith.constant 0 : index
    %c0_45 = arith.constant 0 : index
    %60 = vector.load %arg0[%c5, %c0_44, %c0_45] : memref<8x8x16xf32, #tpu.memory_space<vmem>>, vector<1x8x16xf32>
    %61 = vector.shape_cast %60 : vector<1x8x16xf32> to vector<8x16xf32>
    %c5_46 = arith.constant 5 : index
    %c0_47 = arith.constant 0 : index
    %c0_48 = arith.constant 0 : index
    %62 = vector.load %arg3[%c5_46, %c0_47, %c0_48] : memref<8x1x1xf32, #tpu.memory_space<vmem>>, vector<1x1x1xf32>
    %63 = vector.shape_cast %62 : vector<1x1x1xf32> to vector<1x1xf32>
    %64 = vector.broadcast %63 : vector<1x1xf32> to vector<8x16xf32>
    %65 = arith.mulf %61, %64 : vector<8x16xf32>
    %c5_49 = arith.constant 5 : index
    %c0_50 = arith.constant 0 : index
    %c0_51 = arith.constant 0 : index
    %66 = vector.load %arg4[%c5_49, %c0_50, %c0_51] : memref<8x1x1xf32, #tpu.memory_space<vmem>>, vector<1x1x1xf32>
    %67 = vector.shape_cast %66 : vector<1x1x1xf32> to vector<1x1xf32>
    %68 = vector.broadcast %67 : vector<1x1xf32> to vector<8x16xf32>
    %69 = arith.addf %65, %68 : vector<8x16xf32>
    %cst_52 = arith.constant 0.000000e+00 : f32
    %70 = vector.broadcast %cst_52 : f32 to vector<8x16xf32>
    %71 = arith.maximumf %69, %70 : vector<8x16xf32>
    %c6 = arith.constant 6 : index
    %c0_53 = arith.constant 0 : index
    %c0_54 = arith.constant 0 : index
    %72 = vector.load %arg0[%c6, %c0_53, %c0_54] : memref<8x8x16xf32, #tpu.memory_space<vmem>>, vector<1x8x16xf32>
    %73 = vector.shape_cast %72 : vector<1x8x16xf32> to vector<8x16xf32>
    %c6_55 = arith.constant 6 : index
    %c0_56 = arith.constant 0 : index
    %c0_57 = arith.constant 0 : index
    %74 = vector.load %arg3[%c6_55, %c0_56, %c0_57] : memref<8x1x1xf32, #tpu.memory_space<vmem>>, vector<1x1x1xf32>
    %75 = vector.shape_cast %74 : vector<1x1x1xf32> to vector<1x1xf32>
    %76 = vector.broadcast %75 : vector<1x1xf32> to vector<8x16xf32>
    %77 = arith.mulf %73, %76 : vector<8x16xf32>
    %c6_58 = arith.constant 6 : index
    %c0_59 = arith.constant 0 : index
    %c0_60 = arith.constant 0 : index
    %78 = vector.load %arg4[%c6_58, %c0_59, %c0_60] : memref<8x1x1xf32, #tpu.memory_space<vmem>>, vector<1x1x1xf32>
    %79 = vector.shape_cast %78 : vector<1x1x1xf32> to vector<1x1xf32>
    %80 = vector.broadcast %79 : vector<1x1xf32> to vector<8x16xf32>
    %81 = arith.addf %77, %80 : vector<8x16xf32>
    %cst_61 = arith.constant 0.000000e+00 : f32
    %82 = vector.broadcast %cst_61 : f32 to vector<8x16xf32>
    %83 = arith.maximumf %81, %82 : vector<8x16xf32>
    %c7 = arith.constant 7 : index
    %c0_62 = arith.constant 0 : index
    %c0_63 = arith.constant 0 : index
    %84 = vector.load %arg0[%c7, %c0_62, %c0_63] : memref<8x8x16xf32, #tpu.memory_space<vmem>>, vector<1x8x16xf32>
    %85 = vector.shape_cast %84 : vector<1x8x16xf32> to vector<8x16xf32>
    %c7_64 = arith.constant 7 : index
    %c0_65 = arith.constant 0 : index
    %c0_66 = arith.constant 0 : index
    %86 = vector.load %arg3[%c7_64, %c0_65, %c0_66] : memref<8x1x1xf32, #tpu.memory_space<vmem>>, vector<1x1x1xf32>
    %87 = vector.shape_cast %86 : vector<1x1x1xf32> to vector<1x1xf32>
    %88 = vector.broadcast %87 : vector<1x1xf32> to vector<8x16xf32>
    %89 = arith.mulf %85, %88 : vector<8x16xf32>
    %c7_67 = arith.constant 7 : index
    %c0_68 = arith.constant 0 : index
    %c0_69 = arith.constant 0 : index
    %90 = vector.load %arg4[%c7_67, %c0_68, %c0_69] : memref<8x1x1xf32, #tpu.memory_space<vmem>>, vector<1x1x1xf32>
    %91 = vector.shape_cast %90 : vector<1x1x1xf32> to vector<1x1xf32>
    %92 = vector.broadcast %91 : vector<1x1xf32> to vector<8x16xf32>
    %93 = arith.addf %89, %92 : vector<8x16xf32>
    %cst_70 = arith.constant 0.000000e+00 : f32
    %94 = vector.broadcast %cst_70 : f32 to vector<8x16xf32>
    %95 = arith.maximumf %93, %94 : vector<8x16xf32>
    %c0_71 = arith.constant 0 : index
    %c0_72 = arith.constant 0 : index
    %c0_73 = arith.constant 0 : index
    %c0_74 = arith.constant 0 : index
    %96 = vector.load %arg1[%c0_71, %c0_72, %c0_73, %c0_74] : memref<4x8x16x64xf32, #tpu.memory_space<vmem>>, vector<1x1x16x64xf32>
    %97 = vector.shape_cast %96 : vector<1x1x16x64xf32> to vector<16x64xf32>
    %cst_75 = arith.constant dense<0.000000e+00> : vector<8x64xf32>
    %98 = tpu.matmul %11, %97, %cst_75 {dimension_numbers = #tpu.dot_dimension_numbers<[1], [0], [0], [1], [0, 0, 1, 1], [], []>} : vector<8x16xf32>, vector<16x64xf32>, vector<8x64xf32> -> vector<8x64xf32>
    %c0_76 = arith.constant 0 : index
    %c1_77 = arith.constant 1 : index
    %c0_78 = arith.constant 0 : index
    %c0_79 = arith.constant 0 : index
    %99 = vector.load %arg1[%c0_76, %c1_77, %c0_78, %c0_79] : memref<4x8x16x64xf32, #tpu.memory_space<vmem>>, vector<1x1x16x64xf32>
    %100 = vector.shape_cast %99 : vector<1x1x16x64xf32> to vector<16x64xf32>
    %cst_80 = arith.constant dense<0.000000e+00> : vector<8x64xf32>
    %101 = tpu.matmul %23, %100, %cst_80 {dimension_numbers = #tpu.dot_dimension_numbers<[1], [0], [0], [1], [0, 0, 1, 1], [], []>} : vector<8x16xf32>, vector<16x64xf32>, vector<8x64xf32> -> vector<8x64xf32>
    %102 = arith.addf %98, %101 : vector<8x64xf32>
    %c0_81 = arith.constant 0 : index
    %c2_82 = arith.constant 2 : index
    %c0_83 = arith.constant 0 : index
    %c0_84 = arith.constant 0 : index
    %103 = vector.load %arg1[%c0_81, %c2_82, %c0_83, %c0_84] : memref<4x8x16x64xf32, #tpu.memory_space<vmem>>, vector<1x1x16x64xf32>
    %104 = vector.shape_cast %103 : vector<1x1x16x64xf32> to vector<16x64xf32>
    %cst_85 = arith.constant dense<0.000000e+00> : vector<8x64xf32>
    %105 = tpu.matmul %35, %104, %cst_85 {dimension_numbers = #tpu.dot_dimension_numbers<[1], [0], [0], [1], [0, 0, 1, 1], [], []>} : vector<8x16xf32>, vector<16x64xf32>, vector<8x64xf32> -> vector<8x64xf32>
    %106 = arith.addf %102, %105 : vector<8x64xf32>
    %c0_86 = arith.constant 0 : index
    %c3_87 = arith.constant 3 : index
    %c0_88 = arith.constant 0 : index
    %c0_89 = arith.constant 0 : index
    %107 = vector.load %arg1[%c0_86, %c3_87, %c0_88, %c0_89] : memref<4x8x16x64xf32, #tpu.memory_space<vmem>>, vector<1x1x16x64xf32>
    %108 = vector.shape_cast %107 : vector<1x1x16x64xf32> to vector<16x64xf32>
    %cst_90 = arith.constant dense<0.000000e+00> : vector<8x64xf32>
    %109 = tpu.matmul %47, %108, %cst_90 {dimension_numbers = #tpu.dot_dimension_numbers<[1], [0], [0], [1], [0, 0, 1, 1], [], []>} : vector<8x16xf32>, vector<16x64xf32>, vector<8x64xf32> -> vector<8x64xf32>
    %110 = arith.addf %106, %109 : vector<8x64xf32>
    %c0_91 = arith.constant 0 : index
    %c4_92 = arith.constant 4 : index
    %c0_93 = arith.constant 0 : index
    %c0_94 = arith.constant 0 : index
    %111 = vector.load %arg1[%c0_91, %c4_92, %c0_93, %c0_94] : memref<4x8x16x64xf32, #tpu.memory_space<vmem>>, vector<1x1x16x64xf32>
    %112 = vector.shape_cast %111 : vector<1x1x16x64xf32> to vector<16x64xf32>
    %cst_95 = arith.constant dense<0.000000e+00> : vector<8x64xf32>
    %113 = tpu.matmul %59, %112, %cst_95 {dimension_numbers = #tpu.dot_dimension_numbers<[1], [0], [0], [1], [0, 0, 1, 1], [], []>} : vector<8x16xf32>, vector<16x64xf32>, vector<8x64xf32> -> vector<8x64xf32>
    %114 = arith.addf %110, %113 : vector<8x64xf32>
    %c0_96 = arith.constant 0 : index
    %c5_97 = arith.constant 5 : index
    %c0_98 = arith.constant 0 : index
    %c0_99 = arith.constant 0 : index
    %115 = vector.load %arg1[%c0_96, %c5_97, %c0_98, %c0_99] : memref<4x8x16x64xf32, #tpu.memory_space<vmem>>, vector<1x1x16x64xf32>
    %116 = vector.shape_cast %115 : vector<1x1x16x64xf32> to vector<16x64xf32>
    %cst_100 = arith.constant dense<0.000000e+00> : vector<8x64xf32>
    %117 = tpu.matmul %71, %116, %cst_100 {dimension_numbers = #tpu.dot_dimension_numbers<[1], [0], [0], [1], [0, 0, 1, 1], [], []>} : vector<8x16xf32>, vector<16x64xf32>, vector<8x64xf32> -> vector<8x64xf32>
    %118 = arith.addf %114, %117 : vector<8x64xf32>
    %c0_101 = arith.constant 0 : index
    %c6_102 = arith.constant 6 : index
    %c0_103 = arith.constant 0 : index
    %c0_104 = arith.constant 0 : index
    %119 = vector.load %arg1[%c0_101, %c6_102, %c0_103, %c0_104] : memref<4x8x16x64xf32, #tpu.memory_space<vmem>>, vector<1x1x16x64xf32>
    %120 = vector.shape_cast %119 : vector<1x1x16x64xf32> to vector<16x64xf32>
    %cst_105 = arith.constant dense<0.000000e+00> : vector<8x64xf32>
    %121 = tpu.matmul %83, %120, %cst_105 {dimension_numbers = #tpu.dot_dimension_numbers<[1], [0], [0], [1], [0, 0, 1, 1], [], []>} : vector<8x16xf32>, vector<16x64xf32>, vector<8x64xf32> -> vector<8x64xf32>
    %122 = arith.addf %118, %121 : vector<8x64xf32>
    %c0_106 = arith.constant 0 : index
    %c7_107 = arith.constant 7 : index
    %c0_108 = arith.constant 0 : index
    %c0_109 = arith.constant 0 : index
    %123 = vector.load %arg1[%c0_106, %c7_107, %c0_108, %c0_109] : memref<4x8x16x64xf32, #tpu.memory_space<vmem>>, vector<1x1x16x64xf32>
    %124 = vector.shape_cast %123 : vector<1x1x16x64xf32> to vector<16x64xf32>
    %cst_110 = arith.constant dense<0.000000e+00> : vector<8x64xf32>
    %125 = tpu.matmul %95, %124, %cst_110 {dimension_numbers = #tpu.dot_dimension_numbers<[1], [0], [0], [1], [0, 0, 1, 1], [], []>} : vector<8x16xf32>, vector<16x64xf32>, vector<8x64xf32> -> vector<8x64xf32>
    %126 = arith.addf %122, %125 : vector<8x64xf32>
    %c0_111 = arith.constant 0 : index
    %c0_112 = arith.constant 0 : index
    %c0_113 = arith.constant 0 : index
    %127 = vector.load %arg2[%c0_111, %c0_112, %c0_113] : memref<4x1x1xf32, #tpu.memory_space<vmem>>, vector<1x1x1xf32>
    %128 = vector.shape_cast %127 : vector<1x1x1xf32> to vector<1x1xf32>
    %129 = vector.broadcast %128 : vector<1x1xf32> to vector<8x64xf32>
    %130 = arith.addf %126, %129 : vector<8x64xf32>
    %c1_114 = arith.constant 1 : index
    %c0_115 = arith.constant 0 : index
    %c0_116 = arith.constant 0 : index
    %c0_117 = arith.constant 0 : index
    %131 = vector.load %arg1[%c1_114, %c0_115, %c0_116, %c0_117] : memref<4x8x16x64xf32, #tpu.memory_space<vmem>>, vector<1x1x16x64xf32>
    %132 = vector.shape_cast %131 : vector<1x1x16x64xf32> to vector<16x64xf32>
    %cst_118 = arith.constant dense<0.000000e+00> : vector<8x64xf32>
    %133 = tpu.matmul %11, %132, %cst_118 {dimension_numbers = #tpu.dot_dimension_numbers<[1], [0], [0], [1], [0, 0, 1, 1], [], []>} : vector<8x16xf32>, vector<16x64xf32>, vector<8x64xf32> -> vector<8x64xf32>
    %c1_119 = arith.constant 1 : index
    %c1_120 = arith.constant 1 : index
    %c0_121 = arith.constant 0 : index
    %c0_122 = arith.constant 0 : index
    %134 = vector.load %arg1[%c1_119, %c1_120, %c0_121, %c0_122] : memref<4x8x16x64xf32, #tpu.memory_space<vmem>>, vector<1x1x16x64xf32>
    %135 = vector.shape_cast %134 : vector<1x1x16x64xf32> to vector<16x64xf32>
    %cst_123 = arith.constant dense<0.000000e+00> : vector<8x64xf32>
    %136 = tpu.matmul %23, %135, %cst_123 {dimension_numbers = #tpu.dot_dimension_numbers<[1], [0], [0], [1], [0, 0, 1, 1], [], []>} : vector<8x16xf32>, vector<16x64xf32>, vector<8x64xf32> -> vector<8x64xf32>
    %137 = arith.addf %133, %136 : vector<8x64xf32>
    %c1_124 = arith.constant 1 : index
    %c2_125 = arith.constant 2 : index
    %c0_126 = arith.constant 0 : index
    %c0_127 = arith.constant 0 : index
    %138 = vector.load %arg1[%c1_124, %c2_125, %c0_126, %c0_127] : memref<4x8x16x64xf32, #tpu.memory_space<vmem>>, vector<1x1x16x64xf32>
    %139 = vector.shape_cast %138 : vector<1x1x16x64xf32> to vector<16x64xf32>
    %cst_128 = arith.constant dense<0.000000e+00> : vector<8x64xf32>
    %140 = tpu.matmul %35, %139, %cst_128 {dimension_numbers = #tpu.dot_dimension_numbers<[1], [0], [0], [1], [0, 0, 1, 1], [], []>} : vector<8x16xf32>, vector<16x64xf32>, vector<8x64xf32> -> vector<8x64xf32>
    %141 = arith.addf %137, %140 : vector<8x64xf32>
    %c1_129 = arith.constant 1 : index
    %c3_130 = arith.constant 3 : index
    %c0_131 = arith.constant 0 : index
    %c0_132 = arith.constant 0 : index
    %142 = vector.load %arg1[%c1_129, %c3_130, %c0_131, %c0_132] : memref<4x8x16x64xf32, #tpu.memory_space<vmem>>, vector<1x1x16x64xf32>
    %143 = vector.shape_cast %142 : vector<1x1x16x64xf32> to vector<16x64xf32>
    %cst_133 = arith.constant dense<0.000000e+00> : vector<8x64xf32>
    %144 = tpu.matmul %47, %143, %cst_133 {dimension_numbers = #tpu.dot_dimension_numbers<[1], [0], [0], [1], [0, 0, 1, 1], [], []>} : vector<8x16xf32>, vector<16x64xf32>, vector<8x64xf32> -> vector<8x64xf32>
    %145 = arith.addf %141, %144 : vector<8x64xf32>
    %c1_134 = arith.constant 1 : index
    %c4_135 = arith.constant 4 : index
    %c0_136 = arith.constant 0 : index
    %c0_137 = arith.constant 0 : index
    %146 = vector.load %arg1[%c1_134, %c4_135, %c0_136, %c0_137] : memref<4x8x16x64xf32, #tpu.memory_space<vmem>>, vector<1x1x16x64xf32>
    %147 = vector.shape_cast %146 : vector<1x1x16x64xf32> to vector<16x64xf32>
    %cst_138 = arith.constant dense<0.000000e+00> : vector<8x64xf32>
    %148 = tpu.matmul %59, %147, %cst_138 {dimension_numbers = #tpu.dot_dimension_numbers<[1], [0], [0], [1], [0, 0, 1, 1], [], []>} : vector<8x16xf32>, vector<16x64xf32>, vector<8x64xf32> -> vector<8x64xf32>
    %149 = arith.addf %145, %148 : vector<8x64xf32>
    %c1_139 = arith.constant 1 : index
    %c5_140 = arith.constant 5 : index
    %c0_141 = arith.constant 0 : index
    %c0_142 = arith.constant 0 : index
    %150 = vector.load %arg1[%c1_139, %c5_140, %c0_141, %c0_142] : memref<4x8x16x64xf32, #tpu.memory_space<vmem>>, vector<1x1x16x64xf32>
    %151 = vector.shape_cast %150 : vector<1x1x16x64xf32> to vector<16x64xf32>
    %cst_143 = arith.constant dense<0.000000e+00> : vector<8x64xf32>
    %152 = tpu.matmul %71, %151, %cst_143 {dimension_numbers = #tpu.dot_dimension_numbers<[1], [0], [0], [1], [0, 0, 1, 1], [], []>} : vector<8x16xf32>, vector<16x64xf32>, vector<8x64xf32> -> vector<8x64xf32>
    %153 = arith.addf %149, %152 : vector<8x64xf32>
    %c1_144 = arith.constant 1 : index
    %c6_145 = arith.constant 6 : index
    %c0_146 = arith.constant 0 : index
    %c0_147 = arith.constant 0 : index
    %154 = vector.load %arg1[%c1_144, %c6_145, %c0_146, %c0_147] : memref<4x8x16x64xf32, #tpu.memory_space<vmem>>, vector<1x1x16x64xf32>
    %155 = vector.shape_cast %154 : vector<1x1x16x64xf32> to vector<16x64xf32>
    %cst_148 = arith.constant dense<0.000000e+00> : vector<8x64xf32>
    %156 = tpu.matmul %83, %155, %cst_148 {dimension_numbers = #tpu.dot_dimension_numbers<[1], [0], [0], [1], [0, 0, 1, 1], [], []>} : vector<8x16xf32>, vector<16x64xf32>, vector<8x64xf32> -> vector<8x64xf32>
    %157 = arith.addf %153, %156 : vector<8x64xf32>
    %c1_149 = arith.constant 1 : index
    %c7_150 = arith.constant 7 : index
    %c0_151 = arith.constant 0 : index
    %c0_152 = arith.constant 0 : index
    %158 = vector.load %arg1[%c1_149, %c7_150, %c0_151, %c0_152] : memref<4x8x16x64xf32, #tpu.memory_space<vmem>>, vector<1x1x16x64xf32>
    %159 = vector.shape_cast %158 : vector<1x1x16x64xf32> to vector<16x64xf32>
    %cst_153 = arith.constant dense<0.000000e+00> : vector<8x64xf32>
    %160 = tpu.matmul %95, %159, %cst_153 {dimension_numbers = #tpu.dot_dimension_numbers<[1], [0], [0], [1], [0, 0, 1, 1], [], []>} : vector<8x16xf32>, vector<16x64xf32>, vector<8x64xf32> -> vector<8x64xf32>
    %161 = arith.addf %157, %160 : vector<8x64xf32>
    %c1_154 = arith.constant 1 : index
    %c0_155 = arith.constant 0 : index
    %c0_156 = arith.constant 0 : index
    %162 = vector.load %arg2[%c1_154, %c0_155, %c0_156] : memref<4x1x1xf32, #tpu.memory_space<vmem>>, vector<1x1x1xf32>
    %163 = vector.shape_cast %162 : vector<1x1x1xf32> to vector<1x1xf32>
    %164 = vector.broadcast %163 : vector<1x1xf32> to vector<8x64xf32>
    %165 = arith.addf %161, %164 : vector<8x64xf32>
    %c2_157 = arith.constant 2 : index
    %c0_158 = arith.constant 0 : index
    %c0_159 = arith.constant 0 : index
    %c0_160 = arith.constant 0 : index
    %166 = vector.load %arg1[%c2_157, %c0_158, %c0_159, %c0_160] : memref<4x8x16x64xf32, #tpu.memory_space<vmem>>, vector<1x1x16x64xf32>
    %167 = vector.shape_cast %166 : vector<1x1x16x64xf32> to vector<16x64xf32>
    %cst_161 = arith.constant dense<0.000000e+00> : vector<8x64xf32>
    %168 = tpu.matmul %11, %167, %cst_161 {dimension_numbers = #tpu.dot_dimension_numbers<[1], [0], [0], [1], [0, 0, 1, 1], [], []>} : vector<8x16xf32>, vector<16x64xf32>, vector<8x64xf32> -> vector<8x64xf32>
    %c2_162 = arith.constant 2 : index
    %c1_163 = arith.constant 1 : index
    %c0_164 = arith.constant 0 : index
    %c0_165 = arith.constant 0 : index
    %169 = vector.load %arg1[%c2_162, %c1_163, %c0_164, %c0_165] : memref<4x8x16x64xf32, #tpu.memory_space<vmem>>, vector<1x1x16x64xf32>
    %170 = vector.shape_cast %169 : vector<1x1x16x64xf32> to vector<16x64xf32>
    %cst_166 = arith.constant dense<0.000000e+00> : vector<8x64xf32>
    %171 = tpu.matmul %23, %170, %cst_166 {dimension_numbers = #tpu.dot_dimension_numbers<[1], [0], [0], [1], [0, 0, 1, 1], [], []>} : vector<8x16xf32>, vector<16x64xf32>, vector<8x64xf32> -> vector<8x64xf32>
    %172 = arith.addf %168, %171 : vector<8x64xf32>
    %c2_167 = arith.constant 2 : index
    %c2_168 = arith.constant 2 : index
    %c0_169 = arith.constant 0 : index
    %c0_170 = arith.constant 0 : index
    %173 = vector.load %arg1[%c2_167, %c2_168, %c0_169, %c0_170] : memref<4x8x16x64xf32, #tpu.memory_space<vmem>>, vector<1x1x16x64xf32>
    %174 = vector.shape_cast %173 : vector<1x1x16x64xf32> to vector<16x64xf32>
    %cst_171 = arith.constant dense<0.000000e+00> : vector<8x64xf32>
    %175 = tpu.matmul %35, %174, %cst_171 {dimension_numbers = #tpu.dot_dimension_numbers<[1], [0], [0], [1], [0, 0, 1, 1], [], []>} : vector<8x16xf32>, vector<16x64xf32>, vector<8x64xf32> -> vector<8x64xf32>
    %176 = arith.addf %172, %175 : vector<8x64xf32>
    %c2_172 = arith.constant 2 : index
    %c3_173 = arith.constant 3 : index
    %c0_174 = arith.constant 0 : index
    %c0_175 = arith.constant 0 : index
    %177 = vector.load %arg1[%c2_172, %c3_173, %c0_174, %c0_175] : memref<4x8x16x64xf32, #tpu.memory_space<vmem>>, vector<1x1x16x64xf32>
    %178 = vector.shape_cast %177 : vector<1x1x16x64xf32> to vector<16x64xf32>
    %cst_176 = arith.constant dense<0.000000e+00> : vector<8x64xf32>
    %179 = tpu.matmul %47, %178, %cst_176 {dimension_numbers = #tpu.dot_dimension_numbers<[1], [0], [0], [1], [0, 0, 1, 1], [], []>} : vector<8x16xf32>, vector<16x64xf32>, vector<8x64xf32> -> vector<8x64xf32>
    %180 = arith.addf %176, %179 : vector<8x64xf32>
    %c2_177 = arith.constant 2 : index
    %c4_178 = arith.constant 4 : index
    %c0_179 = arith.constant 0 : index
    %c0_180 = arith.constant 0 : index
    %181 = vector.load %arg1[%c2_177, %c4_178, %c0_179, %c0_180] : memref<4x8x16x64xf32, #tpu.memory_space<vmem>>, vector<1x1x16x64xf32>
    %182 = vector.shape_cast %181 : vector<1x1x16x64xf32> to vector<16x64xf32>
    %cst_181 = arith.constant dense<0.000000e+00> : vector<8x64xf32>
    %183 = tpu.matmul %59, %182, %cst_181 {dimension_numbers = #tpu.dot_dimension_numbers<[1], [0], [0], [1], [0, 0, 1, 1], [], []>} : vector<8x16xf32>, vector<16x64xf32>, vector<8x64xf32> -> vector<8x64xf32>
    %184 = arith.addf %180, %183 : vector<8x64xf32>
    %c2_182 = arith.constant 2 : index
    %c5_183 = arith.constant 5 : index
    %c0_184 = arith.constant 0 : index
    %c0_185 = arith.constant 0 : index
    %185 = vector.load %arg1[%c2_182, %c5_183, %c0_184, %c0_185] : memref<4x8x16x64xf32, #tpu.memory_space<vmem>>, vector<1x1x16x64xf32>
    %186 = vector.shape_cast %185 : vector<1x1x16x64xf32> to vector<16x64xf32>
    %cst_186 = arith.constant dense<0.000000e+00> : vector<8x64xf32>
    %187 = tpu.matmul %71, %186, %cst_186 {dimension_numbers = #tpu.dot_dimension_numbers<[1], [0], [0], [1], [0, 0, 1, 1], [], []>} : vector<8x16xf32>, vector<16x64xf32>, vector<8x64xf32> -> vector<8x64xf32>
    %188 = arith.addf %184, %187 : vector<8x64xf32>
    %c2_187 = arith.constant 2 : index
    %c6_188 = arith.constant 6 : index
    %c0_189 = arith.constant 0 : index
    %c0_190 = arith.constant 0 : index
    %189 = vector.load %arg1[%c2_187, %c6_188, %c0_189, %c0_190] : memref<4x8x16x64xf32, #tpu.memory_space<vmem>>, vector<1x1x16x64xf32>
    %190 = vector.shape_cast %189 : vector<1x1x16x64xf32> to vector<16x64xf32>
    %cst_191 = arith.constant dense<0.000000e+00> : vector<8x64xf32>
    %191 = tpu.matmul %83, %190, %cst_191 {dimension_numbers = #tpu.dot_dimension_numbers<[1], [0], [0], [1], [0, 0, 1, 1], [], []>} : vector<8x16xf32>, vector<16x64xf32>, vector<8x64xf32> -> vector<8x64xf32>
    %192 = arith.addf %188, %191 : vector<8x64xf32>
    %c2_192 = arith.constant 2 : index
    %c7_193 = arith.constant 7 : index
    %c0_194 = arith.constant 0 : index
    %c0_195 = arith.constant 0 : index
    %193 = vector.load %arg1[%c2_192, %c7_193, %c0_194, %c0_195] : memref<4x8x16x64xf32, #tpu.memory_space<vmem>>, vector<1x1x16x64xf32>
    %194 = vector.shape_cast %193 : vector<1x1x16x64xf32> to vector<16x64xf32>
    %cst_196 = arith.constant dense<0.000000e+00> : vector<8x64xf32>
    %195 = tpu.matmul %95, %194, %cst_196 {dimension_numbers = #tpu.dot_dimension_numbers<[1], [0], [0], [1], [0, 0, 1, 1], [], []>} : vector<8x16xf32>, vector<16x64xf32>, vector<8x64xf32> -> vector<8x64xf32>
    %196 = arith.addf %192, %195 : vector<8x64xf32>
    %c2_197 = arith.constant 2 : index
    %c0_198 = arith.constant 0 : index
    %c0_199 = arith.constant 0 : index
    %197 = vector.load %arg2[%c2_197, %c0_198, %c0_199] : memref<4x1x1xf32, #tpu.memory_space<vmem>>, vector<1x1x1xf32>
    %198 = vector.shape_cast %197 : vector<1x1x1xf32> to vector<1x1xf32>
    %199 = vector.broadcast %198 : vector<1x1xf32> to vector<8x64xf32>
    %200 = arith.addf %196, %199 : vector<8x64xf32>
    %c3_200 = arith.constant 3 : index
    %c0_201 = arith.constant 0 : index
    %c0_202 = arith.constant 0 : index
    %c0_203 = arith.constant 0 : index
    %201 = vector.load %arg1[%c3_200, %c0_201, %c0_202, %c0_203] : memref<4x8x16x64xf32, #tpu.memory_space<vmem>>, vector<1x1x16x64xf32>
    %202 = vector.shape_cast %201 : vector<1x1x16x64xf32> to vector<16x64xf32>
    %cst_204 = arith.constant dense<0.000000e+00> : vector<8x64xf32>
    %203 = tpu.matmul %11, %202, %cst_204 {dimension_numbers = #tpu.dot_dimension_numbers<[1], [0], [0], [1], [0, 0, 1, 1], [], []>} : vector<8x16xf32>, vector<16x64xf32>, vector<8x64xf32> -> vector<8x64xf32>
    %c3_205 = arith.constant 3 : index
    %c1_206 = arith.constant 1 : index
    %c0_207 = arith.constant 0 : index
    %c0_208 = arith.constant 0 : index
    %204 = vector.load %arg1[%c3_205, %c1_206, %c0_207, %c0_208] : memref<4x8x16x64xf32, #tpu.memory_space<vmem>>, vector<1x1x16x64xf32>
    %205 = vector.shape_cast %204 : vector<1x1x16x64xf32> to vector<16x64xf32>
    %cst_209 = arith.constant dense<0.000000e+00> : vector<8x64xf32>
    %206 = tpu.matmul %23, %205, %cst_209 {dimension_numbers = #tpu.dot_dimension_numbers<[1], [0], [0], [1], [0, 0, 1, 1], [], []>} : vector<8x16xf32>, vector<16x64xf32>, vector<8x64xf32> -> vector<8x64xf32>
    %207 = arith.addf %203, %206 : vector<8x64xf32>
    %c3_210 = arith.constant 3 : index
    %c2_211 = arith.constant 2 : index
    %c0_212 = arith.constant 0 : index
    %c0_213 = arith.constant 0 : index
    %208 = vector.load %arg1[%c3_210, %c2_211, %c0_212, %c0_213] : memref<4x8x16x64xf32, #tpu.memory_space<vmem>>, vector<1x1x16x64xf32>
    %209 = vector.shape_cast %208 : vector<1x1x16x64xf32> to vector<16x64xf32>
    %cst_214 = arith.constant dense<0.000000e+00> : vector<8x64xf32>
    %210 = tpu.matmul %35, %209, %cst_214 {dimension_numbers = #tpu.dot_dimension_numbers<[1], [0], [0], [1], [0, 0, 1, 1], [], []>} : vector<8x16xf32>, vector<16x64xf32>, vector<8x64xf32> -> vector<8x64xf32>
    %211 = arith.addf %207, %210 : vector<8x64xf32>
    %c3_215 = arith.constant 3 : index
    %c3_216 = arith.constant 3 : index
    %c0_217 = arith.constant 0 : index
    %c0_218 = arith.constant 0 : index
    %212 = vector.load %arg1[%c3_215, %c3_216, %c0_217, %c0_218] : memref<4x8x16x64xf32, #tpu.memory_space<vmem>>, vector<1x1x16x64xf32>
    %213 = vector.shape_cast %212 : vector<1x1x16x64xf32> to vector<16x64xf32>
    %cst_219 = arith.constant dense<0.000000e+00> : vector<8x64xf32>
    %214 = tpu.matmul %47, %213, %cst_219 {dimension_numbers = #tpu.dot_dimension_numbers<[1], [0], [0], [1], [0, 0, 1, 1], [], []>} : vector<8x16xf32>, vector<16x64xf32>, vector<8x64xf32> -> vector<8x64xf32>
    %215 = arith.addf %211, %214 : vector<8x64xf32>
    %c3_220 = arith.constant 3 : index
    %c4_221 = arith.constant 4 : index
    %c0_222 = arith.constant 0 : index
    %c0_223 = arith.constant 0 : index
    %216 = vector.load %arg1[%c3_220, %c4_221, %c0_222, %c0_223] : memref<4x8x16x64xf32, #tpu.memory_space<vmem>>, vector<1x1x16x64xf32>
    %217 = vector.shape_cast %216 : vector<1x1x16x64xf32> to vector<16x64xf32>
    %cst_224 = arith.constant dense<0.000000e+00> : vector<8x64xf32>
    %218 = tpu.matmul %59, %217, %cst_224 {dimension_numbers = #tpu.dot_dimension_numbers<[1], [0], [0], [1], [0, 0, 1, 1], [], []>} : vector<8x16xf32>, vector<16x64xf32>, vector<8x64xf32> -> vector<8x64xf32>
    %219 = arith.addf %215, %218 : vector<8x64xf32>
    %c3_225 = arith.constant 3 : index
    %c5_226 = arith.constant 5 : index
    %c0_227 = arith.constant 0 : index
    %c0_228 = arith.constant 0 : index
    %220 = vector.load %arg1[%c3_225, %c5_226, %c0_227, %c0_228] : memref<4x8x16x64xf32, #tpu.memory_space<vmem>>, vector<1x1x16x64xf32>
    %221 = vector.shape_cast %220 : vector<1x1x16x64xf32> to vector<16x64xf32>
    %cst_229 = arith.constant dense<0.000000e+00> : vector<8x64xf32>
    %222 = tpu.matmul %71, %221, %cst_229 {dimension_numbers = #tpu.dot_dimension_numbers<[1], [0], [0], [1], [0, 0, 1, 1], [], []>} : vector<8x16xf32>, vector<16x64xf32>, vector<8x64xf32> -> vector<8x64xf32>
    %223 = arith.addf %219, %222 : vector<8x64xf32>
    %c3_230 = arith.constant 3 : index
    %c6_231 = arith.constant 6 : index
    %c0_232 = arith.constant 0 : index
    %c0_233 = arith.constant 0 : index
    %224 = vector.load %arg1[%c3_230, %c6_231, %c0_232, %c0_233] : memref<4x8x16x64xf32, #tpu.memory_space<vmem>>, vector<1x1x16x64xf32>
    %225 = vector.shape_cast %224 : vector<1x1x16x64xf32> to vector<16x64xf32>
    %cst_234 = arith.constant dense<0.000000e+00> : vector<8x64xf32>
    %226 = tpu.matmul %83, %225, %cst_234 {dimension_numbers = #tpu.dot_dimension_numbers<[1], [0], [0], [1], [0, 0, 1, 1], [], []>} : vector<8x16xf32>, vector<16x64xf32>, vector<8x64xf32> -> vector<8x64xf32>
    %227 = arith.addf %223, %226 : vector<8x64xf32>
    %c3_235 = arith.constant 3 : index
    %c7_236 = arith.constant 7 : index
    %c0_237 = arith.constant 0 : index
    %c0_238 = arith.constant 0 : index
    %228 = vector.load %arg1[%c3_235, %c7_236, %c0_237, %c0_238] : memref<4x8x16x64xf32, #tpu.memory_space<vmem>>, vector<1x1x16x64xf32>
    %229 = vector.shape_cast %228 : vector<1x1x16x64xf32> to vector<16x64xf32>
    %cst_239 = arith.constant dense<0.000000e+00> : vector<8x64xf32>
    %230 = tpu.matmul %95, %229, %cst_239 {dimension_numbers = #tpu.dot_dimension_numbers<[1], [0], [0], [1], [0, 0, 1, 1], [], []>} : vector<8x16xf32>, vector<16x64xf32>, vector<8x64xf32> -> vector<8x64xf32>
    %231 = arith.addf %227, %230 : vector<8x64xf32>
    %c3_240 = arith.constant 3 : index
    %c0_241 = arith.constant 0 : index
    %c0_242 = arith.constant 0 : index
    %232 = vector.load %arg2[%c3_240, %c0_241, %c0_242] : memref<4x1x1xf32, #tpu.memory_space<vmem>>, vector<1x1x1xf32>
    %233 = vector.shape_cast %232 : vector<1x1x1xf32> to vector<1x1xf32>
    %234 = vector.broadcast %233 : vector<1x1xf32> to vector<8x64xf32>
    %235 = arith.addf %231, %234 : vector<8x64xf32>
    %c0_243 = arith.constant 0 : index
    %c0_244 = arith.constant 0 : index
    %c0_245 = arith.constant 0 : index
    %236 = vector.load %arg7[%c0_243, %c0_244, %c0_245] : memref<4x1x1xf32, #tpu.memory_space<vmem>>, vector<1x1x1xf32>
    %237 = vector.shape_cast %236 : vector<1x1x1xf32> to vector<1x1xf32>
    %238 = vector.broadcast %237 : vector<1x1xf32> to vector<8x64xf32>
    %239 = arith.mulf %130, %238 : vector<8x64xf32>
    %c0_246 = arith.constant 0 : index
    %c0_247 = arith.constant 0 : index
    %c0_248 = arith.constant 0 : index
    %240 = vector.load %arg8[%c0_246, %c0_247, %c0_248] : memref<4x1x1xf32, #tpu.memory_space<vmem>>, vector<1x1x1xf32>
    %241 = vector.shape_cast %240 : vector<1x1x1xf32> to vector<1x1xf32>
    %242 = vector.broadcast %241 : vector<1x1xf32> to vector<8x64xf32>
    %243 = arith.addf %239, %242 : vector<8x64xf32>
    %cst_249 = arith.constant 0.000000e+00 : f32
    %244 = vector.broadcast %cst_249 : f32 to vector<8x64xf32>
    %245 = arith.maximumf %243, %244 : vector<8x64xf32>
    %c1_250 = arith.constant 1 : index
    %c0_251 = arith.constant 0 : index
    %c0_252 = arith.constant 0 : index
    %246 = vector.load %arg7[%c1_250, %c0_251, %c0_252] : memref<4x1x1xf32, #tpu.memory_space<vmem>>, vector<1x1x1xf32>
    %247 = vector.shape_cast %246 : vector<1x1x1xf32> to vector<1x1xf32>
    %248 = vector.broadcast %247 : vector<1x1xf32> to vector<8x64xf32>
    %249 = arith.mulf %165, %248 : vector<8x64xf32>
    %c1_253 = arith.constant 1 : index
    %c0_254 = arith.constant 0 : index
    %c0_255 = arith.constant 0 : index
    %250 = vector.load %arg8[%c1_253, %c0_254, %c0_255] : memref<4x1x1xf32, #tpu.memory_space<vmem>>, vector<1x1x1xf32>
    %251 = vector.shape_cast %250 : vector<1x1x1xf32> to vector<1x1xf32>
    %252 = vector.broadcast %251 : vector<1x1xf32> to vector<8x64xf32>
    %253 = arith.addf %249, %252 : vector<8x64xf32>
    %cst_256 = arith.constant 0.000000e+00 : f32
    %254 = vector.broadcast %cst_256 : f32 to vector<8x64xf32>
    %255 = arith.maximumf %253, %254 : vector<8x64xf32>
    %c2_257 = arith.constant 2 : index
    %c0_258 = arith.constant 0 : index
    %c0_259 = arith.constant 0 : index
    %256 = vector.load %arg7[%c2_257, %c0_258, %c0_259] : memref<4x1x1xf32, #tpu.memory_space<vmem>>, vector<1x1x1xf32>
    %257 = vector.shape_cast %256 : vector<1x1x1xf32> to vector<1x1xf32>
    %258 = vector.broadcast %257 : vector<1x1xf32> to vector<8x64xf32>
    %259 = arith.mulf %200, %258 : vector<8x64xf32>
    %c2_260 = arith.constant 2 : index
    %c0_261 = arith.constant 0 : index
    %c0_262 = arith.constant 0 : index
    %260 = vector.load %arg8[%c2_260, %c0_261, %c0_262] : memref<4x1x1xf32, #tpu.memory_space<vmem>>, vector<1x1x1xf32>
    %261 = vector.shape_cast %260 : vector<1x1x1xf32> to vector<1x1xf32>
    %262 = vector.broadcast %261 : vector<1x1xf32> to vector<8x64xf32>
    %263 = arith.addf %259, %262 : vector<8x64xf32>
    %cst_263 = arith.constant 0.000000e+00 : f32
    %264 = vector.broadcast %cst_263 : f32 to vector<8x64xf32>
    %265 = arith.maximumf %263, %264 : vector<8x64xf32>
    %c3_264 = arith.constant 3 : index
    %c0_265 = arith.constant 0 : index
    %c0_266 = arith.constant 0 : index
    %266 = vector.load %arg7[%c3_264, %c0_265, %c0_266] : memref<4x1x1xf32, #tpu.memory_space<vmem>>, vector<1x1x1xf32>
    %267 = vector.shape_cast %266 : vector<1x1x1xf32> to vector<1x1xf32>
    %268 = vector.broadcast %267 : vector<1x1xf32> to vector<8x64xf32>
    %269 = arith.mulf %235, %268 : vector<8x64xf32>
    %c3_267 = arith.constant 3 : index
    %c0_268 = arith.constant 0 : index
    %c0_269 = arith.constant 0 : index
    %270 = vector.load %arg8[%c3_267, %c0_268, %c0_269] : memref<4x1x1xf32, #tpu.memory_space<vmem>>, vector<1x1x1xf32>
    %271 = vector.shape_cast %270 : vector<1x1x1xf32> to vector<1x1xf32>
    %272 = vector.broadcast %271 : vector<1x1xf32> to vector<8x64xf32>
    %273 = arith.addf %269, %272 : vector<8x64xf32>
    %cst_270 = arith.constant 0.000000e+00 : f32
    %274 = vector.broadcast %cst_270 : f32 to vector<8x64xf32>
    %275 = arith.maximumf %273, %274 : vector<8x64xf32>
    %c0_271 = arith.constant 0 : index
    %c0_272 = arith.constant 0 : index
    %c0_273 = arith.constant 0 : index
    %c0_274 = arith.constant 0 : index
    %276 = vector.load %arg5[%c0_271, %c0_272, %c0_273, %c0_274] : memref<4x4x64x256xf32, #tpu.memory_space<vmem>>, vector<1x1x64x256xf32>
    %277 = vector.shape_cast %276 : vector<1x1x64x256xf32> to vector<64x256xf32>
    %cst_275 = arith.constant dense<0.000000e+00> : vector<8x256xf32>
    %278 = tpu.matmul %245, %277, %cst_275 {dimension_numbers = #tpu.dot_dimension_numbers<[1], [0], [0], [1], [0, 0, 1, 1], [], []>} : vector<8x64xf32>, vector<64x256xf32>, vector<8x256xf32> -> vector<8x256xf32>
    %c0_276 = arith.constant 0 : index
    %c1_277 = arith.constant 1 : index
    %c0_278 = arith.constant 0 : index
    %c0_279 = arith.constant 0 : index
    %279 = vector.load %arg5[%c0_276, %c1_277, %c0_278, %c0_279] : memref<4x4x64x256xf32, #tpu.memory_space<vmem>>, vector<1x1x64x256xf32>
    %280 = vector.shape_cast %279 : vector<1x1x64x256xf32> to vector<64x256xf32>
    %cst_280 = arith.constant dense<0.000000e+00> : vector<8x256xf32>
    %281 = tpu.matmul %255, %280, %cst_280 {dimension_numbers = #tpu.dot_dimension_numbers<[1], [0], [0], [1], [0, 0, 1, 1], [], []>} : vector<8x64xf32>, vector<64x256xf32>, vector<8x256xf32> -> vector<8x256xf32>
    %282 = arith.addf %278, %281 : vector<8x256xf32>
    %c0_281 = arith.constant 0 : index
    %c2_282 = arith.constant 2 : index
    %c0_283 = arith.constant 0 : index
    %c0_284 = arith.constant 0 : index
    %283 = vector.load %arg5[%c0_281, %c2_282, %c0_283, %c0_284] : memref<4x4x64x256xf32, #tpu.memory_space<vmem>>, vector<1x1x64x256xf32>
    %284 = vector.shape_cast %283 : vector<1x1x64x256xf32> to vector<64x256xf32>
    %cst_285 = arith.constant dense<0.000000e+00> : vector<8x256xf32>
    %285 = tpu.matmul %265, %284, %cst_285 {dimension_numbers = #tpu.dot_dimension_numbers<[1], [0], [0], [1], [0, 0, 1, 1], [], []>} : vector<8x64xf32>, vector<64x256xf32>, vector<8x256xf32> -> vector<8x256xf32>
    %286 = arith.addf %282, %285 : vector<8x256xf32>
    %c0_286 = arith.constant 0 : index
    %c3_287 = arith.constant 3 : index
    %c0_288 = arith.constant 0 : index
    %c0_289 = arith.constant 0 : index
    %287 = vector.load %arg5[%c0_286, %c3_287, %c0_288, %c0_289] : memref<4x4x64x256xf32, #tpu.memory_space<vmem>>, vector<1x1x64x256xf32>
    %288 = vector.shape_cast %287 : vector<1x1x64x256xf32> to vector<64x256xf32>
    %cst_290 = arith.constant dense<0.000000e+00> : vector<8x256xf32>
    %289 = tpu.matmul %275, %288, %cst_290 {dimension_numbers = #tpu.dot_dimension_numbers<[1], [0], [0], [1], [0, 0, 1, 1], [], []>} : vector<8x64xf32>, vector<64x256xf32>, vector<8x256xf32> -> vector<8x256xf32>
    %290 = arith.addf %286, %289 : vector<8x256xf32>
    %c0_291 = arith.constant 0 : index
    %c0_292 = arith.constant 0 : index
    %c0_293 = arith.constant 0 : index
    %291 = vector.load %arg6[%c0_291, %c0_292, %c0_293] : memref<4x1x1xf32, #tpu.memory_space<vmem>>, vector<1x1x1xf32>
    %292 = vector.shape_cast %291 : vector<1x1x1xf32> to vector<1x1xf32>
    %293 = vector.broadcast %292 : vector<1x1xf32> to vector<8x256xf32>
    %294 = arith.addf %290, %293 : vector<8x256xf32>
    %c1_294 = arith.constant 1 : index
    %c0_295 = arith.constant 0 : index
    %c0_296 = arith.constant 0 : index
    %c0_297 = arith.constant 0 : index
    %295 = vector.load %arg5[%c1_294, %c0_295, %c0_296, %c0_297] : memref<4x4x64x256xf32, #tpu.memory_space<vmem>>, vector<1x1x64x256xf32>
    %296 = vector.shape_cast %295 : vector<1x1x64x256xf32> to vector<64x256xf32>
    %cst_298 = arith.constant dense<0.000000e+00> : vector<8x256xf32>
    %297 = tpu.matmul %245, %296, %cst_298 {dimension_numbers = #tpu.dot_dimension_numbers<[1], [0], [0], [1], [0, 0, 1, 1], [], []>} : vector<8x64xf32>, vector<64x256xf32>, vector<8x256xf32> -> vector<8x256xf32>
    %c1_299 = arith.constant 1 : index
    %c1_300 = arith.constant 1 : index
    %c0_301 = arith.constant 0 : index
    %c0_302 = arith.constant 0 : index
    %298 = vector.load %arg5[%c1_299, %c1_300, %c0_301, %c0_302] : memref<4x4x64x256xf32, #tpu.memory_space<vmem>>, vector<1x1x64x256xf32>
    %299 = vector.shape_cast %298 : vector<1x1x64x256xf32> to vector<64x256xf32>
    %cst_303 = arith.constant dense<0.000000e+00> : vector<8x256xf32>
    %300 = tpu.matmul %255, %299, %cst_303 {dimension_numbers = #tpu.dot_dimension_numbers<[1], [0], [0], [1], [0, 0, 1, 1], [], []>} : vector<8x64xf32>, vector<64x256xf32>, vector<8x256xf32> -> vector<8x256xf32>
    %301 = arith.addf %297, %300 : vector<8x256xf32>
    %c1_304 = arith.constant 1 : index
    %c2_305 = arith.constant 2 : index
    %c0_306 = arith.constant 0 : index
    %c0_307 = arith.constant 0 : index
    %302 = vector.load %arg5[%c1_304, %c2_305, %c0_306, %c0_307] : memref<4x4x64x256xf32, #tpu.memory_space<vmem>>, vector<1x1x64x256xf32>
    %303 = vector.shape_cast %302 : vector<1x1x64x256xf32> to vector<64x256xf32>
    %cst_308 = arith.constant dense<0.000000e+00> : vector<8x256xf32>
    %304 = tpu.matmul %265, %303, %cst_308 {dimension_numbers = #tpu.dot_dimension_numbers<[1], [0], [0], [1], [0, 0, 1, 1], [], []>} : vector<8x64xf32>, vector<64x256xf32>, vector<8x256xf32> -> vector<8x256xf32>
    %305 = arith.addf %301, %304 : vector<8x256xf32>
    %c1_309 = arith.constant 1 : index
    %c3_310 = arith.constant 3 : index
    %c0_311 = arith.constant 0 : index
    %c0_312 = arith.constant 0 : index
    %306 = vector.load %arg5[%c1_309, %c3_310, %c0_311, %c0_312] : memref<4x4x64x256xf32, #tpu.memory_space<vmem>>, vector<1x1x64x256xf32>
    %307 = vector.shape_cast %306 : vector<1x1x64x256xf32> to vector<64x256xf32>
    %cst_313 = arith.constant dense<0.000000e+00> : vector<8x256xf32>
    %308 = tpu.matmul %275, %307, %cst_313 {dimension_numbers = #tpu.dot_dimension_numbers<[1], [0], [0], [1], [0, 0, 1, 1], [], []>} : vector<8x64xf32>, vector<64x256xf32>, vector<8x256xf32> -> vector<8x256xf32>
    %309 = arith.addf %305, %308 : vector<8x256xf32>
    %c1_314 = arith.constant 1 : index
    %c0_315 = arith.constant 0 : index
    %c0_316 = arith.constant 0 : index
    %310 = vector.load %arg6[%c1_314, %c0_315, %c0_316] : memref<4x1x1xf32, #tpu.memory_space<vmem>>, vector<1x1x1xf32>
    %311 = vector.shape_cast %310 : vector<1x1x1xf32> to vector<1x1xf32>
    %312 = vector.broadcast %311 : vector<1x1xf32> to vector<8x256xf32>
    %313 = arith.addf %309, %312 : vector<8x256xf32>
    %c2_317 = arith.constant 2 : index
    %c0_318 = arith.constant 0 : index
    %c0_319 = arith.constant 0 : index
    %c0_320 = arith.constant 0 : index
    %314 = vector.load %arg5[%c2_317, %c0_318, %c0_319, %c0_320] : memref<4x4x64x256xf32, #tpu.memory_space<vmem>>, vector<1x1x64x256xf32>
    %315 = vector.shape_cast %314 : vector<1x1x64x256xf32> to vector<64x256xf32>
    %cst_321 = arith.constant dense<0.000000e+00> : vector<8x256xf32>
    %316 = tpu.matmul %245, %315, %cst_321 {dimension_numbers = #tpu.dot_dimension_numbers<[1], [0], [0], [1], [0, 0, 1, 1], [], []>} : vector<8x64xf32>, vector<64x256xf32>, vector<8x256xf32> -> vector<8x256xf32>
    %c2_322 = arith.constant 2 : index
    %c1_323 = arith.constant 1 : index
    %c0_324 = arith.constant 0 : index
    %c0_325 = arith.constant 0 : index
    %317 = vector.load %arg5[%c2_322, %c1_323, %c0_324, %c0_325] : memref<4x4x64x256xf32, #tpu.memory_space<vmem>>, vector<1x1x64x256xf32>
    %318 = vector.shape_cast %317 : vector<1x1x64x256xf32> to vector<64x256xf32>
    %cst_326 = arith.constant dense<0.000000e+00> : vector<8x256xf32>
    %319 = tpu.matmul %255, %318, %cst_326 {dimension_numbers = #tpu.dot_dimension_numbers<[1], [0], [0], [1], [0, 0, 1, 1], [], []>} : vector<8x64xf32>, vector<64x256xf32>, vector<8x256xf32> -> vector<8x256xf32>
    %320 = arith.addf %316, %319 : vector<8x256xf32>
    %c2_327 = arith.constant 2 : index
    %c2_328 = arith.constant 2 : index
    %c0_329 = arith.constant 0 : index
    %c0_330 = arith.constant 0 : index
    %321 = vector.load %arg5[%c2_327, %c2_328, %c0_329, %c0_330] : memref<4x4x64x256xf32, #tpu.memory_space<vmem>>, vector<1x1x64x256xf32>
    %322 = vector.shape_cast %321 : vector<1x1x64x256xf32> to vector<64x256xf32>
    %cst_331 = arith.constant dense<0.000000e+00> : vector<8x256xf32>
    %323 = tpu.matmul %265, %322, %cst_331 {dimension_numbers = #tpu.dot_dimension_numbers<[1], [0], [0], [1], [0, 0, 1, 1], [], []>} : vector<8x64xf32>, vector<64x256xf32>, vector<8x256xf32> -> vector<8x256xf32>
    %324 = arith.addf %320, %323 : vector<8x256xf32>
    %c2_332 = arith.constant 2 : index
    %c3_333 = arith.constant 3 : index
    %c0_334 = arith.constant 0 : index
    %c0_335 = arith.constant 0 : index
    %325 = vector.load %arg5[%c2_332, %c3_333, %c0_334, %c0_335] : memref<4x4x64x256xf32, #tpu.memory_space<vmem>>, vector<1x1x64x256xf32>
    %326 = vector.shape_cast %325 : vector<1x1x64x256xf32> to vector<64x256xf32>
    %cst_336 = arith.constant dense<0.000000e+00> : vector<8x256xf32>
    %327 = tpu.matmul %275, %326, %cst_336 {dimension_numbers = #tpu.dot_dimension_numbers<[1], [0], [0], [1], [0, 0, 1, 1], [], []>} : vector<8x64xf32>, vector<64x256xf32>, vector<8x256xf32> -> vector<8x256xf32>
    %328 = arith.addf %324, %327 : vector<8x256xf32>
    %c2_337 = arith.constant 2 : index
    %c0_338 = arith.constant 0 : index
    %c0_339 = arith.constant 0 : index
    %329 = vector.load %arg6[%c2_337, %c0_338, %c0_339] : memref<4x1x1xf32, #tpu.memory_space<vmem>>, vector<1x1x1xf32>
    %330 = vector.shape_cast %329 : vector<1x1x1xf32> to vector<1x1xf32>
    %331 = vector.broadcast %330 : vector<1x1xf32> to vector<8x256xf32>
    %332 = arith.addf %328, %331 : vector<8x256xf32>
    %c3_340 = arith.constant 3 : index
    %c0_341 = arith.constant 0 : index
    %c0_342 = arith.constant 0 : index
    %c0_343 = arith.constant 0 : index
    %333 = vector.load %arg5[%c3_340, %c0_341, %c0_342, %c0_343] : memref<4x4x64x256xf32, #tpu.memory_space<vmem>>, vector<1x1x64x256xf32>
    %334 = vector.shape_cast %333 : vector<1x1x64x256xf32> to vector<64x256xf32>
    %cst_344 = arith.constant dense<0.000000e+00> : vector<8x256xf32>
    %335 = tpu.matmul %245, %334, %cst_344 {dimension_numbers = #tpu.dot_dimension_numbers<[1], [0], [0], [1], [0, 0, 1, 1], [], []>} : vector<8x64xf32>, vector<64x256xf32>, vector<8x256xf32> -> vector<8x256xf32>
    %c3_345 = arith.constant 3 : index
    %c1_346 = arith.constant 1 : index
    %c0_347 = arith.constant 0 : index
    %c0_348 = arith.constant 0 : index
    %336 = vector.load %arg5[%c3_345, %c1_346, %c0_347, %c0_348] : memref<4x4x64x256xf32, #tpu.memory_space<vmem>>, vector<1x1x64x256xf32>
    %337 = vector.shape_cast %336 : vector<1x1x64x256xf32> to vector<64x256xf32>
    %cst_349 = arith.constant dense<0.000000e+00> : vector<8x256xf32>
    %338 = tpu.matmul %255, %337, %cst_349 {dimension_numbers = #tpu.dot_dimension_numbers<[1], [0], [0], [1], [0, 0, 1, 1], [], []>} : vector<8x64xf32>, vector<64x256xf32>, vector<8x256xf32> -> vector<8x256xf32>
    %339 = arith.addf %335, %338 : vector<8x256xf32>
    %c3_350 = arith.constant 3 : index
    %c2_351 = arith.constant 2 : index
    %c0_352 = arith.constant 0 : index
    %c0_353 = arith.constant 0 : index
    %340 = vector.load %arg5[%c3_350, %c2_351, %c0_352, %c0_353] : memref<4x4x64x256xf32, #tpu.memory_space<vmem>>, vector<1x1x64x256xf32>
    %341 = vector.shape_cast %340 : vector<1x1x64x256xf32> to vector<64x256xf32>
    %cst_354 = arith.constant dense<0.000000e+00> : vector<8x256xf32>
    %342 = tpu.matmul %265, %341, %cst_354 {dimension_numbers = #tpu.dot_dimension_numbers<[1], [0], [0], [1], [0, 0, 1, 1], [], []>} : vector<8x64xf32>, vector<64x256xf32>, vector<8x256xf32> -> vector<8x256xf32>
    %343 = arith.addf %339, %342 : vector<8x256xf32>
    %c3_355 = arith.constant 3 : index
    %c3_356 = arith.constant 3 : index
    %c0_357 = arith.constant 0 : index
    %c0_358 = arith.constant 0 : index
    %344 = vector.load %arg5[%c3_355, %c3_356, %c0_357, %c0_358] : memref<4x4x64x256xf32, #tpu.memory_space<vmem>>, vector<1x1x64x256xf32>
    %345 = vector.shape_cast %344 : vector<1x1x64x256xf32> to vector<64x256xf32>
    %cst_359 = arith.constant dense<0.000000e+00> : vector<8x256xf32>
    %346 = tpu.matmul %275, %345, %cst_359 {dimension_numbers = #tpu.dot_dimension_numbers<[1], [0], [0], [1], [0, 0, 1, 1], [], []>} : vector<8x64xf32>, vector<64x256xf32>, vector<8x256xf32> -> vector<8x256xf32>
    %347 = arith.addf %343, %346 : vector<8x256xf32>
    %c3_360 = arith.constant 3 : index
    %c0_361 = arith.constant 0 : index
    %c0_362 = arith.constant 0 : index
    %348 = vector.load %arg6[%c3_360, %c0_361, %c0_362] : memref<4x1x1xf32, #tpu.memory_space<vmem>>, vector<1x1x1xf32>
    %349 = vector.shape_cast %348 : vector<1x1x1xf32> to vector<1x1xf32>
    %350 = vector.broadcast %349 : vector<1x1xf32> to vector<8x256xf32>
    %351 = arith.addf %347, %350 : vector<8x256xf32>
    %c0_363 = arith.constant 0 : index
    %c0_364 = arith.constant 0 : index
    %c0_365 = arith.constant 0 : index
    %352 = vector.load %arg11[%c0_363, %c0_364, %c0_365] : memref<4x1x1xf32, #tpu.memory_space<vmem>>, vector<1x1x1xf32>
    %353 = vector.shape_cast %352 : vector<1x1x1xf32> to vector<1x1xf32>
    %354 = vector.broadcast %353 : vector<1x1xf32> to vector<8x256xf32>
    %355 = arith.mulf %294, %354 : vector<8x256xf32>
    %c0_366 = arith.constant 0 : index
    %c0_367 = arith.constant 0 : index
    %c0_368 = arith.constant 0 : index
    %356 = vector.load %arg12[%c0_366, %c0_367, %c0_368] : memref<4x1x1xf32, #tpu.memory_space<vmem>>, vector<1x1x1xf32>
    %357 = vector.shape_cast %356 : vector<1x1x1xf32> to vector<1x1xf32>
    %358 = vector.broadcast %357 : vector<1x1xf32> to vector<8x256xf32>
    %359 = arith.addf %355, %358 : vector<8x256xf32>
    %cst_369 = arith.constant 0.000000e+00 : f32
    %360 = vector.broadcast %cst_369 : f32 to vector<8x256xf32>
    %361 = arith.maximumf %359, %360 : vector<8x256xf32>
    %c1_370 = arith.constant 1 : index
    %c0_371 = arith.constant 0 : index
    %c0_372 = arith.constant 0 : index
    %362 = vector.load %arg11[%c1_370, %c0_371, %c0_372] : memref<4x1x1xf32, #tpu.memory_space<vmem>>, vector<1x1x1xf32>
    %363 = vector.shape_cast %362 : vector<1x1x1xf32> to vector<1x1xf32>
    %364 = vector.broadcast %363 : vector<1x1xf32> to vector<8x256xf32>
    %365 = arith.mulf %313, %364 : vector<8x256xf32>
    %c1_373 = arith.constant 1 : index
    %c0_374 = arith.constant 0 : index
    %c0_375 = arith.constant 0 : index
    %366 = vector.load %arg12[%c1_373, %c0_374, %c0_375] : memref<4x1x1xf32, #tpu.memory_space<vmem>>, vector<1x1x1xf32>
    %367 = vector.shape_cast %366 : vector<1x1x1xf32> to vector<1x1xf32>
    %368 = vector.broadcast %367 : vector<1x1xf32> to vector<8x256xf32>
    %369 = arith.addf %365, %368 : vector<8x256xf32>
    %cst_376 = arith.constant 0.000000e+00 : f32
    %370 = vector.broadcast %cst_376 : f32 to vector<8x256xf32>
    %371 = arith.maximumf %369, %370 : vector<8x256xf32>
    %c2_377 = arith.constant 2 : index
    %c0_378 = arith.constant 0 : index
    %c0_379 = arith.constant 0 : index
    %372 = vector.load %arg11[%c2_377, %c0_378, %c0_379] : memref<4x1x1xf32, #tpu.memory_space<vmem>>, vector<1x1x1xf32>
    %373 = vector.shape_cast %372 : vector<1x1x1xf32> to vector<1x1xf32>
    %374 = vector.broadcast %373 : vector<1x1xf32> to vector<8x256xf32>
    %375 = arith.mulf %332, %374 : vector<8x256xf32>
    %c2_380 = arith.constant 2 : index
    %c0_381 = arith.constant 0 : index
    %c0_382 = arith.constant 0 : index
    %376 = vector.load %arg12[%c2_380, %c0_381, %c0_382] : memref<4x1x1xf32, #tpu.memory_space<vmem>>, vector<1x1x1xf32>
    %377 = vector.shape_cast %376 : vector<1x1x1xf32> to vector<1x1xf32>
    %378 = vector.broadcast %377 : vector<1x1xf32> to vector<8x256xf32>
    %379 = arith.addf %375, %378 : vector<8x256xf32>
    %cst_383 = arith.constant 0.000000e+00 : f32
    %380 = vector.broadcast %cst_383 : f32 to vector<8x256xf32>
    %381 = arith.maximumf %379, %380 : vector<8x256xf32>
    %c3_384 = arith.constant 3 : index
    %c0_385 = arith.constant 0 : index
    %c0_386 = arith.constant 0 : index
    %382 = vector.load %arg11[%c3_384, %c0_385, %c0_386] : memref<4x1x1xf32, #tpu.memory_space<vmem>>, vector<1x1x1xf32>
    %383 = vector.shape_cast %382 : vector<1x1x1xf32> to vector<1x1xf32>
    %384 = vector.broadcast %383 : vector<1x1xf32> to vector<8x256xf32>
    %385 = arith.mulf %351, %384 : vector<8x256xf32>
    %c3_387 = arith.constant 3 : index
    %c0_388 = arith.constant 0 : index
    %c0_389 = arith.constant 0 : index
    %386 = vector.load %arg12[%c3_387, %c0_388, %c0_389] : memref<4x1x1xf32, #tpu.memory_space<vmem>>, vector<1x1x1xf32>
    %387 = vector.shape_cast %386 : vector<1x1x1xf32> to vector<1x1xf32>
    %388 = vector.broadcast %387 : vector<1x1xf32> to vector<8x256xf32>
    %389 = arith.addf %385, %388 : vector<8x256xf32>
    %cst_390 = arith.constant 0.000000e+00 : f32
    %390 = vector.broadcast %cst_390 : f32 to vector<8x256xf32>
    %391 = arith.maximumf %389, %390 : vector<8x256xf32>
    %c0_391 = arith.constant 0 : index
    %c0_392 = arith.constant 0 : index
    %c0_393 = arith.constant 0 : index
    %392 = vector.load %arg9[%c0_391, %c0_392, %c0_393] : memref<4x256x256xf32, #tpu.memory_space<vmem>>, vector<1x256x256xf32>
    %393 = vector.shape_cast %392 : vector<1x256x256xf32> to vector<256x256xf32>
    %cst_394 = arith.constant dense<0.000000e+00> : vector<8x256xf32>
    %394 = tpu.matmul %361, %393, %cst_394 {dimension_numbers = #tpu.dot_dimension_numbers<[1], [0], [0], [1], [0, 0, 1, 1], [], []>} : vector<8x256xf32>, vector<256x256xf32>, vector<8x256xf32> -> vector<8x256xf32>
    %c1_395 = arith.constant 1 : index
    %c0_396 = arith.constant 0 : index
    %c0_397 = arith.constant 0 : index
    %395 = vector.load %arg9[%c1_395, %c0_396, %c0_397] : memref<4x256x256xf32, #tpu.memory_space<vmem>>, vector<1x256x256xf32>
    %396 = vector.shape_cast %395 : vector<1x256x256xf32> to vector<256x256xf32>
    %cst_398 = arith.constant dense<0.000000e+00> : vector<8x256xf32>
    %397 = tpu.matmul %371, %396, %cst_398 {dimension_numbers = #tpu.dot_dimension_numbers<[1], [0], [0], [1], [0, 0, 1, 1], [], []>} : vector<8x256xf32>, vector<256x256xf32>, vector<8x256xf32> -> vector<8x256xf32>
    %398 = arith.addf %394, %397 : vector<8x256xf32>
    %c2_399 = arith.constant 2 : index
    %c0_400 = arith.constant 0 : index
    %c0_401 = arith.constant 0 : index
    %399 = vector.load %arg9[%c2_399, %c0_400, %c0_401] : memref<4x256x256xf32, #tpu.memory_space<vmem>>, vector<1x256x256xf32>
    %400 = vector.shape_cast %399 : vector<1x256x256xf32> to vector<256x256xf32>
    %cst_402 = arith.constant dense<0.000000e+00> : vector<8x256xf32>
    %401 = tpu.matmul %381, %400, %cst_402 {dimension_numbers = #tpu.dot_dimension_numbers<[1], [0], [0], [1], [0, 0, 1, 1], [], []>} : vector<8x256xf32>, vector<256x256xf32>, vector<8x256xf32> -> vector<8x256xf32>
    %402 = arith.addf %398, %401 : vector<8x256xf32>
    %c3_403 = arith.constant 3 : index
    %c0_404 = arith.constant 0 : index
    %c0_405 = arith.constant 0 : index
    %403 = vector.load %arg9[%c3_403, %c0_404, %c0_405] : memref<4x256x256xf32, #tpu.memory_space<vmem>>, vector<1x256x256xf32>
    %404 = vector.shape_cast %403 : vector<1x256x256xf32> to vector<256x256xf32>
    %cst_406 = arith.constant dense<0.000000e+00> : vector<8x256xf32>
    %405 = tpu.matmul %391, %404, %cst_406 {dimension_numbers = #tpu.dot_dimension_numbers<[1], [0], [0], [1], [0, 0, 1, 1], [], []>} : vector<8x256xf32>, vector<256x256xf32>, vector<8x256xf32> -> vector<8x256xf32>
    %406 = arith.addf %402, %405 : vector<8x256xf32>
    %c0_407 = arith.constant 0 : index
    %c0_408 = arith.constant 0 : index
    %407 = vector.load %arg10[%c0_407, %c0_408] : memref<1x1xf32, #tpu.memory_space<vmem>>, vector<1x1xf32>
    %408 = vector.broadcast %407 : vector<1x1xf32> to vector<8x256xf32>
    %409 = arith.addf %406, %408 : vector<8x256xf32>
    %c0_409 = arith.constant 0 : index
    %c0_410 = arith.constant 0 : index
    %410 = vector.load %arg14[%c0_409, %c0_410] : memref<8x256xf32, #tpu.memory_space<vmem>>, vector<8x256xf32>
    tpu.vector_store %arg14[%c0_409, %c0_410], %409 {strides = array<i32>} : memref<8x256xf32, #tpu.memory_space<vmem>>, vector<8x256xf32>,
    %c0_411 = arith.constant 0 : index
    %c0_412 = arith.constant 0 : index
    %411 = vector.load %arg13[%c0_411, %c0_412] : memref<2x8xf32, #tpu.memory_space<vmem>>, vector<2x8xf32>
    %cst_413 = arith.constant dense<0.000000e+00> : vector<2x256xf32>
    %412 = tpu.matmul %411, %409, %cst_413 {dimension_numbers = #tpu.dot_dimension_numbers<[1], [0], [0], [1], [0, 0, 1, 1], [], []>} : vector<2x8xf32>, vector<8x256xf32>, vector<2x256xf32> -> vector<2x256xf32>
    %c0_414 = arith.constant 0 : index
    %c0_415 = arith.constant 0 : index
    %413 = vector.load %arg15[%c0_414, %c0_415] : memref<2x256xf32, #tpu.memory_space<vmem>>, vector<2x256xf32>
    tpu.vector_store %arg15[%c0_414, %c0_415], %412 {strides = array<i32>} : memref<2x256xf32, #tpu.memory_space<vmem>>, vector<2x256xf32>,
    return
  }
}

</mosaic_0001>

<bundles_post_ra>
// kernel: graph_layout_mask_extractor_forward.2
= control target key start
LH: loop header
LB: loop body
LE: loop exit
PB: predicated region body
PF: predicated region fallthrough
CT: control target
= control target key end

     0   :  { %vm67_vm0 = vcmask 64512   ;;  %v1134_v0 = vmov 0.0   ;;  %vm1135_vm1 = vmmov 0   ;;  %vm163_vm2 = vcmask 1040384   ;;  %s1138_s23 = smov 8   ;;  %s1139_s24 = smov 3   ;;  %s1455_s0 = inlined_call_operand.vmem [shape: f32[8,3], index: 0, kind: input, shape index: {}]   ;;  %s1456_s1 = inlined_call_operand.vmem [shape: f32[8,8], index: 1, kind: input, shape index: {}]   ;;  %s1457_s2 = inlined_call_operand.vmem [shape: f32[9,8], index: 2, kind: input, shape index: {}]   ;;  %s1458_s4 = inlined_call_operand.vmem [shape: f32[11,8], index: 4, kind: input, shape index: {}]   ;;  %s1459_s3 = inlined_call_operand.vmem [shape: f32[1,8], index: 3, kind: input, shape index: {}]   ;;  %s1460_s5 = inlined_call_operand.vmem [shape: f32[1,8], index: 5, kind: input, shape index: {}]   ;;  %s1461_s6 = inlined_call_operand.vmem [shape: f32[1,8], index: 6, kind: input, shape index: {}]   ;;  %s1462_s7 = inlined_call_operand.vmem [shape: f32[1,8], index: 7, kind: input, shape index: {}]   ;;  %s1463_s8 = inlined_call_operand.vmem [shape: f32[19,16], index: 8, kind: input, shape index: {}]   ;;  %s1464_s10 = inlined_call_operand.vmem [shape: f32[24,16], index: 10, kind: input, shape index: {}]   ;;  %s1465_s9 = inlined_call_operand.vmem [shape: f32[1,16], index: 9, kind: input, shape index: {}]   ;;  %s1466_s11 = inlined_call_operand.vmem [shape: f32[1,16], index: 11, kind: input, shape index: {}]   ;;  %s1467_s12 = inlined_call_operand.vmem [shape: f32[1,16], index: 12, kind: input, shape index: {}]   ;;  %s1468_s13 = inlined_call_operand.vmem [shape: f32[1,16], index: 13, kind: input, shape index: {}]   ;;  %s1469_s14 = inlined_call_operand.vmem [shape: f32[35,128], index: 14, kind: input, shape index: {}]   ;;  %s1470_s16 = inlined_call_operand.vmem [shape: f32[144,128], index: 16, kind: input, shape index: {}]   ;;  %s1471_s15 = inlined_call_operand.vmem [shape: f32[1,128], index: 15, kind: input, shape index: {}]   ;;  %s1472_s17 = inlined_call_operand.vmem [shape: f32[1,128], index: 17, kind: input, shape index: {}]   ;;  %s1473_s18 = inlined_call_operand.vmem [shape: f32[8,128], index: 18, kind: output, shape index: {}]  }
   0x1   :  { %1475 = sst [smem:[#allocation2_spill]] %s1455_s0  ;;  %1013 = vmatprep.subr.mxu1 %v1134_v0  ;;  %1015 = vmatprep.mubr.msk.f32.mxu1 %vm1135_vm1, %v1134_v0  ;;  %v1136_v6 = vmov 0.0|0.0   ;;  %vm1137_vm3 = vmmov 1   ;;  %s1140_s25 = smov 6   ;;  %vm149_vm5 = vcmask 23552   ;;  %vm151_vm6 = vcmask 48128  }
   0x2   :  { %1476 = sst [smem:[#allocation3_spill]] %s1456_s1  ;;  %s1478_s29 = sld [smem:[#allocation2_spill]]  ;;  %1055 = vmatprep.subr.mxu0 %v1134_v0  ;;  %1057 = vmatprep.mubr.msk.f32.mxu0 %vm1135_vm1, %v1134_v0  ;;  %vm1080_vm4 = vmpackc.low %vm163_vm2, %vm1137_vm3  ;;  %vm159_vm7 = vcmask 72704   ;;  %v64_v13 = vld [vmem:[%s1458_s4] sm:$0xff]  ;;  %v65_v14 = vld [vmem:[%s1458_s4 + $0x8] sm:$0x7] }
   0x3   :  { %1477 = sst [smem:[#allocation4_spill]] %s1457_s2  ;;  %s1479_s19 = sld [smem:[#allocation3_spill]]  ;;  %vm252_vm8 = vcmask 1042432   ;;  %v1083_v15 = vpack.c.bf16 %v65_v14, %v64_v13  ;;  %v962_v16 = vld [vmem:[%s1459_s3] ss:$0 sm:$0xff]  ;;  %vm248_vm10 = vcmask 89088  }
   0x4   :  { %s1480_s21 = sld [smem:[#allocation4_spill]]  ;;  %vm1084_vm9 = vmpackc.low %vm252_vm8, %vm1137_vm3  ;;  %v965_v23 = vld [vmem:[%s1460_s5] ss:$0 sm:$0xff]  ;;  %s1141_s5 = smov 16   ;;  %v344_v33 = vld [vmem:[%s1463_s8 + $0x8] sm:$0xff]  ;;  %vm429_vm11 = vcmask 130048  }
   0x5   :  { %v968_v25 = vld [vmem:[%s1461_s6] ss:$0 sm:$0xff]  ;;  %v345_v35 = vld [vmem:[%s1463_s8 + $0x10] sm:$0x7]  ;;  %vm437_vm12 = vcmask 154624   ;;  %v348_v43 = vld [vmem:[%s1464_s10 + $0x8] sm:$0xff] }
   0x6   :  { %v969_v28 = vld [vmem:[%s1462_s7] ss:$0 sm:$0xff]  ;;  %v349_v45 = vld [vmem:[%s1464_s10 + $0x10] sm:$0xff]  ;;  %vm526_vm13 = vcmask 195584   ;;  %v618_v63 = vld [vmem:[%s1469_s14 + $0x8] sm:$0xff]  ;;  %vm720_vm14 = vcmask 261120  }
   0x7   :  { %v343_v32 = vld [vmem:[%s1463_s8] sm:$0xff]  ;;  %vm728_vm15 = vcmask 285696  }
   0x8   :  { %v1242_v1 = vld [vmem:[%s1478_s29] sm:$0xff]  ;;  %v1087_v34 = vpack.c.bf16 %v344_v33, %v343_v32  ;;  %v638_v32 = vld [vmem:[%s1470_s16 + $0x78] sm:$0xff] }
   0x9   :  { %v1249_v2 = vld [vmem:[%s1479_s19] sm:$0xff]  ;;  %1014 = vmatpush3.msra.mxu1 %v1242_v1  ;;  %238 = vrot.lane.b32.xlu1 %v1242_v1, %s1138_s23 }
   0xa   :  { %1016 = vmatmul.mubr.msk.f32.vlgmr.msra.gmra.mrb[0].mxu1 %vm67_vm0, %v1249_v2  ;;  %v61_v3 = vld [vmem:[%s1480_s21] sm:$0xff]  ;;  %v62_v4 = vld [vmem:[%s1480_s21 + $0x8] sm:$0x1]  ;;  %1078 = vmatprep.subr.bf16.mxu1 %v1136_v6 }
   0xb   :  { %1022 = vmatprep.mubr.msk.f32.mxu1 %vm1135_vm1, %v1134_v0  ;;  %v1079_v5 = vpack.c.bf16 %v62_v4, %v61_v3  ;;  %v347_v42 = vld [vmem:[%s1464_s10] sm:$0xff]  ;;  %v619_v3 = vld [vmem:[%s1469_s14 + $0x10] sm:$0xff] }
   0xc   :  { %v1090_v44 = vpack.c.bf16 %v348_v43, %v347_v42  ;;  %v971_v46 = vld [vmem:[%s1465_s9] ss:$0 sm:$0xff] }
   0xd   :  { %1081 = vmatpush3.bf16.msk.msra.mxu1 %vm1080_vm4, %v1079_v5  ;;  %v974_v53 = vld [vmem:[%s1466_s11] ss:$0 sm:$0xff]  ;;  %s1142_s11 = smov 32   ;;  %v620_v5 = vld [vmem:[%s1469_s14 + $0x18] sm:$0xff] }
   0xe   :  { %1082 = vmatprep.subr.bf16.mxu1 %v1136_v6  ;;  %v976_v55 = vld [vmem:[%s1467_s12] ss:$0 sm:$0xff] }
   0xf   :  { %v977_v58 = vld [vmem:[%s1468_s13] ss:$0 sm:$0xff] }
  0x10   :  { %v617_v62 = vld [vmem:[%s1469_s14] sm:$0xff] }
  0x11   :  { %v1093_v4 = vpack.c.bf16 %v618_v63, %v617_v62  ;;  %v627_v14 = vld [vmem:[%s1470_s16 + $0x20] sm:$0xff] }
  0x7b   :  { %v239_v20 = vpop.permute.xlu1 %238 }
  0xdd   :  { %v137_v7 = vpop.f32.mrb[0].mxu1 }
  0xde   :  { %142 = vrot.lane.b32.xlu0 %v137_v7, %s1139_s24  ;;  %v1017_v8 = vpop.f32.mrb[1].mxu1  ;;  %v1096_v7 = vpack.c.bf16 %v620_v5, %v619_v3 }
  0xdf   :  { %v623_v8 = vld [vmem:[%s1470_s16] sm:$0xff] }
  0xe2   :  { %146 = vrot.lane.b32.xlu0 %v1242_v1, %s1140_s25 }
  0xe6   :  { %425 = vrot.lane.b32.xlu0 %v1242_v1, %s1141_s5 }
 0x150   :  { %v143_v9 = vpop.permute.xlu0 %142 }
 0x151   :  { %v150_v10 = vsel %vm149_vm5, %v1242_v1, %v143_v9  ;;  %v624_v9 = vld [vmem:[%s1470_s16 + $0x8] sm:$0xff] }
 0x154   :  { %v147_v11 = vpop.permute.xlu0 %146 }
 0x155   :  { %v152_v12 = vsel %vm151_vm6, %v150_v10, %v147_v11  ;;  %v625_v10 = vld [vmem:[%s1470_s16 + $0x10] sm:$0xff]  ;;  %v1099_v11 = vpack.c.bf16 %v624_v9, %v623_v8 }
 0x156   :  { %1023 = vmatmul.mubr.msk.f32.vlgmr.msra.gmra.mrb[2].mxu1 %vm159_vm7, %v152_v12  ;;  %v626_v12 = vld [vmem:[%s1470_s16 + $0x18] sm:$0xff] }
 0x157   :  { %1029 = vmatprep.mubr.msk.f32.mxu1 %vm1135_vm1, %v1134_v0  ;;  %1085 = vmatpush3.bf16.msk.msra.mxu1 %vm1084_vm9, %v1083_v15  ;;  %v1102_v13 = vpack.c.bf16 %v626_v12, %v625_v10  ;;  %v628_v15 = vld [vmem:[%s1470_s16 + $0x28] sm:$0xff] }
 0x158   :  { %1032 = vmatprep.subr.mxu1 %v1134_v0  ;;  %v426_v38 = vpop.permute.xlu0 %425 }
 0x229   :  { %v233_v17 = vpop.f32.mrb[2].mxu1 }
 0x22a   :  { %v234_v18 = vadd.f32 %v962_v16, %v233_v17  ;;  %v1024_v19 = vpop.f32.mrb[3].mxu1  ;;  %v1105_v16 = vpack.c.bf16 %v628_v15, %v627_v14  ;;  %v629_v17 = vld [vmem:[%s1470_s16 + $0x30] sm:$0xff] }
 0x22c   :  { %v237_v21 = vmax.f32 %v234_v18, 0.0  ;;  %v630_v18 = vld [vmem:[%s1470_s16 + $0x38] sm:$0xff] }
 0x22e   :  { %v241_v22 = vsel %vm67_vm0, %v237_v21, %v239_v20  ;;  %v1108_v21 = vpack.c.bf16 %v630_v18, %v629_v17 }
 0x22f   :  { %1030 = vmatmul.mubr.msk.f32.vlgmr.msra.gmra.mrb[4].mxu1 %vm248_vm10, %v241_v22  ;;  %v631_v22 = vld [vmem:[%s1470_s16 + $0x40] sm:$0xff] }
 0x230   :  { %1034 = vmatprep.mubr.msk.f32.mxu1 %vm1135_vm1, %v1134_v0 }
 0x302   :  { %v322_v24 = vpop.f32.mrb[4].mxu1 }
 0x303   :  { %v323_v26 = vadd.f32 %v965_v23, %v322_v24  ;;  %v1031_v27 = vpop.f32.mrb[5].mxu1  ;;  %v632_v23 = vld [vmem:[%s1470_s16 + $0x48] sm:$0xff] }
 0x304   :  { %v1111_v24 = vpack.c.bf16 %v632_v23, %v631_v22 }
 0x305   :  { %v334_v29 = vmul.f32 %v968_v25, %v323_v26  ;;  %v633_v25 = vld [vmem:[%s1470_s16 + $0x50] sm:$0xff]  ;;  %v634_v26 = vld [vmem:[%s1470_s16 + $0x58] sm:$0xff] }
 0x306   :  { %v1114_v27 = vpack.c.bf16 %v634_v26, %v633_v25 }
 0x307   :  { %v341_v30 = vadd.f32 %v969_v28, %v334_v29  ;;  %v635_v28 = vld [vmem:[%s1470_s16 + $0x60] sm:$0xff]  ;;  %v636_v29 = vld [vmem:[%s1470_s16 + $0x68] sm:$0xff] }
 0x309   :  { %v342_v31 = vmax.f32 %v341_v30, 0.0  ;;  %v1117_v30 = vpack.c.bf16 %v636_v29, %v635_v28 }
 0x30b   :  { %1033 = vmatpush3.msra.mxu1 %v342_v31 }
 0x30c   :  { %1035 = vmatmul.mubr.msk.f32.vlgmr.msra.gmra.mrb[6].mxu1 %vm67_vm0, %v1249_v2  ;;  %1086 = vmatprep.subr.bf16.mxu1 %v1136_v6 }
 0x30d   :  { %1043 = vmatprep.mubr.msk.f32.mxu1 %vm1135_vm1, %v1134_v0  ;;  %1088 = vmatpush3.bf16.msra.mxu1 %v1087_v34 }
 0x30e   :  { %1041 = vmatprep.subr.mxu1 %v1134_v0 }
 0x311   :  { %1042 = vmatpush3.msk.msra.mxu1 %vm252_vm8, %v345_v35 }
 0x312   :  { %1089 = vmatprep.subr.bf16.mxu1 %v1136_v6 }
 0x3df   :  { %v417_v36 = vpop.f32.mrb[6].mxu1 }
 0x3e0   :  { %422 = vrot.lane.b32.xlu1 %v417_v36, %s1138_s23  ;;  %v1036_v37 = vpop.f32.mrb[7].mxu1 }
 0x3e4   :  { %516 = vrot.lane.b32.xlu1 %v342_v31, %s1141_s5 }
 0x3e8   :  { %716 = vrot.lane.b32.xlu1 %v1242_v1, %s1142_s11  ;;  %v621_v1 = vld [vmem:[%s1469_s14 + $0x20] sm:$0x7] }
 0x452   :  { %v423_v39 = vpop.permute.xlu1 %422 }
 0x453   :  { %v428_v40 = vsel %vm67_vm0, %v342_v31, %v423_v39  ;;  %v637_v31 = vld [vmem:[%s1470_s16 + $0x70] sm:$0xff] }
 0x454   :  { %v430_v41 = vsel %vm429_vm11, %v428_v40, %v426_v38  ;;  %v1120_v33 = vpack.c.bf16 %v638_v32, %v637_v31  ;;  %v639_v38 = vld [vmem:[%s1470_s16 + $0x80] sm:$0xff] }
 0x455   :  { %1044 = vmatmul.mubr.msk.f32.vlgmr.msra.gmra.mrb[8].mxu1 %vm437_vm12, %v430_v41  ;;  %v979_v40 = vld [vmem:[%s1471_s15] ss:$0 sm:$0xff] }
 0x456   :  { %1052 = vmatprep.mubr.msk.f32.mxu1 %vm1135_vm1, %v1134_v0  ;;  %1091 = vmatpush3.bf16.msra.mxu1 %v1090_v44  ;;  %v517_v51 = vpop.permute.xlu1 %516 }
 0x457   :  { %1050 = vmatprep.subr.mxu1 %v1134_v0 }
 0x45a   :  { %1051 = vmatpush3.msra.mxu1 %v349_v45  ;;  %v717_v34 = vpop.permute.xlu1 %716 }
 0x45b   :  { %1092 = vmatprep.subr.bf16.mxu1 %v1136_v6 }
 0x528   :  { %v510_v47 = vpop.f32.mrb[8].mxu1 }
 0x529   :  { %v511_v48 = vadd.f32 %v971_v46, %v510_v47  ;;  %v1045_v49 = vpop.f32.mrb[9].mxu1 }
 0x52b   :  { %v514_v50 = vmax.f32 %v511_v48, 0.0 }
 0x52d   :  { %v519_v52 = vsel %vm429_vm11, %v514_v50, %v517_v51 }
 0x52e   :  { %1053 = vmatmul.mubr.msk.f32.vlgmr.msra.gmra.mrb[10].mxu1 %vm526_vm13, %v519_v52 }
 0x52f   :  { %1070 = vmatprep.mubr.msk.f32.mxu1 %vm1135_vm1, %v1134_v0  ;;  %1094 = vmatpush3.bf16.msra.mxu1 %v1093_v4 }
 0x530   :  { %1095 = vmatprep.subr.bf16.mxu1 %v1136_v6 }
 0x533   :  { %1097 = vmatpush3.bf16.msra.mxu1 %v1096_v7 }
 0x534   :  { %1068 = vmatprep.subr.mxu1 %v1134_v0 }
 0x537   :  { %1069 = vmatpush3.msk.msra.mxu1 %vm252_vm8, %v621_v1 }
 0x538   :  { %1073 = vmatprep.subr.mxu1 %v1134_v0 }
 0x601   :  { %v596_v54 = vpop.f32.mrb[10].mxu1 }
 0x602   :  { %v597_v56 = vadd.f32 %v974_v53, %v596_v54  ;;  %v1054_v57 = vpop.f32.mrb[11].mxu1 }
 0x604   :  { %v608_v59 = vmul.f32 %v976_v55, %v597_v56 }
 0x606   :  { %v615_v60 = vadd.f32 %v977_v58, %v608_v59 }
 0x608   :  { %v1349_v61 = vmax.f32 %v615_v60, 0.0 }
 0x60a   :  { %1056 = vmatpush3.msra.mxu0 %v1349_v61 }
 0x60b   :  { %1058 = vmatmul.mubr.msk.f32.vlgmr.msra.gmra.mrb[0].mxu0 %vm67_vm0, %v1249_v2  ;;  %1098 = vmatprep.subr.bf16.mxu0 %v1136_v6 }
 0x60c   :  { %983 = vmatprep.mubr.msk.f32.mxu0 %vm429_vm11, %v1349_v61  ;;  %1100 = vmatpush1.bf16.msra.mxu0 %v1099_v11 }
 0x60d   :  { %1101 = vmatprep.subr.bf16.mxu0 %v1136_v6 }
 0x610   :  { %1103 = vmatpush1.bf16.msra.mxu0 %v1102_v13 }
 0x611   :  { %1104 = vmatprep.subr.bf16.mxu0 %v1136_v6 }
 0x614   :  { %1106 = vmatpush1.bf16.msra.mxu0 %v1105_v16 }
 0x615   :  { %1107 = vmatprep.subr.bf16.mxu0 %v1136_v6 }
 0x618   :  { %1109 = vmatpush1.bf16.msra.mxu0 %v1108_v21 }
 0x619   :  { %1110 = vmatprep.subr.bf16.mxu0 %v1136_v6 }
 0x61c   :  { %1112 = vmatpush1.bf16.msra.mxu0 %v1111_v24 }
 0x61d   :  { %1113 = vmatprep.subr.bf16.mxu0 %v1136_v6 }
 0x620   :  { %1115 = vmatpush1.bf16.msra.mxu0 %v1114_v27 }
 0x621   :  { %1116 = vmatprep.subr.bf16.mxu0 %v1136_v6 }
 0x624   :  { %1118 = vmatpush1.bf16.msra.mxu0 %v1117_v30 }
 0x625   :  { %1119 = vmatprep.subr.bf16.mxu0 %v1136_v6 }
 0x628   :  { %1121 = vmatpush1.bf16.msra.mxu0 %v1120_v33 }
 0x629   :  { %1122 = vmatprep.subr.bf16.mxu0 %v1136_v6  ;;  %v640_v6 = vld [vmem:[%s1470_s16 + $0x88] sm:$0xff] }
 0x62a   :  { %v1123_v39 = vpack.c.bf16 %v640_v6, %v639_v38 }
 0x62c   :  { %1124 = vmatpush1.bf16.msra.mxu0 %v1123_v39 }
 0x6de   :  { %v708_v19 = vpop.f32.mrb[0].mxu0 }
 0x6df   :  { %713 = vrot.lane.b32.xlu0 %v708_v19, %s1141_s5  ;;  %v1059_v20 = vpop.f32.mrb[1].mxu0 }
 0x751   :  { %v714_v35 = vpop.permute.xlu0 %713 }
 0x752   :  { %v719_v36 = vsel %vm429_vm11, %v1349_v61, %v714_v35 }
 0x753   :  { %v721_v37 = vsel %vm720_vm14, %v719_v36, %v717_v34 }
 0x754   :  { %1071 = vmatmul.mubr.msk.f32.vlgmr.msra.gmra.mrb[12].mxu1 %vm728_vm15, %v721_v37 }
 0x755   :  { %1075 = vmatprep.mubr.msk.f32.mxu1 %vm1135_vm1, %v1134_v0  ;;  %v982_v0 = vld [vmem:[%s1472_s17] ss:$0 sm:$0xff] }
 0x827   :  { %v801_v41 = vpop.f32.mrb[12].mxu1 }
 0x828   :  { %v802_v42 = vadd.f32 %v979_v40, %v801_v41  ;;  %v1072_v43 = vpop.f32.mrb[13].mxu1 }
 0x82a   :  { %v805_v44 = vmax.f32 %v802_v42, 0.0 }
 0x82c   :  { %880 = vmatmul.mubr.f32.vlgmr.msra.gmra.mrb[2].mxu0 %v805_v44 }
 0x8ff   :  { %v881_v45 = vpop.f32.mrb[2].mxu0 }
 0x900   :  { %v882_v46 = vadd.f32 %v982_v0, %v881_v45  ;;  %v883_v47 = vpop.f32.mrb[3].mxu0 }
 0x902   :  { %1074 = vmatpush3.msra.mxu1 %v882_v46 }
 0x903   :  { %1076 = vmatmul.mubr.msk.f32.vlgmr.msra.gmra.mrb[14].mxu1 %vm67_vm0, %v1249_v2 }
 0x9d6   :  { %v951_v48 = vpop.f32.mrb[14].mxu1 }
 0x9d7   :  { %v955_v49 = vadd.f32 %v951_v48, %v882_v46  ;;  %v1077_v50 = vpop.f32.mrb[15].mxu1 }
 0x9d9   :  { %956 = vst [vmem:[%s1473_s18] sm:$0xff] %v955_v49 }

// kernel: graph_layout_mask_extractor_forward.3
= control target key start
LH: loop header
LB: loop body
LE: loop exit
PB: predicated region body
PF: predicated region fallthrough
CT: control target
= control target key end

     0   :  { %v6635_v0 = vmov 0   ;;  %v6636_v12 = vmov 0.0|0.0   ;;  %vm6637_vm0 = vmmov 0   ;;  %v6638_v16 = vmov 0.0   ;;  %s8863_s4 = inlined_call_operand.vmem [shape: f32[8,1,1], index: 4, kind: input, shape index: {}]   ;;  %s8864_s3 = inlined_call_operand.vmem [shape: f32[8,1,1], index: 3, kind: input, shape index: {}]   ;;  %s8865_s10 = inlined_call_operand.<no memory space> [shape: f32[1,1], index: 10, kind: input, shape index: {}]   ;;  %s8866_s1 = inlined_call_operand.vmem [shape: f32[4,8,16,64], index: 1, kind: input, shape index: {}]   ;;  %s8867_s7 = inlined_call_operand.vmem [shape: f32[4,1,1], index: 7, kind: input, shape index: {}]   ;;  %s8868_s2 = inlined_call_operand.vmem [shape: f32[4,1,1], index: 2, kind: input, shape index: {}]   ;;  %s8869_s8 = inlined_call_operand.vmem [shape: f32[4,1,1], index: 8, kind: input, shape index: {}]   ;;  %s8870_s6 = inlined_call_operand.vmem [shape: f32[4,1,1], index: 6, kind: input, shape index: {}]   ;;  %s8871_s11 = inlined_call_operand.vmem [shape: f32[4,1,1], index: 11, kind: input, shape index: {}]   ;;  %s8872_s12 = inlined_call_operand.vmem [shape: f32[4,1,1], index: 12, kind: input, shape index: {}]   ;;  %s8873_s0 = inlined_call_operand.vmem [shape: f32[8,8,16], index: 0, kind: input, shape index: {}]   ;;  %s8874_s5 = inlined_call_operand.vmem [shape: f32[4,4,64,256], index: 5, kind: input, shape index: {}]   ;;  %s8875_s9 = inlined_call_operand.vmem [shape: f32[4,256,256], index: 9, kind: input, shape index: {}]   ;;  %s8876_s14 = inlined_call_operand.vmem [shape: f32[8,256], index: 14, kind: output, shape index: {0}]   ;;  %s8877_s13 = inlined_call_operand.vmem [shape: f32[2,8], index: 13, kind: input, shape index: {}]   ;;  %s8878_s15 = inlined_call_operand.vmem [shape: f32[2,256], index: 15, kind: output, shape index: {1}]  }
   0x1   :  { %6634 = vset.pattern.permute.xlu1 %v6635_v0  ;;  %6633 = vset.pattern.permute.xlu0 %v6635_v0  ;;  %v5053_v1 = vld [vmem:[%s8863_s4 + $0x1] ss:$0 sm:$0xff]  ;;  %v21_v3 = vstv %s8865_s10  ;;  %v5048_v4 = vld [vmem:[%s8863_s4] ss:$0 sm:$0xff]  ;;  %v5058_v6 = vld [vmem:[%s8863_s4 + $0x2] ss:$0 sm:$0xff] }
   0x2   :  { %v5051_v2 = vld [vmem:[%s8864_s3 + $0x1] ss:$0 sm:$0xff]  ;;  %97 = vperm.xlu1 %6634, %v5053_v1   ;;  %22 = vst [vmem:[#allocation2] sm:$0x1] %v21_v3  ;;  %v5047_v5 = vld [vmem:[%s8864_s3] ss:$0 sm:$0xff]  ;;  %5991 = vmatprep.subr.bf16.mxu0 %v6636_v12 }
   0x3   :  { %85 = vperm.xlu0 %6633, %v5051_v2   ;;  %v5056_v7 = vld [vmem:[%s8864_s3 + $0x2] ss:$0 sm:$0xff]  ;;  %v5063_v8 = vld [vmem:[%s8863_s4 + $0x3] ss:$0 sm:$0xff]  ;;  %v5068_v10 = vld [vmem:[%s8863_s4 + $0x4] ss:$0 sm:$0xff]  ;;  %5994 = vmatprep.subr.bf16.mxu1 %v6636_v12 }
   0x4   :  { %v5061_v9 = vld [vmem:[%s8864_s3 + $0x3] ss:$0 sm:$0xff]  ;;  %v5066_v11 = vld [vmem:[%s8864_s3 + $0x4] ss:$0 sm:$0xff]  ;;  %v5084_v13 = vld [vmem:[%s8866_s1 + $0x10] sm:$0xff]  ;;  %5771 = vmatprep.mubr.msk.f32.mxu0 %vm6637_vm0, %v6638_v16  ;;  %5778 = vmatprep.mubr.msk.f32.mxu1 %vm6637_vm0, %v6638_v16  ;;  %vm269_vm1 = vcmask 130048  }
   0x5   :  { %v5085_v14 = vld [vmem:[%s8866_s1 + $0x18] sm:$0xff]  ;;  %v264_v17 = vld [vmem:[%s8866_s1] sm:$0xff]  ;;  %v265_v18 = vld [vmem:[%s8866_s1 + $0x8] sm:$0xff]  ;;  %vm2826_vm2 = vcmask 523264   ;;  %vm4952_vm3 = vcmask 64512  }
   0x6   :  { %70 = vperm.xlu1 %6634, %v5048_v4   ;;  %v5992_v15 = vpack.c.bf16 %v5085_v14, %v5084_v13  ;;  %v5995_v19 = vpack.c.bf16 %v265_v18, %v264_v17  ;;  %v5073_v20 = vld [vmem:[%s8863_s4 + $0x5] ss:$0 sm:$0xff]  ;;  %v5078_v22 = vld [vmem:[%s8863_s4 + $0x6] ss:$0 sm:$0xff]  ;;  %v5083_v24 = vld [vmem:[%s8863_s4 + $0x7] ss:$0 sm:$0xff] }
   0x7   :  { %59 = vperm.xlu0 %6633, %v5047_v5   ;;  %v5071_v21 = vld [vmem:[%s8864_s3 + $0x5] ss:$0 sm:$0xff]  ;;  %v5076_v23 = vld [vmem:[%s8864_s3 + $0x6] ss:$0 sm:$0xff]  ;;  %v5081_v25 = vld [vmem:[%s8864_s3 + $0x7] ss:$0 sm:$0xff] }
   0x8   :  { %5993 = vmatpush3.bf16.msra.mxu0 %v5992_v15  ;;  %5996 = vmatpush3.bf16.msra.mxu1 %v5995_v19  ;;  %v5188_v26 = vld [vmem:[%s8867_s7 + $0x1] ss:$0 sm:$0xff]  ;;  %v5106_v29 = vld [vmem:[%s8868_s2] ss:$0 sm:$0xff]  ;;  %v5158_v32 = vld [vmem:[%s8868_s2 + $0x2] ss:$0 sm:$0xff] }
   0x9   :  { %5997 = vmatprep.subr.bf16.mxu0 %v6636_v12  ;;  %6000 = vmatprep.subr.bf16.mxu1 %v6636_v12  ;;  %v5132_v27 = vld [vmem:[%s8868_s2 + $0x1] ss:$0 sm:$0xff]  ;;  %v5185_v30 = vld [vmem:[%s8867_s7] ss:$0 sm:$0xff]  ;;  %v5192_v33 = vld [vmem:[%s8867_s7 + $0x2] ss:$0 sm:$0xff] }
   0xa   :  { %124 = vperm.xlu1 %6634, %v5058_v6   ;;  %v5190_v28 = vld [vmem:[%s8869_s8 + $0x1] ss:$0 sm:$0xff]  ;;  %v5186_v31 = vld [vmem:[%s8869_s8] ss:$0 sm:$0xff]  ;;  %v5194_v34 = vld [vmem:[%s8869_s8 + $0x2] ss:$0 sm:$0xff] }
   0xb   :  { %112 = vperm.xlu0 %6633, %v5056_v7   ;;  %v5184_v35 = vld [vmem:[%s8868_s2 + $0x3] ss:$0 sm:$0xff]  ;;  %v5321_v38 = vld [vmem:[%s8870_s6 + $0x1] ss:$0 sm:$0xff]  ;;  %v5391_v39 = vld [vmem:[%s8870_s6 + $0x2] ss:$0 sm:$0xff] }
   0xc   :  { %v5196_v36 = vld [vmem:[%s8867_s7 + $0x3] ss:$0 sm:$0xff]  ;;  %v5465_v40 = vld [vmem:[%s8871_s11 + $0x1] ss:$0 sm:$0xff]  ;;  %v5469_v41 = vld [vmem:[%s8871_s11 + $0x2] ss:$0 sm:$0xff] }
   0xd   :  { %v5198_v37 = vld [vmem:[%s8869_s8 + $0x3] ss:$0 sm:$0xff]  ;;  %v5467_v42 = vld [vmem:[%s8872_s12 + $0x1] ss:$0 sm:$0xff]  ;;  %v5471_v43 = vld [vmem:[%s8872_s12 + $0x2] ss:$0 sm:$0xff] }
   0xe   :  { %151 = vperm.xlu1 %6634, %v5063_v8   ;;  %v5251_v44 = vld [vmem:[%s8870_s6] ss:$0 sm:$0xff]  ;;  %v5461_v45 = vld [vmem:[%s8870_s6 + $0x3] ss:$0 sm:$0xff]  ;;  %v5049_v51 = vld [vmem:[%s8873_s0 + $0x8] sm:$0xff] }
   0xf   :  { %139 = vperm.xlu0 %6633, %v5061_v9   ;;  %v5462_v46 = vld [vmem:[%s8871_s11] ss:$0 sm:$0xff]  ;;  %v5473_v47 = vld [vmem:[%s8871_s11 + $0x3] ss:$0 sm:$0xff]  ;;  %v5089_v56 = vld [vmem:[%s8866_s1 + $0x28] sm:$0xff] }
  0x10   :  { %v5463_v48 = vld [vmem:[%s8872_s12] ss:$0 sm:$0xff]  ;;  %v5475_v49 = vld [vmem:[%s8872_s12 + $0x3] ss:$0 sm:$0xff]  ;;  %v5091_v0 = vld [vmem:[%s8866_s1 + $0x30] sm:$0xff] }
  0x11   :  { %v5668_v50 = vld [vmem:[#allocation2] ss:$0 sm:$0xff]  ;;  %v5092_v1 = vld [vmem:[%s8866_s1 + $0x38] sm:$0xff]  ;;  %v5054_v2 = vld [vmem:[%s8873_s0 + $0x10] sm:$0xff] }
  0x12   :  { %178 = vperm.xlu1 %6634, %v5068_v10   ;;  %v5088_v55 = vld [vmem:[%s8866_s1 + $0x20] sm:$0xff]  ;;  %v6001_v6 = vpack.c.bf16 %v5092_v1, %v5091_v0  ;;  %v5095_v10 = vld [vmem:[%s8866_s1 + $0x48] sm:$0xff]  ;;  %v5116_v0 = vld [vmem:[%s8866_s1 + $0xb0] sm:$0xff] }
  0x13   :  { %166 = vperm.xlu0 %6633, %v5066_v11   ;;  %v51_v57 = vld [vmem:[%s8873_s0] sm:$0xff]  ;;  %v5998_v61 = vpack.c.bf16 %v5089_v56, %v5088_v55  ;;  %v5059_v11 = vld [vmem:[%s8873_s0 + $0x18] sm:$0xff]  ;;  %v5108_v56 = vld [vmem:[%s8866_s1 + $0x88] sm:$0xff] }
  0x14   :  { %v5094_v9 = vld [vmem:[%s8866_s1 + $0x40] sm:$0xff] }
  0x15   :  { %v6004_v17 = vpack.c.bf16 %v5095_v10, %v5094_v9  ;;  %v5123_v9 = vld [vmem:[%s8866_s1 + $0xd8] sm:$0xff]  ;;  %v5125_v10 = vld [vmem:[%s8866_s1 + $0xe0] sm:$0xff] }
  0x16   :  { %205 = vperm.xlu1 %6634, %v5073_v20   ;;  %v5097_v20 = vld [vmem:[%s8866_s1 + $0x50] sm:$0xff] }
  0x17   :  { %193 = vperm.xlu0 %6633, %v5071_v21   ;;  %v5098_v21 = vld [vmem:[%s8866_s1 + $0x58] sm:$0xff] }
  0x1a   :  { %232 = vperm.xlu1 %6634, %v5078_v22   ;;  %v5064_v22 = vld [vmem:[%s8873_s0 + $0x20] sm:$0xff] }
  0x1b   :  { %220 = vperm.xlu0 %6633, %v5076_v23  }
  0x1e   :  { %259 = vperm.xlu1 %6634, %v5083_v24  }
  0x1f   :  { %247 = vperm.xlu0 %6633, %v5081_v25  }
  0x22   :  { %2726 = vperm.xlu1 %6634, %v5188_v26   ;;  %v6007_v26 = vpack.c.bf16 %v5098_v21, %v5097_v20  ;;  %v5136_v20 = vld [vmem:[%s8866_s1 + $0x118] sm:$0xff] }
  0x23   :  { %1487 = vperm.xlu0 %6633, %v5132_v27  }
  0x26   :  { %885 = vperm.xlu1 %6634, %v5106_v29   ;;  %v5100_v29 = vld [vmem:[%s8866_s1 + $0x60] sm:$0xff] }
  0x27   :  { %2738 = vperm.xlu0 %6633, %v5190_v28  }
  0x2a   :  { %2713 = vperm.xlu1 %6634, %v5186_v31   ;;  %v5069_v31 = vld [vmem:[%s8873_s0 + $0x28] sm:$0xff] }
  0x2b   :  { %2702 = vperm.xlu0 %6633, %v5185_v30   ;;  %v5101_v30 = vld [vmem:[%s8866_s1 + $0x68] sm:$0xff] }
  0x2e   :  { %2751 = vperm.xlu1 %6634, %v5192_v33  }
  0x2f   :  { %2089 = vperm.xlu0 %6633, %v5158_v32  }
  0x32   :  { %2691 = vperm.xlu1 %6634, %v5184_v35   ;;  %v6010_v35 = vpack.c.bf16 %v5101_v30, %v5100_v29  ;;  %v5142_v30 = vld [vmem:[%s8866_s1 + $0x130] sm:$0xff] }
  0x33   :  { %2763 = vperm.xlu0 %6633, %v5194_v34  }
  0x36   :  { %2788 = vperm.xlu1 %6634, %v5198_v37  }
  0x37   :  { %2776 = vperm.xlu0 %6633, %v5196_v36  }
  0x3a   :  { %3906 = vperm.xlu1 %6634, %v5391_v39   ;;  %v5104_v39 = vld [vmem:[%s8866_s1 + $0x78] sm:$0xff] }
  0x3b   :  { %3537 = vperm.xlu0 %6633, %v5321_v38   ;;  %v5103_v38 = vld [vmem:[%s8866_s1 + $0x70] sm:$0xff] }
  0x3e   :  { %4342 = vperm.xlu1 %6634, %v5469_v41  }
  0x3f   :  { %4314 = vperm.xlu0 %6633, %v5465_v40   ;;  %v5074_v40 = vld [vmem:[%s8873_s0 + $0x30] sm:$0xff] }
  0x42   :  { %4355 = vperm.xlu1 %6634, %v5471_v43  }
  0x43   :  { %4327 = vperm.xlu0 %6633, %v5467_v42  }
  0x46   :  { %4275 = vperm.xlu1 %6634, %v5461_v45  }
  0x47   :  { %3168 = vperm.xlu0 %6633, %v5251_v44   ;;  %v6013_v44 = vpack.c.bf16 %v5104_v39, %v5103_v38  ;;  %v5149_v38 = vld [vmem:[%s8866_s1 + $0x158] sm:$0xff]  ;;  %v5151_v39 = vld [vmem:[%s8866_s1 + $0x160] sm:$0xff] }
  0x4a   :  { %4370 = vperm.xlu1 %6634, %v5473_v47   ;;  %v5109_v47 = vld [vmem:[%s8866_s1 + $0x90] sm:$0xff] }
  0x4b   :  { %4287 = vperm.xlu0 %6633, %v5462_v46  }
  0x4e   :  { %4383 = vperm.xlu1 %6634, %v5475_v49   ;;  %v5079_v49 = vld [vmem:[%s8873_s0 + $0x38] sm:$0xff] }
  0x4f   :  { %4299 = vperm.xlu0 %6633, %v5463_v48   ;;  %v5110_v48 = vld [vmem:[%s8866_s1 + $0x98] sm:$0xff] }
  0x53   :  { %4944 = vperm.xlu0 %6633, %v5668_v50  }
  0x81   :  { %v98_v52 = vpop.permute.xlu1 %97 }
  0x82   :  { %v86_v53 = vpop.permute.xlu0 %85 }
  0x83   :  { %v88_v54 = vmul.f32 %v5049_v51, %v86_v53  ;;  %v5107_v53 = vld [vmem:[%s8866_s1 + $0x80] sm:$0xff] }
  0x85   :  { %v100_v58 = vadd.f32 %v98_v52, %v88_v54  ;;  %v71_v59 = vpop.permute.xlu1 %70  ;;  %v6016_v52 = vpack.c.bf16 %v5110_v48, %v5109_v47  ;;  %v5162_v47 = vld [vmem:[%s8866_s1 + $0x198] sm:$0xff] }
  0x86   :  { %v60_v60 = vpop.permute.xlu0 %59 }
  0x87   :  { %v6874_v62 = vmax.f32 %v100_v58, 0.0  ;;  %v62_v63 = vmul.f32 %v60_v60, %v51_v57  ;;  %v5113_v57 = vld [vmem:[%s8866_s1 + $0xa0] sm:$0xff]  ;;  %v5114_v58 = vld [vmem:[%s8866_s1 + $0xa8] sm:$0xff] }
  0x89   :  { %v73_v3 = vadd.f32 %v71_v59, %v62_v63  ;;  %5772 = vmatmul.mubr.msk.f32.vlgmr.msra.gmra.mrb[0].mxu0 %vm269_vm1, %v6874_v62  ;;  %v125_v4 = vpop.permute.xlu1 %124  ;;  %v6022_v63 = vpack.c.bf16 %v5114_v58, %v5113_v57  ;;  %v5168_v57 = vld [vmem:[%s8866_s1 + $0x1b0] sm:$0xff]  ;;  %v5169_v58 = vld [vmem:[%s8866_s1 + $0x1b8] sm:$0xff] }
  0x8a   :  { %v113_v5 = vpop.permute.xlu0 %112  ;;  %5999 = vmatpush3.bf16.msra.mxu0 %v5998_v61  ;;  %5785 = vmatprep.mubr.msk.f32.mxu0 %vm6637_vm0, %v6638_v16  ;;  %v6019_v61 = vpack.c.bf16 %v5108_v56, %v5107_v53  ;;  %v5166_v53 = vld [vmem:[%s8866_s1 + $0x1a8] sm:$0xff] }
  0x8b   :  { %v6889_v7 = vmax.f32 %v73_v3, 0.0  ;;  %v115_v8 = vmul.f32 %v5054_v2, %v113_v5  ;;  %6003 = vmatprep.subr.bf16.mxu0 %v6636_v12  ;;  %v5117_v2 = vld [vmem:[%s8866_s1 + $0xb8] sm:$0xff]  ;;  %v5119_v3 = vld [vmem:[%s8866_s1 + $0xc0] sm:$0xff] }
  0x8c   :  { %v6025_v5 = vpack.c.bf16 %v5117_v2, %v5116_v0  ;;  %v5174_v0 = vld [vmem:[%s8866_s1 + $0x1d0] sm:$0xff]  ;;  %v5175_v2 = vld [vmem:[%s8866_s1 + $0x1d8] sm:$0xff] }
  0x8d   :  { %v127_v13 = vadd.f32 %v125_v4, %v115_v8  ;;  %5779 = vmatmul.mubr.msk.f32.vlgmr.msra.gmra.mrb[0].mxu1 %vm269_vm1, %v6889_v7  ;;  %v152_v14 = vpop.permute.xlu1 %151  ;;  %v5120_v4 = vld [vmem:[%s8866_s1 + $0xc8] sm:$0xff]  ;;  %v5122_v8 = vld [vmem:[%s8866_s1 + $0xd0] sm:$0xff] }
  0x8e   :  { %v140_v15 = vpop.permute.xlu0 %139  ;;  %6002 = vmatpush3.bf16.msra.mxu1 %v6001_v6  ;;  %5792 = vmatprep.mubr.msk.f32.mxu1 %vm6637_vm0, %v6638_v16  ;;  %v6028_v6 = vpack.c.bf16 %v5120_v4, %v5119_v3  ;;  %v5178_v3 = vld [vmem:[%s8866_s1 + $0x1e8] sm:$0xff]  ;;  %v6079_v4 = vpack.c.bf16 %v5175_v2, %v5174_v0 }
  0x8f   :  { %v6905_v18 = vmax.f32 %v127_v13, 0.0  ;;  %v142_v19 = vmul.f32 %v5059_v11, %v140_v15  ;;  %6006 = vmatprep.subr.bf16.mxu1 %v6636_v12  ;;  %v5126_v11 = vld [vmem:[%s8866_s1 + $0xe8] sm:$0xff]  ;;  %v6031_v13 = vpack.c.bf16 %v5123_v9, %v5122_v8  ;;  %v5128_v15 = vld [vmem:[%s8866_s1 + $0xf0] sm:$0xff] }
  0x90   :  { %v5201_v8 = vld [vmem:[%s8874_s5 + $0x90] sm:$0xff] }
  0x91   :  { %v154_v23 = vadd.f32 %v152_v14, %v142_v19  ;;  %5786 = vmatmul.mubr.msk.f32.vlgmr.msra.gmra.mrb[2].mxu0 %vm269_vm1, %v6905_v18  ;;  %v179_v24 = vpop.permute.xlu1 %178  ;;  %v6034_v14 = vpack.c.bf16 %v5126_v11, %v5125_v10  ;;  %v5135_v19 = vld [vmem:[%s8866_s1 + $0x110] sm:$0xff]  ;;  %v5268_v11 = vld [vmem:[%s8874_s5 + $0x280] sm:$0xff] }
  0x92   :  { %v167_v25 = vpop.permute.xlu0 %166  ;;  %6005 = vmatpush3.bf16.msra.mxu0 %v6004_v17  ;;  %5799 = vmatprep.mubr.msk.f32.mxu0 %vm6637_vm0, %v6638_v16  ;;  %v5129_v17 = vld [vmem:[%s8866_s1 + $0xf8] sm:$0xff] }
  0x93   :  { %v6921_v27 = vmax.f32 %v154_v23, 0.0  ;;  %v169_v28 = vmul.f32 %v5064_v22, %v167_v25  ;;  %6009 = vmatprep.subr.bf16.mxu0 %v6636_v12  ;;  %v6037_v21 = vpack.c.bf16 %v5129_v17, %v5128_v15  ;;  %v6040_v22 = vpack.c.bf16 %v5136_v20, %v5135_v19  ;;  %v5133_v23 = vld [vmem:[%s8866_s1 + $0x100] sm:$0xff]  ;;  %v5204_v15 = vld [vmem:[%s8874_s5 + $0xa8] sm:$0xff]  ;;  %v5206_v17 = vld [vmem:[%s8874_s5 + $0xb8] sm:$0xff] }
  0x94   :  { %v5139_v25 = vld [vmem:[%s8866_s1 + $0x120] sm:$0xff]  ;;  %v5273_v19 = vld [vmem:[%s8874_s5 + $0x2a8] sm:$0xff]  ;;  %v6091_v20 = vpack.c.bf16 %v5206_v17, %v5204_v15 }
  0x95   :  { %v181_v32 = vadd.f32 %v179_v24, %v169_v28  ;;  %5793 = vmatmul.mubr.msk.f32.vlgmr.msra.gmra.mrb[2].mxu1 %vm269_vm1, %v6921_v27  ;;  %v206_v33 = vpop.permute.xlu1 %205  ;;  %v5134_v24 = vld [vmem:[%s8866_s1 + $0x108] sm:$0xff] }
  0x96   :  { %v194_v34 = vpop.permute.xlu0 %193  ;;  %6008 = vmatpush3.bf16.msra.mxu1 %v6007_v26  ;;  %5806 = vmatprep.mubr.msk.f32.mxu1 %vm6637_vm0, %v6638_v16  ;;  %v5140_v26 = vld [vmem:[%s8866_s1 + $0x128] sm:$0xff]  ;;  %v6043_v28 = vpack.c.bf16 %v5134_v24, %v5133_v23  ;;  %v5205_v23 = vld [vmem:[%s8874_s5 + $0xb0] sm:$0xff] }
  0x97   :  { %v6937_v36 = vmax.f32 %v181_v32, 0.0  ;;  %v196_v37 = vmul.f32 %v5069_v31, %v194_v34  ;;  %6012 = vmatprep.subr.bf16.mxu1 %v6636_v12  ;;  %v6046_v29 = vpack.c.bf16 %v5140_v26, %v5139_v25  ;;  %v5143_v31 = vld [vmem:[%s8866_s1 + $0x138] sm:$0xff]  ;;  %v5145_v32 = vld [vmem:[%s8866_s1 + $0x140] sm:$0xff] }
  0x98   :  { %v6049_v34 = vpack.c.bf16 %v5143_v31, %v5142_v30  ;;  %v5272_v26 = vld [vmem:[%s8874_s5 + $0x2a0] sm:$0xff]  ;;  %v5208_v30 = vld [vmem:[%s8874_s5 + $0xc8] sm:$0xff]  ;;  %v5210_v31 = vld [vmem:[%s8874_s5 + $0xd8] sm:$0xff] }
  0x99   :  { %v208_v41 = vadd.f32 %v206_v33, %v196_v37  ;;  %5800 = vmatmul.mubr.msk.f32.vlgmr.msra.gmra.mrb[4].mxu0 %vm269_vm1, %v6937_v36  ;;  %v233_v42 = vpop.permute.xlu1 %232  ;;  %v5146_v33 = vld [vmem:[%s8866_s1 + $0x148] sm:$0xff]  ;;  %v5148_v37 = vld [vmem:[%s8866_s1 + $0x150] sm:$0xff] }
  0x9a   :  { %v221_v43 = vpop.permute.xlu0 %220  ;;  %6011 = vmatpush3.bf16.msra.mxu0 %v6010_v35  ;;  %5813 = vmatprep.mubr.msk.f32.mxu0 %vm6637_vm0, %v6638_v16  ;;  %v6052_v35 = vpack.c.bf16 %v5146_v33, %v5145_v32  ;;  %v5277_v32 = vld [vmem:[%s8874_s5 + $0x2c8] sm:$0xff]  ;;  %v6095_v33 = vpack.c.bf16 %v5210_v31, %v5208_v30 }
  0x9b   :  { %v6953_v45 = vmax.f32 %v208_v41, 0.0  ;;  %v223_v46 = vmul.f32 %v5074_v40, %v221_v43  ;;  %6015 = vmatprep.subr.bf16.mxu0 %v6636_v12  ;;  %v5152_v40 = vld [vmem:[%s8866_s1 + $0x168] sm:$0xff]  ;;  %v6055_v41 = vpack.c.bf16 %v5149_v38, %v5148_v37  ;;  %v5154_v43 = vld [vmem:[%s8866_s1 + $0x170] sm:$0xff] }
  0x9c   :  { %v5209_v37 = vld [vmem:[%s8874_s5 + $0xd0] sm:$0xff] }
  0x9d   :  { %v235_v50 = vadd.f32 %v233_v42, %v223_v46  ;;  %5807 = vmatmul.mubr.msk.f32.vlgmr.msra.gmra.mrb[4].mxu1 %vm269_vm1, %v6953_v45  ;;  %v260_v59 = vpop.permute.xlu1 %259  ;;  %v6058_v42 = vpack.c.bf16 %v5152_v40, %v5151_v39  ;;  %v5161_v46 = vld [vmem:[%s8866_s1 + $0x190] sm:$0xff]  ;;  %v5276_v40 = vld [vmem:[%s8874_s5 + $0x2c0] sm:$0xff] }
  0x9e   :  { %v248_v51 = vpop.permute.xlu0 %247  ;;  %6014 = vmatpush3.bf16.msra.mxu1 %v6013_v44  ;;  %5820 = vmatprep.mubr.msk.f32.mxu1 %vm6637_vm0, %v6638_v16  ;;  %v5155_v44 = vld [vmem:[%s8866_s1 + $0x178] sm:$0xff] }
  0x9f   :  { %v6972_v54 = vmax.f32 %v235_v50, 0.0  ;;  %v250_v55 = vmul.f32 %v5079_v49, %v248_v51  ;;  %6018 = vmatprep.subr.bf16.mxu1 %v6636_v12  ;;  %v6061_v48 = vpack.c.bf16 %v5155_v44, %v5154_v43  ;;  %v6064_v49 = vpack.c.bf16 %v5162_v47, %v5161_v46  ;;  %v5159_v50 = vld [vmem:[%s8866_s1 + $0x180] sm:$0xff]  ;;  %v5160_v51 = vld [vmem:[%s8866_s1 + $0x188] sm:$0xff]  ;;  %v5214_v44 = vld [vmem:[%s8874_s5 + $0xf8] sm:$0xff] }
  0xa0   :  { %v5212_v43 = vld [vmem:[%s8874_s5 + $0xe8] sm:$0xff] }
  0xa1   :  { %v262_v60 = vadd.f32 %v260_v59, %v250_v55  ;;  %5814 = vmatmul.mubr.msk.f32.vlgmr.msra.gmra.mrb[6].mxu0 %vm269_vm1, %v6972_v54  ;;  %v6067_v55 = vpack.c.bf16 %v5160_v51, %v5159_v50  ;;  %v5171_v59 = vld [vmem:[%s8866_s1 + $0x1c0] sm:$0xff]  ;;  %v5281_v46 = vld [vmem:[%s8874_s5 + $0x2e8] sm:$0xff]  ;;  %v6099_v47 = vpack.c.bf16 %v5214_v44, %v5212_v43  ;;  %v5213_v50 = vld [vmem:[%s8874_s5 + $0xf0] sm:$0xff] }
  0xa2   :  { %6017 = vmatpush3.bf16.msra.mxu0 %v6016_v52  ;;  %5827 = vmatprep.mubr.msk.f32.mxu0 %vm6637_vm0, %v6638_v16  ;;  %v5165_v52 = vld [vmem:[%s8866_s1 + $0x1a0] sm:$0xff] }
  0xa3   :  { %v6991_v1 = vmax.f32 %v262_v60, 0.0  ;;  %6021 = vmatprep.subr.bf16.mxu0 %v6636_v12  ;;  %v6070_v56 = vpack.c.bf16 %v5166_v53, %v5165_v52  ;;  %v5172_v60 = vld [vmem:[%s8866_s1 + $0x1c8] sm:$0xff]  ;;  %v5280_v53 = vld [vmem:[%s8874_s5 + $0x2e0] sm:$0xff] }
  0xa5   :  { %5821 = vmatmul.mubr.msk.f32.vlgmr.msra.gmra.mrb[6].mxu1 %vm269_vm1, %v6991_v1  ;;  %5828 = vmatmul.mubr.msk.f32.vlgmr.msra.gmra.mrb[8].mxu0 %vm269_vm1, %v6874_v62 }
  0xa6   :  { %6020 = vmatpush3.bf16.msra.mxu1 %v6019_v61  ;;  %6023 = vmatpush3.bf16.msra.mxu0 %v6022_v63  ;;  %v6073_v61 = vpack.c.bf16 %v5169_v58, %v5168_v57  ;;  %v6076_v63 = vpack.c.bf16 %v5172_v60, %v5171_v59  ;;  %v2794_v57 = vld [vmem:[%s8874_s5 + $0x8] sm:$0xff]  ;;  %v2796_v58 = vld [vmem:[%s8874_s5 + $0x18] sm:$0xff] }
  0xa7   :  { %5834 = vmatprep.mubr.msk.f32.mxu1 %vm6637_vm0, %v6638_v16  ;;  %5841 = vmatprep.mubr.msk.f32.mxu0 %vm6637_vm0, %v6638_v16  ;;  %v5253_v59 = vld [vmem:[%s8874_s5 + $0x208] sm:$0xff]  ;;  %v6103_v60 = vpack.c.bf16 %v2796_v58, %v2794_v57 }
  0xa8   :  { %6024 = vmatprep.subr.bf16.mxu1 %v6636_v12  ;;  %6027 = vmatprep.subr.bf16.mxu0 %v6636_v12 }
  0xa9   :  { %5835 = vmatmul.mubr.msk.f32.vlgmr.msra.gmra.mrb[8].mxu1 %vm269_vm1, %v6889_v7  ;;  %5842 = vmatmul.mubr.msk.f32.vlgmr.msra.gmra.mrb[10].mxu0 %vm269_vm1, %v6905_v18 }
  0xaa   :  { %6026 = vmatpush3.bf16.msra.mxu1 %v6025_v5  ;;  %6029 = vmatpush3.bf16.msra.mxu0 %v6028_v6  ;;  %v5180_v6 = vld [vmem:[%s8866_s1 + $0x1f0] sm:$0xff] }
  0xab   :  { %5848 = vmatprep.mubr.msk.f32.mxu1 %vm6637_vm0, %v6638_v16  ;;  %5855 = vmatprep.mubr.msk.f32.mxu0 %vm6637_vm0, %v6638_v16 }
  0xac   :  { %6030 = vmatprep.subr.bf16.mxu1 %v6636_v12  ;;  %6033 = vmatprep.subr.bf16.mxu0 %v6636_v12 }
  0xad   :  { %5849 = vmatmul.mubr.msk.f32.vlgmr.msra.gmra.mrb[10].mxu1 %vm269_vm1, %v6921_v27  ;;  %5856 = vmatmul.mubr.msk.f32.vlgmr.msra.gmra.mrb[12].mxu0 %vm269_vm1, %v6937_v36 }
  0xae   :  { %6032 = vmatpush3.bf16.msra.mxu1 %v6031_v13  ;;  %6035 = vmatpush3.bf16.msra.mxu0 %v6034_v14  ;;  %v5270_v13 = vld [vmem:[%s8874_s5 + $0x290] sm:$0xff] }
  0xaf   :  { %5862 = vmatprep.mubr.msk.f32.mxu1 %vm6637_vm0, %v6638_v16  ;;  %5869 = vmatprep.mubr.msk.f32.mxu0 %vm6637_vm0, %v6638_v16  ;;  %v6153_v14 = vpack.c.bf16 %v5270_v13, %v5268_v11 }
  0xb0   :  { %6036 = vmatprep.subr.bf16.mxu1 %v6636_v12  ;;  %6039 = vmatprep.subr.bf16.mxu0 %v6636_v12 }
  0xb1   :  { %5863 = vmatmul.mubr.msk.f32.vlgmr.msra.gmra.mrb[12].mxu1 %vm269_vm1, %v6953_v45  ;;  %5870 = vmatmul.mubr.msk.f32.vlgmr.msra.gmra.mrb[14].mxu0 %vm269_vm1, %v6972_v54 }
  0xb2   :  { %6038 = vmatpush3.bf16.msra.mxu1 %v6037_v21  ;;  %6041 = vmatpush3.bf16.msra.mxu0 %v6040_v22  ;;  %v5275_v21 = vld [vmem:[%s8874_s5 + $0x2b8] sm:$0xff]  ;;  %v5203_v22 = vld [vmem:[%s8874_s5 + $0xa0] sm:$0xff] }
  0xb3   :  { %5876 = vmatprep.mubr.msk.f32.mxu1 %vm6637_vm0, %v6638_v16  ;;  %5883 = vmatprep.mubr.msk.f32.mxu0 %vm6637_vm0, %v6638_v16  ;;  %v6155_v24 = vpack.c.bf16 %v5275_v21, %v5273_v19  ;;  %v6093_v25 = vpack.c.bf16 %v5205_v23, %v5203_v22 }
  0xb4   :  { %6042 = vmatprep.subr.bf16.mxu1 %v6636_v12  ;;  %6045 = vmatprep.subr.bf16.mxu0 %v6636_v12 }
  0xb5   :  { %5877 = vmatmul.mubr.msk.f32.vlgmr.msra.gmra.mrb[14].mxu1 %vm269_vm1, %v6991_v1  ;;  %5884 = vmatmul.mubr.msk.f32.vlgmr.msra.gmra.mrb[16].mxu0 %vm269_vm1, %v6874_v62 }
  0xb6   :  { %6044 = vmatpush3.bf16.msra.mxu1 %v6043_v28  ;;  %6047 = vmatpush3.bf16.msra.mxu0 %v6046_v29  ;;  %v5274_v28 = vld [vmem:[%s8874_s5 + $0x2b0] sm:$0xff] }
  0xb7   :  { %5890 = vmatprep.mubr.msk.f32.mxu1 %vm6637_vm0, %v6638_v16  ;;  %5897 = vmatprep.mubr.msk.f32.mxu0 %vm6637_vm0, %v6638_v16  ;;  %v6157_v29 = vpack.c.bf16 %v5274_v28, %v5272_v26 }
  0xb8   :  { %6048 = vmatprep.subr.bf16.mxu1 %v6636_v12  ;;  %6051 = vmatprep.subr.bf16.mxu0 %v6636_v12 }
  0xb9   :  { %5891 = vmatmul.mubr.msk.f32.vlgmr.msra.gmra.mrb[16].mxu1 %vm269_vm1, %v6889_v7  ;;  %5898 = vmatmul.mubr.msk.f32.vlgmr.msra.gmra.mrb[18].mxu0 %vm269_vm1, %v6905_v18 }
  0xba   :  { %6050 = vmatpush3.bf16.msra.mxu1 %v6049_v34  ;;  %6053 = vmatpush3.bf16.msra.mxu0 %v6052_v35  ;;  %v5279_v34 = vld [vmem:[%s8874_s5 + $0x2d8] sm:$0xff]  ;;  %v5207_v35 = vld [vmem:[%s8874_s5 + $0xc0] sm:$0xff] }
  0xbb   :  { %5904 = vmatprep.mubr.msk.f32.mxu1 %vm6637_vm0, %v6638_v16  ;;  %5911 = vmatprep.mubr.msk.f32.mxu0 %vm6637_vm0, %v6638_v16  ;;  %v6159_v38 = vpack.c.bf16 %v5279_v34, %v5277_v32  ;;  %v6097_v39 = vpack.c.bf16 %v5209_v37, %v5207_v35 }
  0xbc   :  { %6054 = vmatprep.subr.bf16.mxu1 %v6636_v12  ;;  %6057 = vmatprep.subr.bf16.mxu0 %v6636_v12 }
  0xbd   :  { %5905 = vmatmul.mubr.msk.f32.vlgmr.msra.gmra.mrb[18].mxu1 %vm269_vm1, %v6921_v27  ;;  %5912 = vmatmul.mubr.msk.f32.vlgmr.msra.gmra.mrb[20].mxu0 %vm269_vm1, %v6937_v36 }
  0xbe   :  { %6056 = vmatpush3.bf16.msra.mxu1 %v6055_v41  ;;  %6059 = vmatpush3.bf16.msra.mxu0 %v6058_v42  ;;  %v5278_v41 = vld [vmem:[%s8874_s5 + $0x2d0] sm:$0xff] }
  0xbf   :  { %5918 = vmatprep.mubr.msk.f32.mxu1 %vm6637_vm0, %v6638_v16  ;;  %5925 = vmatprep.mubr.msk.f32.mxu0 %vm6637_vm0, %v6638_v16  ;;  %v6161_v42 = vpack.c.bf16 %v5278_v41, %v5276_v40  ;;  %v1488_v40 = vpop.permute.xlu0 %1487 }
  0xc0   :  { %6060 = vmatprep.subr.bf16.mxu1 %v6636_v12  ;;  %6063 = vmatprep.subr.bf16.mxu0 %v6636_v12 }
  0xc1   :  { %5919 = vmatmul.mubr.msk.f32.vlgmr.msra.gmra.mrb[20].mxu1 %vm269_vm1, %v6953_v45  ;;  %5926 = vmatmul.mubr.msk.f32.vlgmr.msra.gmra.mrb[22].mxu0 %vm269_vm1, %v6972_v54 }
  0xc2   :  { %6062 = vmatpush3.bf16.msra.mxu1 %v6061_v48  ;;  %6065 = vmatpush3.bf16.msra.mxu0 %v6064_v49  ;;  %v5283_v48 = vld [vmem:[%s8874_s5 + $0x2f8] sm:$0xff]  ;;  %v5211_v49 = vld [vmem:[%s8874_s5 + $0xe0] sm:$0xff] }
  0xc3   :  { %5932 = vmatprep.mubr.msk.f32.mxu1 %vm6637_vm0, %v6638_v16  ;;  %5939 = vmatprep.mubr.msk.f32.mxu0 %vm6637_vm0, %v6638_v16  ;;  %v6163_v51 = vpack.c.bf16 %v5283_v48, %v5281_v46  ;;  %v6101_v52 = vpack.c.bf16 %v5213_v50, %v5211_v49  ;;  %v2727_v48 = vpop.permute.xlu1 %2726 }
  0xc4   :  { %6066 = vmatprep.subr.bf16.mxu1 %v6636_v12  ;;  %6069 = vmatprep.subr.bf16.mxu0 %v6636_v12 }
  0xc5   :  { %5933 = vmatmul.mubr.msk.f32.vlgmr.msra.gmra.mrb[22].mxu1 %vm269_vm1, %v6991_v1  ;;  %5940 = vmatmul.mubr.msk.f32.vlgmr.msra.gmra.mrb[24].mxu0 %vm269_vm1, %v6874_v62  ;;  %v5177_v62 = vld [vmem:[%s8866_s1 + $0x1e0] sm:$0xff] }
  0xc6   :  { %6068 = vmatpush3.bf16.msra.mxu1 %v6067_v55  ;;  %6071 = vmatpush3.bf16.msra.mxu0 %v6070_v56  ;;  %v6082_v5 = vpack.c.bf16 %v5178_v3, %v5177_v62  ;;  %v5282_v55 = vld [vmem:[%s8874_s5 + $0x2f0] sm:$0xff] }
  0xc7   :  { %5946 = vmatprep.mubr.msk.f32.mxu1 %vm6637_vm0, %v6638_v16  ;;  %5953 = vmatprep.mubr.msk.f32.mxu0 %vm6637_vm0, %v6638_v16  ;;  %v6165_v56 = vpack.c.bf16 %v5282_v55, %v5280_v53  ;;  %v2795_v53 = vld [vmem:[%s8874_s5 + $0x10] sm:$0xff] }
  0xc8   :  { %6072 = vmatprep.subr.bf16.mxu1 %v6636_v12  ;;  %6075 = vmatprep.subr.bf16.mxu0 %v6636_v12 }
  0xc9   :  { %5947 = vmatmul.mubr.msk.f32.vlgmr.msra.gmra.mrb[24].mxu1 %vm269_vm1, %v6889_v7  ;;  %5954 = vmatmul.mubr.msk.f32.vlgmr.msra.gmra.mrb[26].mxu0 %vm269_vm1, %v6905_v18  ;;  %v5181_v7 = vld [vmem:[%s8866_s1 + $0x1f8] sm:$0xff] }
  0xca   :  { %6074 = vmatpush3.bf16.msra.mxu1 %v6073_v61  ;;  %6077 = vmatpush3.bf16.msra.mxu0 %v6076_v63  ;;  %v6085_v18 = vpack.c.bf16 %v5181_v7, %v5180_v6  ;;  %v5255_v61 = vld [vmem:[%s8874_s5 + $0x218] sm:$0xff] }
  0xcb   :  { %5960 = vmatprep.mubr.msk.f32.mxu1 %vm6637_vm0, %v6638_v16  ;;  %5967 = vmatprep.mubr.msk.f32.mxu0 %vm6637_vm0, %v6638_v16  ;;  %v6167_v63 = vpack.c.bf16 %v5255_v61, %v5253_v59  ;;  %v5252_v59 = vld [vmem:[%s8874_s5 + $0x200] sm:$0xff]  ;;  %v2798_v61 = vld [vmem:[%s8874_s5 + $0x28] sm:$0xff] }
  0xcc   :  { %6078 = vmatprep.subr.bf16.mxu1 %v6636_v12  ;;  %6081 = vmatprep.subr.bf16.mxu0 %v6636_v12 }
  0xcd   :  { %5961 = vmatmul.mubr.msk.f32.vlgmr.msra.gmra.mrb[26].mxu1 %vm269_vm1, %v6921_v27  ;;  %5968 = vmatmul.mubr.msk.f32.vlgmr.msra.gmra.mrb[28].mxu0 %vm269_vm1, %v6937_v36  ;;  %v5202_v27 = vld [vmem:[%s8874_s5 + $0x98] sm:$0xff]  ;;  %v5269_v36 = vld [vmem:[%s8874_s5 + $0x288] sm:$0xff] }
  0xce   :  { %6080 = vmatpush3.bf16.msra.mxu1 %v6079_v4  ;;  %6083 = vmatpush3.bf16.msra.mxu0 %v6082_v5 }
  0xcf   :  { %5974 = vmatprep.mubr.msk.f32.mxu1 %vm6637_vm0, %v6638_v16  ;;  %5981 = vmatprep.mubr.msk.f32.mxu0 %vm6637_vm0, %v6638_v16 }
  0xd0   :  { %6084 = vmatprep.subr.bf16.mxu1 %v6636_v12  ;;  %v5200_v12 = vld [vmem:[%s8874_s5 + $0x88] sm:$0xff] }
  0xd1   :  { %5975 = vmatmul.mubr.msk.f32.vlgmr.msra.gmra.mrb[28].mxu1 %vm269_vm1, %v6953_v45  ;;  %5982 = vmatmul.mubr.msk.f32.vlgmr.msra.gmra.mrb[30].mxu0 %vm269_vm1, %v6972_v54  ;;  %v6087_v45 = vpack.c.bf16 %v5202_v27, %v5200_v12  ;;  %v5271_v54 = vld [vmem:[%s8874_s5 + $0x298] sm:$0xff] }
  0xd2   :  { %6086 = vmatpush3.bf16.msra.mxu1 %v6085_v18  ;;  %5988 = vmatprep.mubr.msk.f32.mxu1 %vm6637_vm0, %v6638_v16  ;;  %v6151_v9 = vpack.c.bf16 %v5271_v54, %v5269_v36 }
  0xd3   :  { %2894 = vmatprep.mubr.f32.mxu0 %v6638_v16  ;;  %6088 = vmatprep.subr.bf16.mxu0 %v6087_v45 }
  0xd4   :  { %6152 = vmatprep.subr.bf16.mxu1 %v6151_v9 }
  0xd5   :  { %5989 = vmatmul.mubr.msk.f32.vlgmr.msra.gmra.mrb[30].mxu1 %vm269_vm1, %v6991_v1  ;;  %v5199_v1 = vld [vmem:[%s8874_s5 + $0x80] sm:$0xff] }
  0xd6   :  { %3271 = vmatprep.mubr.f32.mxu1 %v6638_v16  ;;  %v6089_v10 = vpack.c.bf16 %v5201_v8, %v5199_v1  ;;  %6154 = vmatpush1.bf16.msra.mxu1 %v6153_v14 }
  0xd7   :  { %6156 = vmatprep.subr.bf16.mxu1 %v6155_v24 }
  0xd8   :  { %6090 = vmatpush1.bf16.msra.mxu0 %v6089_v10 }
  0xd9   :  { %6092 = vmatprep.subr.bf16.mxu0 %v6091_v20 }
  0xda   :  { %6158 = vmatpush1.bf16.msra.mxu1 %v6157_v29 }
  0xdb   :  { %6160 = vmatprep.subr.bf16.mxu1 %v6159_v38 }
  0xdc   :  { %6094 = vmatpush1.bf16.msra.mxu0 %v6093_v25 }
  0xdd   :  { %6096 = vmatprep.subr.bf16.mxu0 %v6095_v33 }
  0xde   :  { %6162 = vmatpush1.bf16.msra.mxu1 %v6161_v42 }
  0xdf   :  { %6164 = vmatprep.subr.bf16.mxu1 %v6163_v51 }
  0xe0   :  { %6098 = vmatpush1.bf16.msra.mxu0 %v6097_v39 }
  0xe1   :  { %6100 = vmatprep.subr.bf16.mxu0 %v6099_v47 }
  0xe2   :  { %6166 = vmatpush1.bf16.msra.mxu1 %v6165_v56 }
  0xe3   :  { %6168 = vmatprep.subr.bf16.mxu1 %v6167_v63  ;;  %v2739_v63 = vpop.permute.xlu0 %2738 }
  0xe4   :  { %6102 = vmatpush1.bf16.msra.mxu0 %v6101_v52  ;;  %v2793_v52 = vld [vmem:[%s8874_s5] sm:$0xff] }
  0xe5   :  { %6104 = vmatprep.subr.bf16.mxu0 %v6103_v60  ;;  %v5254_v60 = vld [vmem:[%s8874_s5 + $0x210] sm:$0xff] }
 0x15c   :  { %v339_v0 = vpop.f32.mrb[0].mxu0 }
 0x15d   :  { %v5773_v2 = vpop.f32.mrb[1].mxu0 }
 0x15e   :  { %v5257_v2 = vld [vmem:[%s8874_s5 + $0x228] sm:$0xff] }
 0x160   :  { %v412_v62 = vpop.f32.mrb[0].mxu1 }
 0x161   :  { %v413_v3 = vadd.f32 %v412_v62, %v339_v0  ;;  %v5780_v4 = vpop.f32.mrb[1].mxu1  ;;  %v2800_v0 = vld [vmem:[%s8874_s5 + $0x38] sm:$0xff] }
 0x162   :  { %v5259_v62 = vld [vmem:[%s8874_s5 + $0x238] sm:$0xff] }
 0x164   :  { %v488_v5 = vpop.f32.mrb[2].mxu0 }
 0x165   :  { %v492_v6 = vadd.f32 %v488_v5, %v413_v3  ;;  %v5787_v7 = vpop.f32.mrb[3].mxu0 }
 0x166   :  { %v6105_v7 = vpack.c.bf16 %v2795_v53, %v2793_v52 }
 0x168   :  { %v565_v18 = vpop.f32.mrb[2].mxu1 }
 0x169   :  { %v569_v12 = vadd.f32 %v565_v18, %v492_v6  ;;  %v5794_v27 = vpop.f32.mrb[3].mxu1  ;;  %v6169_v18 = vpack.c.bf16 %v5254_v60, %v5252_v59  ;;  %v5218_v59 = vld [vmem:[%s8874_s5 + $0x108] sm:$0xff]  ;;  %v5220_v60 = vld [vmem:[%s8874_s5 + $0x118] sm:$0xff] }
 0x16a   :  { %v2799_v27 = vld [vmem:[%s8874_s5 + $0x30] sm:$0xff] }
 0x16c   :  { %v642_v36 = vpop.f32.mrb[4].mxu0 }
 0x16d   :  { %v646_v45 = vadd.f32 %v642_v36, %v569_v12  ;;  %v5801_v54 = vpop.f32.mrb[5].mxu0  ;;  %v2797_v12 = vld [vmem:[%s8874_s5 + $0x20] sm:$0xff] }
 0x16e   :  { %v5256_v36 = vld [vmem:[%s8874_s5 + $0x220] sm:$0xff] }
 0x170   :  { %v719_v1 = vpop.f32.mrb[4].mxu1 }
 0x171   :  { %v723_v8 = vadd.f32 %v719_v1, %v646_v45  ;;  %v5808_v9 = vpop.f32.mrb[5].mxu1 }
 0x172   :  { %v6107_v9 = vpack.c.bf16 %v2800_v0, %v2798_v61  ;;  %v5287_v61 = vld [vmem:[%s8874_s5 + $0x308] sm:$0xff] }
 0x174   :  { %v796_v10 = vpop.f32.mrb[6].mxu0 }
 0x175   :  { %v800_v11 = vadd.f32 %v796_v10, %v723_v8  ;;  %v5815_v13 = vpop.f32.mrb[7].mxu0  ;;  %v6171_v10 = vpack.c.bf16 %v5259_v62, %v5257_v2 }
 0x176   :  { %v2802_v13 = vld [vmem:[%s8874_s5 + $0x48] sm:$0xff] }
 0x178   :  { %v873_v14 = vpop.f32.mrb[6].mxu1  ;;  %v961_v15 = vpop.f32.mrb[8].mxu0 }
 0x179   :  { %v7344_v17 = vadd.f32 %v873_v14, %v800_v11  ;;  %v5822_v19 = vpop.f32.mrb[7].mxu1  ;;  %v5829_v20 = vpop.f32.mrb[9].mxu0  ;;  %v5258_v11 = vld [vmem:[%s8874_s5 + $0x230] sm:$0xff]  ;;  %v2804_v14 = vld [vmem:[%s8874_s5 + $0x58] sm:$0xff] }
 0x17a   :  { %v5263_v19 = vld [vmem:[%s8874_s5 + $0x258] sm:$0xff]  ;;  %v886_v20 = vpop.permute.xlu1 %885 }
 0x17c   :  { %v1031_v21 = vpop.f32.mrb[8].mxu1  ;;  %v1104_v22 = vpop.f32.mrb[10].mxu0 }
 0x17d   :  { %v1032_v23 = vadd.f32 %v1031_v21, %v961_v15  ;;  %v5836_v24 = vpop.f32.mrb[9].mxu1  ;;  %v5843_v25 = vpop.f32.mrb[11].mxu0  ;;  %v5261_v15 = vld [vmem:[%s8874_s5 + $0x248] sm:$0xff] }
 0x17e   :  { %v6109_v24 = vpack.c.bf16 %v2799_v27, %v2797_v12  ;;  %v6173_v25 = vpack.c.bf16 %v5258_v11, %v5256_v36  ;;  %v2714_v0 = vpop.permute.xlu1 %2713  ;;  %v5291_v11 = vld [vmem:[%s8874_s5 + $0x328] sm:$0xff] }
 0x17f   :  { %v1108_v26 = vadd.f32 %v1104_v22, %v1032_v23 }
 0x180   :  { %v1178_v28 = vpop.f32.mrb[10].mxu1  ;;  %v1252_v29 = vpop.f32.mrb[12].mxu0 }
 0x181   :  { %v1182_v30 = vadd.f32 %v1178_v28, %v1108_v26  ;;  %v5850_v31 = vpop.f32.mrb[11].mxu1  ;;  %v5857_v32 = vpop.f32.mrb[13].mxu0  ;;  %v6111_v26 = vpack.c.bf16 %v2804_v14, %v2802_v13  ;;  %v2801_v28 = vld [vmem:[%s8874_s5 + $0x40] sm:$0xff]  ;;  %v5293_v13 = vld [vmem:[%s8874_s5 + $0x338] sm:$0xff] }
 0x182   :  { %v888_v31 = vadd.f32 %v886_v20, %v7344_v17  ;;  %v5265_v17 = vld [vmem:[%s8874_s5 + $0x268] sm:$0xff] }
 0x183   :  { %v1256_v33 = vadd.f32 %v1252_v29, %v1182_v30  ;;  %v2803_v29 = vld [vmem:[%s8874_s5 + $0x50] sm:$0xff]  ;;  %v5260_v30 = vld [vmem:[%s8874_s5 + $0x240] sm:$0xff] }
 0x184   :  { %v1326_v34 = vpop.f32.mrb[12].mxu1  ;;  %v1400_v35 = vpop.f32.mrb[14].mxu0 }
 0x185   :  { %v1330_v37 = vadd.f32 %v1326_v34, %v1256_v33  ;;  %v5864_v38 = vpop.f32.mrb[13].mxu1  ;;  %v5871_v39 = vpop.f32.mrb[15].mxu0 }
 0x186   :  { %v2806_v38 = vld [vmem:[%s8874_s5 + $0x68] sm:$0xff]  ;;  %v2808_v39 = vld [vmem:[%s8874_s5 + $0x78] sm:$0xff] }
 0x187   :  { %v1404_v41 = vadd.f32 %v1400_v35, %v1330_v37  ;;  %v6175_v35 = vpack.c.bf16 %v5263_v19, %v5261_v15  ;;  %v5262_v37 = vld [vmem:[%s8874_s5 + $0x250] sm:$0xff] }
 0x188   :  { %v1474_v42 = vpop.f32.mrb[14].mxu1  ;;  %v1563_v43 = vpop.f32.mrb[16].mxu0 }
 0x189   :  { %v1478_v44 = vadd.f32 %v1474_v42, %v1404_v41  ;;  %v5878_v46 = vpop.f32.mrb[15].mxu1  ;;  %v5885_v47 = vpop.f32.mrb[17].mxu0 }
 0x18a   :  { %v2703_v41 = vpop.permute.xlu0 %2702  ;;  %v6113_v46 = vpack.c.bf16 %v2803_v29, %v2801_v28  ;;  %v6177_v47 = vpack.c.bf16 %v5262_v37, %v5260_v30  ;;  %v5297_v37 = vld [vmem:[%s8874_s5 + $0x358] sm:$0xff] }
 0x18b   :  { %v1490_v49 = vadd.f32 %v1488_v40, %v1478_v44  ;;  %v5267_v40 = vld [vmem:[%s8874_s5 + $0x278] sm:$0xff]  ;;  %v2705_v52 = vmul.f32 %v2703_v41, %v888_v31  ;;  %v6187_v31 = vpack.c.bf16 %v5293_v13, %v5291_v11  ;;  %v5234_v11 = vld [vmem:[%s8874_s5 + $0x180] sm:$0xff]  ;;  %v5236_v13 = vld [vmem:[%s8874_s5 + $0x190] sm:$0xff] }
 0x18c   :  { %v1633_v50 = vpop.f32.mrb[16].mxu1  ;;  %v1706_v51 = vpop.f32.mrb[18].mxu0 }
 0x18d   :  { %v2729_v55 = vmul.f32 %v2727_v48, %v1490_v49  ;;  %v1634_v56 = vadd.f32 %v1633_v50, %v1563_v43  ;;  %v5892_v57 = vpop.f32.mrb[17].mxu1  ;;  %v5899_v58 = vpop.f32.mrb[19].mxu0  ;;  %v6115_v48 = vpack.c.bf16 %v2808_v39, %v2806_v38  ;;  %v2805_v49 = vld [vmem:[%s8874_s5 + $0x60] sm:$0xff]  ;;  %v2807_v50 = vld [vmem:[%s8874_s5 + $0x70] sm:$0xff] }
 0x18e   :  { %v6179_v57 = vpack.c.bf16 %v5267_v40, %v5265_v17  ;;  %v5266_v58 = vld [vmem:[%s8874_s5 + $0x270] sm:$0xff]  ;;  %v2090_v38 = vpop.permute.xlu0 %2089 }
 0x18f   :  { %v2741_v3 = vadd.f32 %v2739_v63, %v2729_v55  ;;  %v1710_v4 = vadd.f32 %v1706_v51, %v1634_v56  ;;  %v5264_v51 = vld [vmem:[%s8874_s5 + $0x260] sm:$0xff]  ;;  %v5289_v63 = vld [vmem:[%s8874_s5 + $0x318] sm:$0xff] }
 0x190   :  { %v1780_v5 = vpop.f32.mrb[18].mxu1  ;;  %v1854_v6 = vpop.f32.mrb[20].mxu0 }
 0x191   :  { %v7379_v45 = vmax.f32 %v2741_v3, 0.0  ;;  %v1784_v54 = vadd.f32 %v1780_v5, %v1710_v4  ;;  %v5906_v1 = vpop.f32.mrb[19].mxu1  ;;  %v5913_v8 = vpop.f32.mrb[21].mxu0  ;;  %v6117_v3 = vpack.c.bf16 %v2807_v50, %v2805_v49  ;;  %v6181_v4 = vpack.c.bf16 %v5266_v58, %v5264_v51  ;;  %v5301_v58 = vld [vmem:[%s8874_s5 + $0x378] sm:$0xff] }
 0x192   :  { %v6119_v5 = vpack.c.bf16 %v5220_v60, %v5218_v59  ;;  %v5286_v1 = vld [vmem:[%s8874_s5 + $0x300] sm:$0xff]  ;;  %v5288_v8 = vld [vmem:[%s8874_s5 + $0x310] sm:$0xff]  ;;  %v2752_v60 = vpop.permute.xlu1 %2751 }
 0x193   :  { %v1858_v21 = vadd.f32 %v1854_v6, %v1784_v54  ;;  %5215 = vmatmul.mubr.msk.f32.vlgmr.msra.gmra.mrb[32].mxu0 %vm2826_vm2, %v7379_v45  ;;  %5284 = vmatmul.mubr.msk.f32.vlgmr.msra.gmra.mrb[32].mxu1 %vm2826_vm2, %v7379_v45  ;;  %v5217_v6 = vld [vmem:[%s8874_s5 + $0x100] sm:$0xff]  ;;  %v6183_v54 = vpack.c.bf16 %v5289_v63, %v5287_v61 }
 0x194   :  { %6106 = vmatpush1.bf16.msra.mxu0 %v6105_v7  ;;  %6170 = vmatpush1.bf16.msra.mxu1 %v6169_v18  ;;  %v1928_v22 = vpop.f32.mrb[20].mxu1  ;;  %v2002_v23 = vpop.f32.mrb[22].mxu0  ;;  %v5219_v7 = vld [vmem:[%s8874_s5 + $0x110] sm:$0xff]  ;;  %v2716_v18 = vadd.f32 %v2714_v0, %v2705_v52 }
 0x195   :  { %v1932_v32 = vadd.f32 %v1928_v22, %v1858_v21  ;;  %v5920_v33 = vpop.f32.mrb[21].mxu1  ;;  %v5927_v34 = vpop.f32.mrb[23].mxu0  ;;  %6108 = vmatprep.subr.bf16.mxu0 %v6107_v9  ;;  %6172 = vmatprep.subr.bf16.mxu1 %v6171_v10  ;;  %v5222_v9 = vld [vmem:[%s8874_s5 + $0x128] sm:$0xff]  ;;  %v5224_v10 = vld [vmem:[%s8874_s5 + $0x138] sm:$0xff]  ;;  %v6121_v20 = vpack.c.bf16 %v5219_v7, %v5217_v6  ;;  %v6185_v21 = vpack.c.bf16 %v5288_v8, %v5286_v1  ;;  %v5221_v22 = vld [vmem:[%s8874_s5 + $0x120] sm:$0xff] }
 0x196   :  { %2968 = vmatprep.mubr.f32.mxu0 %v6638_v16  ;;  %3342 = vmatprep.mubr.f32.mxu1 %v6638_v16  ;;  %v6123_v30 = vpack.c.bf16 %v5224_v10, %v5222_v9  ;;  %v5226_v33 = vld [vmem:[%s8874_s5 + $0x148] sm:$0xff]  ;;  %v5228_v34 = vld [vmem:[%s8874_s5 + $0x158] sm:$0xff]  ;;  %v2764_v8 = vpop.permute.xlu0 %2763 }
 0x197   :  { %v2006_v42 = vadd.f32 %v2002_v23, %v1932_v32  ;;  %v5223_v23 = vld [vmem:[%s8874_s5 + $0x130] sm:$0xff]  ;;  %v5306_v1 = vld [vmem:[%s8874_s5 + $0x398] sm:$0xff] }
 0x198   :  { %6110 = vmatpush1.bf16.msra.mxu0 %v6109_v24  ;;  %6174 = vmatpush1.bf16.msra.mxu1 %v6173_v25  ;;  %v2076_v43 = vpop.f32.mrb[22].mxu1  ;;  %v2165_v44 = vpop.f32.mrb[24].mxu0  ;;  %v5290_v24 = vld [vmem:[%s8874_s5 + $0x320] sm:$0xff]  ;;  %v7486_v25 = vmax.f32 %v2716_v18, 0.0  ;;  %v5292_v32 = vld [vmem:[%s8874_s5 + $0x330] sm:$0xff]  ;;  %v6125_v41 = vpack.c.bf16 %v5223_v23, %v5221_v22  ;;  %v5239_v22 = vld [vmem:[%s8874_s5 + $0x1a8] sm:$0xff] }
 0x199   :  { %v7436_v53 = vadd.f32 %v2076_v43, %v2006_v42  ;;  %v5934_v55 = vpop.f32.mrb[23].mxu1  ;;  %v5941_v56 = vpop.f32.mrb[25].mxu0  ;;  %6112 = vmatprep.subr.bf16.mxu0 %v6111_v26  ;;  %6176 = vmatprep.subr.bf16.mxu1 %v6175_v35  ;;  %v5295_v35 = vld [vmem:[%s8874_s5 + $0x348] sm:$0xff]  ;;  %v6189_v42 = vpack.c.bf16 %v5292_v32, %v5290_v24  ;;  %v6127_v43 = vpack.c.bf16 %v5228_v34, %v5226_v33  ;;  %v5298_v18 = vld [vmem:[%s8874_s5 + $0x360] sm:$0xff]  ;;  %v5241_v23 = vld [vmem:[%s8874_s5 + $0x1b8] sm:$0xff] }
 0x19a   :  { %v6191_v52 = vpack.c.bf16 %v5297_v37, %v5295_v35  ;;  %v5296_v55 = vld [vmem:[%s8874_s5 + $0x350] sm:$0xff]  ;;  %v5230_v56 = vld [vmem:[%s8874_s5 + $0x168] sm:$0xff]  ;;  %v6139_v33 = vpack.c.bf16 %v5241_v23, %v5239_v22  ;;  %v5307_v35 = vld [vmem:[%s8874_s5 + $0x3a0] sm:$0xff] }
 0x19b   :  { %v5308_v24 = vld [vmem:[%s8874_s5 + $0x3a8] sm:$0xff]  ;;  %v5309_v37 = vld [vmem:[%s8874_s5 + $0x3b0] sm:$0xff]  ;;  %v5342_v22 = vld [vmem:[%s8874_s5 + $0x4a0] sm:$0xff] }
 0x19c   :  { %6114 = vmatpush1.bf16.msra.mxu0 %v6113_v46  ;;  %6178 = vmatpush1.bf16.msra.mxu1 %v6177_v47  ;;  %v2235_v2 = vpop.f32.mrb[24].mxu1  ;;  %v2308_v62 = vpop.f32.mrb[26].mxu0  ;;  %v5227_v46 = vld [vmem:[%s8874_s5 + $0x150] sm:$0xff]  ;;  %v5294_v47 = vld [vmem:[%s8874_s5 + $0x340] sm:$0xff] }
 0x19d   :  { %v2236_v12 = vadd.f32 %v2235_v2, %v2165_v44  ;;  %v5948_v27 = vpop.f32.mrb[25].mxu1  ;;  %v5955_v36 = vpop.f32.mrb[27].mxu0  ;;  %6116 = vmatprep.subr.bf16.mxu0 %v6115_v48  ;;  %6180 = vmatprep.subr.bf16.mxu1 %v6179_v57  ;;  %v5225_v44 = vld [vmem:[%s8874_s5 + $0x140] sm:$0xff]  ;;  %v2092_v48 = vadd.f32 %v2090_v38, %v7436_v53  ;;  %v5232_v57 = vld [vmem:[%s8874_s5 + $0x178] sm:$0xff]  ;;  %v5299_v53 = vld [vmem:[%s8874_s5 + $0x368] sm:$0xff]  ;;  %v6193_v0 = vpack.c.bf16 %v5296_v55, %v5294_v47 }
 0x19e   :  { %v6129_v63 = vpack.c.bf16 %v5227_v46, %v5225_v44  ;;  %v6131_v2 = vpack.c.bf16 %v5232_v57, %v5230_v56  ;;  %v6195_v7 = vpack.c.bf16 %v5301_v58, %v5299_v53  ;;  %v5235_v27 = vld [vmem:[%s8874_s5 + $0x188] sm:$0xff]  ;;  %v5237_v36 = vld [vmem:[%s8874_s5 + $0x198] sm:$0xff]  ;;  %v5242_v44 = vld [vmem:[%s8874_s5 + $0x1c0] sm:$0xff]  ;;  %v2777_v53 = vpop.permute.xlu0 %2776 }
 0x19f   :  { %v2312_v14 = vadd.f32 %v2308_v62, %v2236_v12  ;;  %v5229_v62 = vld [vmem:[%s8874_s5 + $0x160] sm:$0xff]  ;;  %v5300_v12 = vld [vmem:[%s8874_s5 + $0x370] sm:$0xff]  ;;  %v5243_v38 = vld [vmem:[%s8874_s5 + $0x1c8] sm:$0xff] }
 0x1a0   :  { %6118 = vmatpush1.bf16.msra.mxu0 %v6117_v3  ;;  %6182 = vmatpush1.bf16.msra.mxu1 %v6181_v4  ;;  %v2382_v15 = vpop.f32.mrb[26].mxu1  ;;  %v2456_v19 = vpop.f32.mrb[28].mxu0  ;;  %v5231_v3 = vld [vmem:[%s8874_s5 + $0x170] sm:$0xff]  ;;  %v2754_v4 = vmul.f32 %v2752_v60, %v2092_v48  ;;  %v6197_v10 = vpack.c.bf16 %v5300_v12, %v5298_v18  ;;  %v5249_v55 = vld [vmem:[%s8874_s5 + $0x1f8] sm:$0xff]  ;;  %v5316_v56 = vld [vmem:[%s8874_s5 + $0x3e8] sm:$0xff] }
 0x1a1   :  { %v2386_v26 = vadd.f32 %v2382_v15, %v2312_v14  ;;  %v5962_v28 = vpop.f32.mrb[27].mxu1  ;;  %v5969_v29 = vpop.f32.mrb[29].mxu0  ;;  %6120 = vmatprep.subr.bf16.mxu0 %v6119_v5  ;;  %6184 = vmatprep.subr.bf16.mxu1 %v6183_v54  ;;  %v5304_v54 = vld [vmem:[%s8874_s5 + $0x388] sm:$0xff]  ;;  %v6133_v9 = vpack.c.bf16 %v5231_v3, %v5229_v62  ;;  %v6135_v15 = vpack.c.bf16 %v5237_v36, %v5235_v27  ;;  %v5244_v46 = vld [vmem:[%s8874_s5 + $0x1d0] sm:$0xff]  ;;  %v5318_v57 = vld [vmem:[%s8874_s5 + $0x3f8] sm:$0xff] }
 0x1a2   :  { %v2766_v14 = vadd.f32 %v2764_v8, %v2754_v4  ;;  %v6137_v28 = vpack.c.bf16 %v5236_v13, %v5234_v11  ;;  %v6145_v58 = vpack.c.bf16 %v5244_v46, %v5242_v44  ;;  %v5246_v60 = vld [vmem:[%s8874_s5 + $0x1e0] sm:$0xff]  ;;  %v5317_v3 = vld [vmem:[%s8874_s5 + $0x3f0] sm:$0xff]  ;;  %v5339_v4 = vld [vmem:[%s8874_s5 + $0x488] sm:$0xff] }
 0x1a3   :  { %v2460_v39 = vadd.f32 %v2456_v19, %v2386_v26  ;;  %5216 = vmatmul.mubr.msk.f32.vlgmr.msra.gmra.mrb[32].mxu0 %vm2826_vm2, %v7486_v25  ;;  %5285 = vmatmul.mubr.msk.f32.vlgmr.msra.gmra.mrb[32].mxu1 %vm2826_vm2, %v7486_v25  ;;  %v6199_v19 = vpack.c.bf16 %v5306_v1, %v5304_v54  ;;  %v5310_v26 = vld [vmem:[%s8874_s5 + $0x3b8] sm:$0xff]  ;;  %v5315_v62 = vld [vmem:[%s8874_s5 + $0x3e0] sm:$0xff]  ;;  %v5340_v54 = vld [vmem:[%s8874_s5 + $0x490] sm:$0xff] }
 0x1a4   :  { %6122 = vmatpush1.bf16.msra.mxu0 %v6121_v20  ;;  %6186 = vmatpush1.bf16.msra.mxu1 %v6185_v21  ;;  %v2530_v17 = vpop.f32.mrb[28].mxu1  ;;  %v2604_v40 = vpop.f32.mrb[30].mxu0  ;;  %v5303_v20 = vld [vmem:[%s8874_s5 + $0x380] sm:$0xff]  ;;  %v5305_v21 = vld [vmem:[%s8874_s5 + $0x390] sm:$0xff]  ;;  %v7588_v32 = vmax.f32 %v2766_v14, 0.0  ;;  %v6203_v34 = vpack.c.bf16 %v5310_v26, %v5308_v24  ;;  %v6213_v27 = vpack.c.bf16 %v5317_v3, %v5315_v62  ;;  %v5343_v13 = vld [vmem:[%s8874_s5 + $0x4a8] sm:$0xff] }
 0x1a5   :  { %v2534_v49 = vadd.f32 %v2530_v17, %v2460_v39  ;;  %v5976_v50 = vpop.f32.mrb[29].mxu1  ;;  %v5983_v51 = vpop.f32.mrb[31].mxu0  ;;  %6124 = vmatprep.subr.bf16.mxu0 %v6123_v30  ;;  %6188 = vmatprep.subr.bf16.mxu1 %v6187_v31  ;;  %v6201_v29 = vpack.c.bf16 %v5305_v21, %v5303_v20  ;;  %v5238_v30 = vld [vmem:[%s8874_s5 + $0x1a0] sm:$0xff]  ;;  %v5240_v31 = vld [vmem:[%s8874_s5 + $0x1b0] sm:$0xff]  ;;  %v5245_v39 = vld [vmem:[%s8874_s5 + $0x1d8] sm:$0xff] }
 0x1a6   :  { %3059 = vmatprep.mubr.f32.mxu0 %v6638_v16  ;;  %3430 = vmatprep.mubr.f32.mxu1 %v6638_v16  ;;  %v5312_v17 = vld [vmem:[%s8874_s5 + $0x3c8] sm:$0xff]  ;;  %v6143_v48 = vpack.c.bf16 %v5245_v39, %v5243_v38  ;;  %v5311_v50 = vld [vmem:[%s8874_s5 + $0x3c0] sm:$0xff]  ;;  %v5313_v51 = vld [vmem:[%s8874_s5 + $0x3d0] sm:$0xff] }
 0x1a7   :  { %v2608_v59 = vadd.f32 %v2604_v40, %v2534_v49  ;;  %v5314_v40 = vld [vmem:[%s8874_s5 + $0x3d8] sm:$0xff]  ;;  %v5338_v36 = vld [vmem:[%s8874_s5 + $0x480] sm:$0xff]  ;;  %v5410_v11 = vld [vmem:[%s8874_s5 + $0x690] sm:$0xff] }
 0x1a8   :  { %6126 = vmatpush1.bf16.msra.mxu0 %v6125_v41  ;;  %6190 = vmatpush1.bf16.msra.mxu1 %v6189_v42  ;;  %v2678_v61 = vpop.f32.mrb[30].mxu1  ;;  %v2692_v41 = vpop.permute.xlu1 %2691  ;;  %v6141_v42 = vpack.c.bf16 %v5240_v31, %v5238_v30  ;;  %v6207_v49 = vpack.c.bf16 %v5314_v40, %v5312_v17  ;;  %v5345_v14 = vld [vmem:[%s8874_s5 + $0x4b8] sm:$0xff]  ;;  %v6217_v20 = vpack.c.bf16 %v5340_v54, %v5338_v36  ;;  %v5344_v23 = vld [vmem:[%s8874_s5 + $0x4b0] sm:$0xff]  ;;  %v5347_v31 = vld [vmem:[%s8874_s5 + $0x4c8] sm:$0xff] }
 0x1a9   :  { %v2682_v5 = vadd.f32 %v2678_v61, %v2608_v59  ;;  %v5990_v6 = vpop.f32.mrb[31].mxu1  ;;  %6128 = vmatprep.subr.bf16.mxu0 %v6127_v43  ;;  %6192 = vmatprep.subr.bf16.mxu1 %v6191_v52  ;;  %v6205_v43 = vpack.c.bf16 %v5309_v37, %v5307_v35  ;;  %v5247_v52 = vld [vmem:[%s8874_s5 + $0x1e8] sm:$0xff]  ;;  %v6209_v59 = vpack.c.bf16 %v5313_v51, %v5311_v50  ;;  %v5248_v61 = vld [vmem:[%s8874_s5 + $0x1f0] sm:$0xff]  ;;  %v5419_v35 = vld [vmem:[%s8874_s5 + $0x6d8] sm:$0xff] }
 0x1aa   :  { %v5409_v6 = vld [vmem:[%s8874_s5 + $0x688] sm:$0xff]  ;;  %v6149_v12 = vpack.c.bf16 %v5248_v61, %v5246_v60  ;;  %v6219_v26 = vpack.c.bf16 %v5345_v14, %v5343_v13  ;;  %v5414_v30 = vld [vmem:[%s8874_s5 + $0x6b0] sm:$0xff]  ;;  %v6221_v37 = vpack.c.bf16 %v5344_v23, %v5342_v22  ;;  %v5346_v39 = vld [vmem:[%s8874_s5 + $0x4c0] sm:$0xff] }
 0x1ab   :  { %v2694_v47 = vadd.f32 %v2692_v41, %v2682_v5  ;;  %v5341_v5 = vld [vmem:[%s8874_s5 + $0x498] sm:$0xff]  ;;  %v5348_v17 = vld [vmem:[%s8874_s5 + $0x4d0] sm:$0xff]  ;;  %v5351_v44 = vld [vmem:[%s8874_s5 + $0x4e8] sm:$0xff] }
 0x1ac   :  { %6130 = vmatpush1.bf16.msra.mxu0 %v6129_v63  ;;  %6194 = vmatpush1.bf16.msra.mxu1 %v6193_v0  ;;  %v6147_v0 = vpack.c.bf16 %v5249_v55, %v5247_v52  ;;  %v2789_v18 = vpop.permute.xlu1 %2788  ;;  %v6215_v8 = vpack.c.bf16 %v5341_v5, %v5339_v4  ;;  %v5353_v46 = vld [vmem:[%s8874_s5 + $0x4f8] sm:$0xff]  ;;  %v5350_v51 = vld [vmem:[%s8874_s5 + $0x4e0] sm:$0xff]  ;;  %v5352_v52 = vld [vmem:[%s8874_s5 + $0x4f0] sm:$0xff] }
 0x1ad   :  { %6132 = vmatprep.subr.bf16.mxu0 %v6131_v2  ;;  %6196 = vmatprep.subr.bf16.mxu1 %v6195_v7  ;;  %v2779_v63 = vmul.f32 %v2777_v53, %v2694_v47  ;;  %v6211_v2 = vpack.c.bf16 %v5318_v57, %v5316_v56  ;;  %v5411_v7 = vld [vmem:[%s8874_s5 + $0x698] sm:$0xff]  ;;  %v5421_v47 = vld [vmem:[%s8874_s5 + $0x6e8] sm:$0xff]  ;;  %v6227_v55 = vpack.c.bf16 %v5353_v46, %v5351_v44  ;;  %v5420_v57 = vld [vmem:[%s8874_s5 + $0x6e0] sm:$0xff] }
 0x1ae   :  { %v5422_v53 = vld [vmem:[%s8874_s5 + $0x6f0] sm:$0xff]  ;;  %v5393_v60 = vld [vmem:[%s8874_s5 + $0x608] sm:$0xff]  ;;  %v5395_v61 = vld [vmem:[%s8874_s5 + $0x618] sm:$0xff] }
 0x1af   :  { %v2791_v1 = vadd.f32 %v2789_v18, %v2779_v63  ;;  %v6229_v63 = vpack.c.bf16 %v5352_v52, %v5350_v51  ;;  %v5324_v62 = vld [vmem:[%s8874_s5 + $0x410] sm:$0xff]  ;;  %v6295_v4 = vpack.c.bf16 %v5395_v61, %v5393_v60  ;;  %v5392_v5 = vld [vmem:[%s8874_s5 + $0x600] sm:$0xff]  ;;  %v5329_v18 = vld [vmem:[%s8874_s5 + $0x438] sm:$0xff] }
 0x1b0   :  { %6134 = vmatpush1.bf16.msra.mxu0 %v6133_v9  ;;  %6198 = vmatpush1.bf16.msra.mxu1 %v6197_v10  ;;  %v6279_v9 = vpack.c.bf16 %v5411_v7, %v5409_v6  ;;  %v5408_v10 = vld [vmem:[%s8874_s5 + $0x680] sm:$0xff]  ;;  %v5394_v6 = vld [vmem:[%s8874_s5 + $0x610] sm:$0xff]  ;;  %v5327_v7 = vld [vmem:[%s8874_s5 + $0x428] sm:$0xff] }
 0x1b1   :  { %6136 = vmatprep.subr.bf16.mxu0 %v6135_v15  ;;  %6200 = vmatprep.subr.bf16.mxu1 %v6199_v19  ;;  %v5413_v15 = vld [vmem:[%s8874_s5 + $0x6a8] sm:$0xff]  ;;  %v5415_v19 = vld [vmem:[%s8874_s5 + $0x6b8] sm:$0xff]  ;;  %v6281_v21 = vpack.c.bf16 %v5410_v11, %v5408_v10  ;;  %v7692_v24 = vmax.f32 %v2791_v1, 0.0  ;;  %v6297_v54 = vpack.c.bf16 %v5394_v6, %v5392_v5  ;;  %v5326_v1 = vld [vmem:[%s8874_s5 + $0x420] sm:$0xff] }
 0x1b2   :  { %v5396_v11 = vld [vmem:[%s8874_s5 + $0x620] sm:$0xff]  ;;  %v5398_v13 = vld [vmem:[%s8874_s5 + $0x630] sm:$0xff]  ;;  %v5331_v14 = vld [vmem:[%s8874_s5 + $0x448] sm:$0xff] }
 0x1b3   :  { %5233 = vmatmul.mubr.msk.f32.vlgmr.msra.gmra.mrb[32].mxu0 %vm2826_vm2, %v7588_v32  ;;  %5302 = vmatmul.mubr.msk.f32.vlgmr.msra.gmra.mrb[32].mxu1 %vm2826_vm2, %v7588_v32  ;;  %v6301_v22 = vpack.c.bf16 %v5398_v13, %v5396_v11  ;;  %v5330_v23 = vld [vmem:[%s8874_s5 + $0x440] sm:$0xff]  ;;  %v5357_v44 = vld [vmem:[%s8874_s5 + $0x508] sm:$0xff]  ;;  %v5359_v46 = vld [vmem:[%s8874_s5 + $0x518] sm:$0xff] }
 0x1b4   :  { %6138 = vmatpush1.bf16.msra.mxu0 %v6137_v28  ;;  %6202 = vmatpush1.bf16.msra.mxu1 %v6201_v29  ;;  %v6283_v28 = vpack.c.bf16 %v5415_v19, %v5413_v15  ;;  %v5412_v29 = vld [vmem:[%s8874_s5 + $0x6a0] sm:$0xff]  ;;  %v5333_v15 = vld [vmem:[%s8874_s5 + $0x458] sm:$0xff]  ;;  %v5401_v19 = vld [vmem:[%s8874_s5 + $0x648] sm:$0xff] }
 0x1b5   :  { %6140 = vmatprep.subr.bf16.mxu0 %v6139_v33  ;;  %6204 = vmatprep.subr.bf16.mxu1 %v6203_v34  ;;  %v5349_v33 = vld [vmem:[%s8874_s5 + $0x4d8] sm:$0xff]  ;;  %v5417_v34 = vld [vmem:[%s8874_s5 + $0x6c8] sm:$0xff]  ;;  %v6285_v38 = vpack.c.bf16 %v5414_v30, %v5412_v29  ;;  %v5402_v30 = vld [vmem:[%s8874_s5 + $0x650] sm:$0xff] }
 0x1b6   :  { %3152 = vmatprep.mubr.f32.mxu0 %v6638_v16  ;;  %3520 = vmatprep.mubr.f32.mxu1 %v6638_v16  ;;  %v6223_v40 = vpack.c.bf16 %v5349_v33, %v5347_v31  ;;  %v6287_v41 = vpack.c.bf16 %v5419_v35, %v5417_v34  ;;  %v5335_v31 = vld [vmem:[%s8874_s5 + $0x468] sm:$0xff]  ;;  %v5337_v33 = vld [vmem:[%s8874_s5 + $0x478] sm:$0xff]  ;;  %v5356_v51 = vld [vmem:[%s8874_s5 + $0x500] sm:$0xff] }
 0x1b7   :  { %v5405_v34 = vld [vmem:[%s8874_s5 + $0x668] sm:$0xff]  ;;  %v5407_v35 = vld [vmem:[%s8874_s5 + $0x678] sm:$0xff]  ;;  %v5358_v52 = vld [vmem:[%s8874_s5 + $0x510] sm:$0xff] }
 0x1b8   :  { %6142 = vmatpush1.bf16.msra.mxu0 %v6141_v42  ;;  %6206 = vmatpush1.bf16.msra.mxu1 %v6205_v43  ;;  %v5416_v42 = vld [vmem:[%s8874_s5 + $0x6c0] sm:$0xff]  ;;  %v5418_v43 = vld [vmem:[%s8874_s5 + $0x6d0] sm:$0xff]  ;;  %v5431_v60 = vld [vmem:[%s8874_s5 + $0x728] sm:$0xff] }
 0x1b9   :  { %6144 = vmatprep.subr.bf16.mxu0 %v6143_v48  ;;  %6208 = vmatprep.subr.bf16.mxu1 %v6207_v49  ;;  %v5423_v48 = vld [vmem:[%s8874_s5 + $0x6f8] sm:$0xff]  ;;  %v6225_v49 = vpack.c.bf16 %v5348_v17, %v5346_v39  ;;  %v6289_v50 = vpack.c.bf16 %v5418_v43, %v5416_v42  ;;  %v5334_v39 = vld [vmem:[%s8874_s5 + $0x460] sm:$0xff]  ;;  %v5336_v17 = vld [vmem:[%s8874_s5 + $0x470] sm:$0xff] }
 0x1ba   :  { %v6291_v56 = vpack.c.bf16 %v5423_v48, %v5421_v47  ;;  %v5404_v42 = vld [vmem:[%s8874_s5 + $0x660] sm:$0xff]  ;;  %v5406_v43 = vld [vmem:[%s8874_s5 + $0x670] sm:$0xff]  ;;  %v5427_v47 = vld [vmem:[%s8874_s5 + $0x708] sm:$0xff] }
 0x1bb   :  { %v5429_v48 = vld [vmem:[%s8874_s5 + $0x718] sm:$0xff]  ;;  %v5430_v5 = vld [vmem:[%s8874_s5 + $0x720] sm:$0xff]  ;;  %v5432_v6 = vld [vmem:[%s8874_s5 + $0x730] sm:$0xff] }
 0x1bc   :  { %6146 = vmatpush1.bf16.msra.mxu0 %v6145_v58  ;;  %6210 = vmatpush1.bf16.msra.mxu1 %v6209_v59  ;;  %v5323_v58 = vld [vmem:[%s8874_s5 + $0x408] sm:$0xff]  ;;  %v5325_v59 = vld [vmem:[%s8874_s5 + $0x418] sm:$0xff]  ;;  %v5436_v11 = vld [vmem:[%s8874_s5 + $0x750] sm:$0xff] }
 0x1bd   :  { %6148 = vmatprep.subr.bf16.mxu0 %v6147_v0  ;;  %6212 = vmatprep.subr.bf16.mxu1 %v6211_v2  ;;  %v6293_v0 = vpack.c.bf16 %v5422_v53, %v5420_v57  ;;  %v5322_v2 = vld [vmem:[%s8874_s5 + $0x400] sm:$0xff]  ;;  %v6231_v3 = vpack.c.bf16 %v5325_v59, %v5323_v58  ;;  %v5428_v53 = vld [vmem:[%s8874_s5 + $0x710] sm:$0xff]  ;;  %v5361_v58 = vld [vmem:[%s8874_s5 + $0x528] sm:$0xff] }
 0x1be   :  { %v6233_v36 = vpack.c.bf16 %v5324_v62, %v5322_v2  ;;  %v5426_v57 = vld [vmem:[%s8874_s5 + $0x700] sm:$0xff]  ;;  %v5363_v59 = vld [vmem:[%s8874_s5 + $0x538] sm:$0xff]  ;;  %v5362_v62 = vld [vmem:[%s8874_s5 + $0x530] sm:$0xff] }
 0x1bf   :  { %v5433_v61 = vld [vmem:[%s8874_s5 + $0x738] sm:$0xff]  ;;  %v5360_v2 = vld [vmem:[%s8874_s5 + $0x520] sm:$0xff]  ;;  %v5369_v13 = vld [vmem:[%s8874_s5 + $0x568] sm:$0xff] }
 0x1c0   :  { %6150 = vmatpush1.bf16.msra.mxu0 %v6149_v12  ;;  %6214 = vmatpush1.bf16.msra.mxu1 %v6213_v27  ;;  %v5397_v12 = vld [vmem:[%s8874_s5 + $0x628] sm:$0xff]  ;;  %v5399_v27 = vld [vmem:[%s8874_s5 + $0x638] sm:$0xff] }
 0x1c1   :  { %6216 = vmatprep.subr.bf16.mxu0 %v6215_v8  ;;  %6280 = vmatprep.subr.bf16.mxu1 %v6279_v9  ;;  %v5328_v8 = vld [vmem:[%s8874_s5 + $0x430] sm:$0xff]  ;;  %v6235_v9 = vpack.c.bf16 %v5329_v18, %v5327_v7  ;;  %v6299_v10 = vpack.c.bf16 %v5399_v27, %v5397_v12  ;;  %v5365_v7 = vld [vmem:[%s8874_s5 + $0x548] sm:$0xff]  ;;  %v5367_v18 = vld [vmem:[%s8874_s5 + $0x558] sm:$0xff] }
 0x1c2   :  { %v5435_v12 = vld [vmem:[%s8874_s5 + $0x748] sm:$0xff]  ;;  %v5437_v27 = vld [vmem:[%s8874_s5 + $0x758] sm:$0xff] }
 0x1c3   :  { %5250 = vmatmul.mubr.msk.f32.vlgmr.msra.gmra.mrb[32].mxu0 %vm2826_vm2, %v7692_v24  ;;  %5319 = vmatmul.mubr.msk.f32.vlgmr.msra.gmra.mrb[32].mxu1 %vm2826_vm2, %v7692_v24 }
 0x1c4   :  { %6218 = vmatpush1.bf16.msra.mxu0 %v6217_v20  ;;  %6282 = vmatpush1.bf16.msra.mxu1 %v6281_v21  ;;  %v5403_v20 = vld [vmem:[%s8874_s5 + $0x658] sm:$0xff]  ;;  %v6237_v21 = vpack.c.bf16 %v5328_v8, %v5326_v1  ;;  %v5364_v1 = vld [vmem:[%s8874_s5 + $0x540] sm:$0xff]  ;;  %v5366_v8 = vld [vmem:[%s8874_s5 + $0x550] sm:$0xff] }
 0x1c5   :  { %6220 = vmatprep.subr.bf16.mxu0 %v6219_v26  ;;  %6284 = vmatprep.subr.bf16.mxu1 %v6283_v28  ;;  %v5332_v26 = vld [vmem:[%s8874_s5 + $0x450] sm:$0xff]  ;;  %v6239_v28 = vpack.c.bf16 %v5333_v15, %v5331_v14  ;;  %v6303_v29 = vpack.c.bf16 %v5403_v20, %v5401_v19  ;;  %v5371_v14 = vld [vmem:[%s8874_s5 + $0x578] sm:$0xff]  ;;  %v5439_v15 = vld [vmem:[%s8874_s5 + $0x768] sm:$0xff]  ;;  %v6257_v20 = vpack.c.bf16 %v5366_v8, %v5364_v1 }
 0x1c6   :  { %3640 = vmatprep.mubr.f32.mxu0 %v6638_v16  ;;  %4009 = vmatprep.mubr.f32.mxu1 %v6638_v16  ;;  %v5441_v19 = vld [vmem:[%s8874_s5 + $0x778] sm:$0xff]  ;;  %v5387_v8 = vld [vmem:[%s8874_s5 + $0x5f0] sm:$0xff] }
 0x1c8   :  { %6222 = vmatpush1.bf16.msra.mxu0 %v6221_v37  ;;  %6286 = vmatpush1.bf16.msra.mxu1 %v6285_v38  ;;  %v6241_v37 = vpack.c.bf16 %v5332_v26, %v5330_v23  ;;  %v5370_v23 = vld [vmem:[%s8874_s5 + $0x570] sm:$0xff]  ;;  %v6259_v26 = vpack.c.bf16 %v5371_v14, %v5369_v13 }
 0x1c9   :  { %6224 = vmatprep.subr.bf16.mxu0 %v6223_v40  ;;  %6288 = vmatprep.subr.bf16.mxu1 %v6287_v41  ;;  %v6243_v40 = vpack.c.bf16 %v5337_v33, %v5335_v31  ;;  %v6307_v41 = vpack.c.bf16 %v5407_v35, %v5405_v34  ;;  %v5376_v31 = vld [vmem:[%s8874_s5 + $0x598] sm:$0xff]  ;;  %v5444_v33 = vld [vmem:[%s8874_s5 + $0x788] sm:$0xff] }
 0x1ca   :  { %v5446_v34 = vld [vmem:[%s8874_s5 + $0x798] sm:$0xff] }
 0x1cc   :  { %6226 = vmatpush1.bf16.msra.mxu0 %v6225_v49  ;;  %6290 = vmatpush1.bf16.msra.mxu1 %v6289_v50  ;;  %v6245_v49 = vpack.c.bf16 %v5336_v17, %v5334_v39  ;;  %v6309_v50 = vpack.c.bf16 %v5406_v43, %v5404_v42  ;;  %v5375_v39 = vld [vmem:[%s8874_s5 + $0x590] sm:$0xff]  ;;  %v5378_v43 = vld [vmem:[%s8874_s5 + $0x5a8] sm:$0xff] }
 0x1cd   :  { %6228 = vmatprep.subr.bf16.mxu0 %v6227_v55  ;;  %6292 = vmatprep.subr.bf16.mxu1 %v6291_v56  ;;  %v6247_v55 = vpack.c.bf16 %v5359_v46, %v5357_v44  ;;  %v6311_v56 = vpack.c.bf16 %v5429_v48, %v5427_v47  ;;  %v5445_v42 = vld [vmem:[%s8874_s5 + $0x790] sm:$0xff]  ;;  %v5380_v44 = vld [vmem:[%s8874_s5 + $0x5b8] sm:$0xff]  ;;  %v5448_v46 = vld [vmem:[%s8874_s5 + $0x7a8] sm:$0xff] }
 0x1ce   :  { %v5450_v47 = vld [vmem:[%s8874_s5 + $0x7b8] sm:$0xff] }
 0x1d0   :  { %6230 = vmatpush1.bf16.msra.mxu0 %v6229_v63  ;;  %6294 = vmatpush1.bf16.msra.mxu1 %v6293_v0  ;;  %v6249_v63 = vpack.c.bf16 %v5358_v52, %v5356_v51  ;;  %v6313_v0 = vpack.c.bf16 %v5428_v53, %v5426_v57  ;;  %v5379_v51 = vld [vmem:[%s8874_s5 + $0x5b0] sm:$0xff]  ;;  %v6267_v52 = vpack.c.bf16 %v5380_v44, %v5378_v43  ;;  %v5382_v53 = vld [vmem:[%s8874_s5 + $0x5c8] sm:$0xff] }
 0x1d1   :  { %6232 = vmatprep.subr.bf16.mxu0 %v6231_v3  ;;  %6296 = vmatprep.subr.bf16.mxu1 %v6295_v4  ;;  %v6251_v3 = vpack.c.bf16 %v5363_v59, %v5361_v58  ;;  %v6315_v4 = vpack.c.bf16 %v5433_v61, %v5431_v60  ;;  %v5449_v57 = vld [vmem:[%s8874_s5 + $0x7b0] sm:$0xff]  ;;  %v5384_v58 = vld [vmem:[%s8874_s5 + $0x5d8] sm:$0xff]  ;;  %v5452_v59 = vld [vmem:[%s8874_s5 + $0x7c8] sm:$0xff] }
 0x1d2   :  { %v5454_v60 = vld [vmem:[%s8874_s5 + $0x7d8] sm:$0xff] }
 0x1d3   :  { %5354 = vmatmul.mubr.msk.f32.vlgmr.msra.gmra.mrb[34].mxu0 %vm2826_vm2, %v7379_v45  ;;  %5424 = vmatmul.mubr.msk.f32.vlgmr.msra.gmra.mrb[34].mxu1 %vm2826_vm2, %v7379_v45  ;;  %v5400_v45 = vld [vmem:[%s8874_s5 + $0x640] sm:$0xff] }
 0x1d4   :  { %6234 = vmatpush1.bf16.msra.mxu0 %v6233_v36  ;;  %6298 = vmatpush1.bf16.msra.mxu1 %v6297_v54  ;;  %v6305_v38 = vpack.c.bf16 %v5402_v30, %v5400_v45  ;;  %v6253_v36 = vpack.c.bf16 %v5362_v62, %v5360_v2  ;;  %v6317_v54 = vpack.c.bf16 %v5432_v6, %v5430_v5  ;;  %v5440_v45 = vld [vmem:[%s8874_s5 + $0x770] sm:$0xff]  ;;  %v5374_v30 = vld [vmem:[%s8874_s5 + $0x588] sm:$0xff]  ;;  %v5388_v6 = vld [vmem:[%s8874_s5 + $0x5f8] sm:$0xff] }
 0x1d5   :  { %6236 = vmatprep.subr.bf16.mxu0 %v6235_v9  ;;  %6300 = vmatprep.subr.bf16.mxu1 %v6299_v10  ;;  %v6255_v9 = vpack.c.bf16 %v5367_v18, %v5365_v7  ;;  %v6319_v10 = vpack.c.bf16 %v5437_v27, %v5435_v12  ;;  %v6263_v17 = vpack.c.bf16 %v5376_v31, %v5374_v30  ;;  %v5383_v2 = vld [vmem:[%s8874_s5 + $0x5d0] sm:$0xff]  ;;  %v5386_v5 = vld [vmem:[%s8874_s5 + $0x5e8] sm:$0xff]  ;;  %v5458_v18 = vld [vmem:[%s8874_s5 + $0x7f8] sm:$0xff] }
 0x1d6   :  { %3711 = vmatprep.mubr.f32.mxu0 %v6638_v16  ;;  %4080 = vmatprep.mubr.f32.mxu1 %v6638_v16  ;;  %v6271_v62 = vpack.c.bf16 %v5384_v58, %v5382_v53  ;;  %v5456_v7 = vld [vmem:[%s8874_s5 + $0x7e8] sm:$0xff]  ;;  %v5487_v30 = vld [vmem:[%s8875_s9 + $0x258] sm:$0xff] }
 0x1d7   :  { %v6339_v1 = vpack.c.bf16 %v5458_v18, %v5456_v7  ;;  %v5508_v7 = vld [vmem:[%s8875_s9 + $0x300] sm:$0xff]  ;;  %v5510_v18 = vld [vmem:[%s8875_s9 + $0x310] sm:$0xff] }
 0x1d8   :  { %6238 = vmatpush1.bf16.msra.mxu0 %v6237_v21  ;;  %6302 = vmatpush1.bf16.msra.mxu1 %v6301_v22  ;;  %v5368_v22 = vld [vmem:[%s8874_s5 + $0x560] sm:$0xff] }
 0x1d9   :  { %6240 = vmatprep.subr.bf16.mxu0 %v6239_v28  ;;  %6304 = vmatprep.subr.bf16.mxu1 %v6303_v29  ;;  %v6323_v28 = vpack.c.bf16 %v5441_v19, %v5439_v15  ;;  %v5438_v29 = vld [vmem:[%s8874_s5 + $0x760] sm:$0xff]  ;;  %v6261_v35 = vpack.c.bf16 %v5370_v23, %v5368_v22  ;;  %v5483_v22 = vld [vmem:[%s8875_s9 + $0x238] sm:$0xff] }
 0x1da   :  { %v5476_v19 = vld [vmem:[%s8875_s9 + $0x200] sm:$0xff] }
 0x1dc   :  { %6242 = vmatpush1.bf16.msra.mxu0 %v6241_v37  ;;  %6306 = vmatpush1.bf16.msra.mxu1 %v6305_v38  ;;  %v6325_v37 = vpack.c.bf16 %v5440_v45, %v5438_v29  ;;  %v5373_v38 = vld [vmem:[%s8874_s5 + $0x580] sm:$0xff]  ;;  %v5482_v29 = vld [vmem:[%s8875_s9 + $0x230] sm:$0xff]  ;;  %v5485_v45 = vld [vmem:[%s8875_s9 + $0x248] sm:$0xff] }
 0x1dd   :  { %6244 = vmatprep.subr.bf16.mxu0 %v6243_v40  ;;  %6308 = vmatprep.subr.bf16.mxu1 %v6307_v41  ;;  %v6327_v40 = vpack.c.bf16 %v5446_v34, %v5444_v33  ;;  %v5443_v41 = vld [vmem:[%s8874_s5 + $0x780] sm:$0xff]  ;;  %v6265_v48 = vpack.c.bf16 %v5375_v39, %v5373_v38  ;;  %v6351_v33 = vpack.c.bf16 %v5487_v30, %v5485_v45  ;;  %v5518_v30 = vld [vmem:[%s8875_s9 + $0x350] sm:$0xff] }
 0x1de   :  { %v5484_v34 = vld [vmem:[%s8875_s9 + $0x240] sm:$0xff] }
 0x1df   :  { %v5516_v45 = vld [vmem:[%s8875_s9 + $0x340] sm:$0xff] }
 0x1e0   :  { %6246 = vmatpush1.bf16.msra.mxu0 %v6245_v49  ;;  %6310 = vmatpush1.bf16.msra.mxu1 %v6309_v50  ;;  %v6329_v49 = vpack.c.bf16 %v5445_v42, %v5443_v41  ;;  %v5377_v50 = vld [vmem:[%s8874_s5 + $0x5a0] sm:$0xff]  ;;  %v5493_v41 = vld [vmem:[%s8875_s9 + $0x288] sm:$0xff]  ;;  %v5495_v42 = vld [vmem:[%s8875_s9 + $0x298] sm:$0xff] }
 0x1e1   :  { %6248 = vmatprep.subr.bf16.mxu0 %v6247_v55  ;;  %6312 = vmatprep.subr.bf16.mxu1 %v6311_v56  ;;  %v6331_v55 = vpack.c.bf16 %v5450_v47, %v5448_v46  ;;  %v5447_v56 = vld [vmem:[%s8874_s5 + $0x7a0] sm:$0xff]  ;;  %v6269_v61 = vpack.c.bf16 %v5379_v51, %v5377_v50  ;;  %v6359_v44 = vpack.c.bf16 %v5495_v42, %v5493_v41  ;;  %v5494_v47 = vld [vmem:[%s8875_s9 + $0x290] sm:$0xff] }
 0x1e2   :  { %v5492_v46 = vld [vmem:[%s8875_s9 + $0x280] sm:$0xff]  ;;  %v5522_v42 = vld [vmem:[%s8875_s9 + $0x370] sm:$0xff] }
 0x1e3   :  { %5355 = vmatmul.mubr.msk.f32.vlgmr.msra.gmra.mrb[34].mxu0 %vm2826_vm2, %v7486_v25  ;;  %5425 = vmatmul.mubr.msk.f32.vlgmr.msra.gmra.mrb[34].mxu1 %vm2826_vm2, %v7486_v25  ;;  %v5434_v25 = vld [vmem:[%s8874_s5 + $0x740] sm:$0xff]  ;;  %v6361_v50 = vpack.c.bf16 %v5494_v47, %v5492_v46  ;;  %v5527_v46 = vld [vmem:[%s8875_s9 + $0x398] sm:$0xff]  ;;  %v5553_v47 = vld [vmem:[%s8875_s9 + $0x468] sm:$0xff] }
 0x1e4   :  { %6250 = vmatpush1.bf16.msra.mxu0 %v6249_v63  ;;  %6314 = vmatpush1.bf16.msra.mxu1 %v6313_v0  ;;  %v6321_v21 = vpack.c.bf16 %v5436_v11, %v5434_v25  ;;  %v6333_v63 = vpack.c.bf16 %v5449_v57, %v5447_v56  ;;  %v5381_v0 = vld [vmem:[%s8874_s5 + $0x5c0] sm:$0xff]  ;;  %v5477_v25 = vld [vmem:[%s8875_s9 + $0x208] sm:$0xff]  ;;  %v5479_v11 = vld [vmem:[%s8875_s9 + $0x218] sm:$0xff] }
 0x1e5   :  { %6252 = vmatprep.subr.bf16.mxu0 %v6251_v3  ;;  %6316 = vmatprep.subr.bf16.mxu1 %v6315_v4  ;;  %v6335_v3 = vpack.c.bf16 %v5454_v60, %v5452_v59  ;;  %v5453_v4 = vld [vmem:[%s8874_s5 + $0x7d0] sm:$0xff]  ;;  %v6273_v12 = vpack.c.bf16 %v5383_v2, %v5381_v0  ;;  %v6343_v15 = vpack.c.bf16 %v5479_v11, %v5477_v25  ;;  %v5501_v56 = vld [vmem:[%s8875_s9 + $0x2c8] sm:$0xff]  ;;  %v5503_v57 = vld [vmem:[%s8875_s9 + $0x2d8] sm:$0xff] }
 0x1e6   :  { %3799 = vmatprep.mubr.f32.mxu0 %v6638_v16  ;;  %4168 = vmatprep.mubr.f32.mxu1 %v6638_v16  ;;  %v6367_v58 = vpack.c.bf16 %v5503_v57, %v5501_v56  ;;  %v5500_v59 = vld [vmem:[%s8875_s9 + $0x2c0] sm:$0xff]  ;;  %v5502_v60 = vld [vmem:[%s8875_s9 + $0x2d0] sm:$0xff] }
 0x1e7   :  { %v6369_v0 = vpack.c.bf16 %v5502_v60, %v5500_v59  ;;  %v5520_v41 = vld [vmem:[%s8875_s9 + $0x360] sm:$0xff]  ;;  %v5526_v57 = vld [vmem:[%s8875_s9 + $0x390] sm:$0xff]  ;;  %v5531_v59 = vld [vmem:[%s8875_s9 + $0x3b8] sm:$0xff] }
 0x1e8   :  { %6254 = vmatpush1.bf16.msra.mxu0 %v6253_v36  ;;  %6318 = vmatpush1.bf16.msra.mxu1 %v6317_v54  ;;  %v5385_v36 = vld [vmem:[%s8874_s5 + $0x5e0] sm:$0xff]  ;;  %v6275_v54 = vpack.c.bf16 %v5388_v6, %v5386_v5  ;;  %v5557_v60 = vld [vmem:[%s8875_s9 + $0x488] sm:$0xff] }
 0x1e9   :  { %6256 = vmatprep.subr.bf16.mxu0 %v6255_v9  ;;  %6320 = vmatprep.subr.bf16.mxu1 %v6319_v10  ;;  %v5455_v9 = vld [vmem:[%s8874_s5 + $0x7e0] sm:$0xff]  ;;  %v5457_v10 = vld [vmem:[%s8874_s5 + $0x7f0] sm:$0xff]  ;;  %v6277_v13 = vpack.c.bf16 %v5387_v8, %v5385_v36  ;;  %v5515_v36 = vld [vmem:[%s8875_s9 + $0x338] sm:$0xff] }
 0x1ea   :  { %v6341_v14 = vpack.c.bf16 %v5457_v10, %v5455_v9  ;;  %v5540_v8 = vld [vmem:[%s8875_s9 + $0x400] sm:$0xff]  ;;  %v5542_v9 = vld [vmem:[%s8875_s9 + $0x410] sm:$0xff]  ;;  %v6377_v10 = vpack.c.bf16 %v5510_v18, %v5508_v7  ;;  %v5535_v7 = vld [vmem:[%s8875_s9 + $0x3d8] sm:$0xff] }
 0x1eb   :  { %v6473_v25 = vpack.c.bf16 %v5542_v9, %v5540_v8  ;;  %v5524_v56 = vld [vmem:[%s8875_s9 + $0x380] sm:$0xff]  ;;  %v5561_v18 = vld [vmem:[%s8875_s9 + $0x4a8] sm:$0xff] }
 0x1ec   :  { %6258 = vmatpush1.bf16.msra.mxu0 %v6257_v20  ;;  %6322 = vmatpush1.bf16.msra.mxu1 %v6321_v21  ;;  %v5478_v20 = vld [vmem:[%s8875_s9 + $0x210] sm:$0xff]  ;;  %v5481_v21 = vld [vmem:[%s8875_s9 + $0x228] sm:$0xff]  ;;  %v5532_v9 = vld [vmem:[%s8875_s9 + $0x3c0] sm:$0xff] }
 0x1ed   :  { %6260 = vmatprep.subr.bf16.mxu0 %v6259_v26  ;;  %6324 = vmatprep.subr.bf16.mxu1 %v6323_v28  ;;  %v6345_v23 = vpack.c.bf16 %v5478_v20, %v5476_v19  ;;  %v6347_v26 = vpack.c.bf16 %v5483_v22, %v5481_v21  ;;  %v5480_v28 = vld [vmem:[%s8875_s9 + $0x220] sm:$0xff]  ;;  %v5519_v19 = vld [vmem:[%s8875_s9 + $0x358] sm:$0xff]  ;;  %v5545_v20 = vld [vmem:[%s8875_s9 + $0x428] sm:$0xff] }
 0x1ee   :  { %v6349_v31 = vpack.c.bf16 %v5482_v29, %v5480_v28  ;;  %v5547_v21 = vld [vmem:[%s8875_s9 + $0x438] sm:$0xff]  ;;  %v5546_v28 = vld [vmem:[%s8875_s9 + $0x430] sm:$0xff] }
 0x1f0   :  { %6262 = vmatpush1.bf16.msra.mxu0 %v6261_v35  ;;  %6326 = vmatpush1.bf16.msra.mxu1 %v6325_v37  ;;  %v5486_v35 = vld [vmem:[%s8875_s9 + $0x250] sm:$0xff]  ;;  %v5489_v37 = vld [vmem:[%s8875_s9 + $0x268] sm:$0xff] }
 0x1f1   :  { %6264 = vmatprep.subr.bf16.mxu0 %v6263_v17  ;;  %6328 = vmatprep.subr.bf16.mxu1 %v6327_v40  ;;  %v6353_v38 = vpack.c.bf16 %v5486_v35, %v5484_v34  ;;  %v5488_v17 = vld [vmem:[%s8875_s9 + $0x260] sm:$0xff]  ;;  %v5490_v40 = vld [vmem:[%s8875_s9 + $0x270] sm:$0xff]  ;;  %v5523_v34 = vld [vmem:[%s8875_s9 + $0x378] sm:$0xff] }
 0x1f2   :  { %v6357_v43 = vpack.c.bf16 %v5490_v40, %v5488_v17  ;;  %v5549_v35 = vld [vmem:[%s8875_s9 + $0x448] sm:$0xff]  ;;  %v5550_v17 = vld [vmem:[%s8875_s9 + $0x450] sm:$0xff] }
 0x1f3   :  { %5372 = vmatmul.mubr.msk.f32.vlgmr.msra.gmra.mrb[34].mxu0 %vm2826_vm2, %v7588_v32  ;;  %5442 = vmatmul.mubr.msk.f32.vlgmr.msra.gmra.mrb[34].mxu1 %vm2826_vm2, %v7588_v32  ;;  %v5451_v32 = vld [vmem:[%s8874_s5 + $0x7c0] sm:$0xff] }
 0x1f4   :  { %6266 = vmatpush1.bf16.msra.mxu0 %v6265_v48  ;;  %6330 = vmatpush1.bf16.msra.mxu1 %v6329_v49  ;;  %v6337_v27 = vpack.c.bf16 %v5453_v4, %v5451_v32  ;;  %v5497_v48 = vld [vmem:[%s8875_s9 + $0x2a8] sm:$0xff]  ;;  %v5499_v49 = vld [vmem:[%s8875_s9 + $0x2b8] sm:$0xff] }
 0x1f5   :  { %6268 = vmatprep.subr.bf16.mxu0 %v6267_v52  ;;  %6332 = vmatprep.subr.bf16.mxu1 %v6331_v55  ;;  %v6363_v51 = vpack.c.bf16 %v5499_v49, %v5497_v48  ;;  %v5496_v52 = vld [vmem:[%s8875_s9 + $0x2a0] sm:$0xff]  ;;  %v5498_v55 = vld [vmem:[%s8875_s9 + $0x2b0] sm:$0xff]  ;;  %v5509_v32 = vld [vmem:[%s8875_s9 + $0x308] sm:$0xff]  ;;  %v6389_v49 = vpack.c.bf16 %v5522_v42, %v5520_v41 }
 0x1f6   :  { %3889 = vmatprep.mubr.f32.mxu0 %v6638_v16  ;;  %4258 = vmatprep.mubr.f32.mxu1 %v6638_v16  ;;  %v6365_v53 = vpack.c.bf16 %v5498_v55, %v5496_v52  ;;  %v5511_v4 = vld [vmem:[%s8875_s9 + $0x318] sm:$0xff]  ;;  %v5554_v52 = vld [vmem:[%s8875_s9 + $0x470] sm:$0xff]  ;;  %v5572_v42 = vld [vmem:[%s8875_s9 + $0x500] sm:$0xff] }
 0x1f7   :  { %v6375_v6 = vpack.c.bf16 %v5511_v4, %v5509_v32  ;;  %v5555_v48 = vld [vmem:[%s8875_s9 + $0x478] sm:$0xff]  ;;  %v5528_v32 = vld [vmem:[%s8875_s9 + $0x3a0] sm:$0xff]  ;;  %v5530_v4 = vld [vmem:[%s8875_s9 + $0x3b0] sm:$0xff] }
 0x1f8   :  { %6270 = vmatpush1.bf16.msra.mxu0 %v6269_v61  ;;  %6334 = vmatpush1.bf16.msra.mxu1 %v6333_v63  ;;  %v5505_v61 = vld [vmem:[%s8875_s9 + $0x2e8] sm:$0xff]  ;;  %v5507_v63 = vld [vmem:[%s8875_s9 + $0x2f8] sm:$0xff] }
 0x1f9   :  { %6272 = vmatprep.subr.bf16.mxu0 %v6271_v62  ;;  %6336 = vmatprep.subr.bf16.mxu1 %v6335_v3  ;;  %v6371_v2 = vpack.c.bf16 %v5507_v63, %v5505_v61  ;;  %v5504_v62 = vld [vmem:[%s8875_s9 + $0x2e0] sm:$0xff]  ;;  %v5506_v3 = vld [vmem:[%s8875_s9 + $0x2f0] sm:$0xff]  ;;  %v5559_v61 = vld [vmem:[%s8875_s9 + $0x498] sm:$0xff]  ;;  %v6393_v63 = vpack.c.bf16 %v5526_v57, %v5524_v56 }
 0x1fa   :  { %v6373_v5 = vpack.c.bf16 %v5506_v3, %v5504_v62  ;;  %v5558_v62 = vld [vmem:[%s8875_s9 + $0x490] sm:$0xff]  ;;  %v5580_v57 = vld [vmem:[%s8875_s9 + $0x540] sm:$0xff] }
 0x1fc   :  { %6274 = vmatpush1.bf16.msra.mxu0 %v6273_v12  ;;  %6338 = vmatpush1.bf16.msra.mxu1 %v6337_v27  ;;  %v5541_v12 = vld [vmem:[%s8875_s9 + $0x408] sm:$0xff] }
 0x1fd   :  { %6276 = vmatprep.subr.bf16.mxu0 %v6275_v54  ;;  %6340 = vmatprep.subr.bf16.mxu1 %v6339_v1  ;;  %v5513_v27 = vld [vmem:[%s8875_s9 + $0x328] sm:$0xff]  ;;  %v5543_v54 = vld [vmem:[%s8875_s9 + $0x418] sm:$0xff] }
 0x1fe   :  { %v6471_v1 = vpack.c.bf16 %v5543_v54, %v5541_v12  ;;  %v6379_v11 = vpack.c.bf16 %v5515_v36, %v5513_v27  ;;  %v5563_v12 = vld [vmem:[%s8875_s9 + $0x4b8] sm:$0xff]  ;;  %v6397_v27 = vpack.c.bf16 %v5530_v4, %v5528_v32  ;;  %v5560_v54 = vld [vmem:[%s8875_s9 + $0x4a0] sm:$0xff] }
 0x1ff   :  { %v6491_v36 = vpack.c.bf16 %v5563_v12, %v5561_v18  ;;  %v5588_v4 = vld [vmem:[%s8875_s9 + $0x580] sm:$0xff]  ;;  %v5595_v18 = vld [vmem:[%s8875_s9 + $0x5b8] sm:$0xff] }
 0x200   :  { %6278 = vmatpush1.bf16.msra.mxu0 %v6277_v13  ;;  %6342 = vmatpush1.bf16.msra.mxu1 %v6341_v14  ;;  %v5512_v13 = vld [vmem:[%s8875_s9 + $0x320] sm:$0xff]  ;;  %v5514_v14 = vld [vmem:[%s8875_s9 + $0x330] sm:$0xff] }
 0x201   :  { %6344 = vmatprep.subr.bf16.mxu1 %v6343_v15  ;;  %6472 = vmatprep.subr.bf16.mxu0 %v6471_v1  ;;  %v5517_v15 = vld [vmem:[%s8875_s9 + $0x348] sm:$0xff]  ;;  %v6381_v22 = vpack.c.bf16 %v5514_v14, %v5512_v13  ;;  %v5562_v1 = vld [vmem:[%s8875_s9 + $0x4b0] sm:$0xff]  ;;  %v5539_v13 = vld [vmem:[%s8875_s9 + $0x3f8] sm:$0xff] }
 0x202   :  { %v6383_v29 = vpack.c.bf16 %v5519_v19, %v5517_v15  ;;  %v5565_v14 = vld [vmem:[%s8875_s9 + $0x4c8] sm:$0xff]  ;;  %v5567_v15 = vld [vmem:[%s8875_s9 + $0x4d8] sm:$0xff] }
 0x203   :  { %5389 = vmatmul.mubr.msk.f32.vlgmr.msra.gmra.mrb[34].mxu0 %vm2826_vm2, %v7692_v24  ;;  %5459 = vmatmul.mubr.msk.f32.vlgmr.msra.gmra.mrb[34].mxu1 %vm2826_vm2, %v7692_v24  ;;  %v5491_v24 = vld [vmem:[%s8875_s9 + $0x278] sm:$0xff] }
 0x204   :  { %6346 = vmatpush1.bf16.msra.mxu1 %v6345_v23  ;;  %v6355_v39 = vpack.c.bf16 %v5491_v24, %v5489_v37  ;;  %6474 = vmatpush1.bf16.msra.mxu0 %v6473_v25  ;;  %v6475_v23 = vpack.c.bf16 %v5547_v21, %v5545_v20  ;;  %v5551_v37 = vld [vmem:[%s8875_s9 + $0x458] sm:$0xff]  ;;  %v6385_v24 = vpack.c.bf16 %v5518_v30, %v5516_v45  ;;  %v5564_v21 = vld [vmem:[%s8875_s9 + $0x4c0] sm:$0xff]  ;;  %v4391_v45 = vld [vmem:[%s8875_s9 + $0x8] sm:$0xff] }
 0x205   :  { %6348 = vmatprep.subr.bf16.mxu1 %v6347_v26  ;;  %v5544_v26 = vld [vmem:[%s8875_s9 + $0x420] sm:$0xff]  ;;  %v6493_v25 = vpack.c.bf16 %v5562_v1, %v5560_v54  ;;  %v6495_v20 = vpack.c.bf16 %v5567_v15, %v5565_v14  ;;  %v4393_v30 = vld [vmem:[%s8875_s9 + $0x18] sm:$0xff]  ;;  %v5597_v1 = vld [vmem:[%s8875_s9 + $0x5c8] sm:$0xff] }
 0x206   :  { %6476 = vmatprep.subr.bf16.mxu0 %v6475_v23  ;;  %v5603_v14 = vld [vmem:[%s8875_s9 + $0x5f8] sm:$0xff] }
 0x208   :  { %6350 = vmatpush1.bf16.msra.mxu1 %v6349_v31  ;;  %v6477_v31 = vpack.c.bf16 %v5546_v28, %v5544_v26  ;;  %v5536_v26 = vld [vmem:[%s8875_s9 + $0x3e0] sm:$0xff]  ;;  %v5538_v28 = vld [vmem:[%s8875_s9 + $0x3f0] sm:$0xff] }
 0x209   :  { %6352 = vmatprep.subr.bf16.mxu1 %v6351_v33  ;;  %v5521_v33 = vld [vmem:[%s8875_s9 + $0x368] sm:$0xff] }
 0x20a   :  { %6478 = vmatpush1.bf16.msra.mxu0 %v6477_v31  ;;  %v6387_v40 = vpack.c.bf16 %v5523_v34, %v5521_v33  ;;  %v5569_v31 = vld [vmem:[%s8875_s9 + $0x4e8] sm:$0xff]  ;;  %v5571_v33 = vld [vmem:[%s8875_s9 + $0x4f8] sm:$0xff]  ;;  %v6405_v34 = vpack.c.bf16 %v5538_v28, %v5536_v26  ;;  %v3538_v28 = vpop.permute.xlu0 %3537 }
 0x20c   :  { %6354 = vmatpush1.bf16.msra.mxu1 %v6353_v38  ;;  %v6479_v38 = vpack.c.bf16 %v5551_v37, %v5549_v35  ;;  %v6499_v35 = vpack.c.bf16 %v5571_v33, %v5569_v31  ;;  %v5568_v37 = vld [vmem:[%s8875_s9 + $0x4e0] sm:$0xff] }
 0x20d   :  { %6356 = vmatprep.subr.bf16.mxu1 %v6355_v39  ;;  %v5548_v39 = vld [vmem:[%s8875_s9 + $0x440] sm:$0xff] }
 0x20e   :  { %6480 = vmatprep.subr.bf16.mxu0 %v6479_v38  ;;  %v6407_v38 = vpack.c.bf16 %v4393_v30, %v4391_v45 }
 0x210   :  { %6358 = vmatpush1.bf16.msra.mxu1 %v6357_v43  ;;  %v6481_v43 = vpack.c.bf16 %v5550_v17, %v5548_v39  ;;  %v5573_v17 = vld [vmem:[%s8875_s9 + $0x508] sm:$0xff] }
 0x211   :  { %6360 = vmatprep.subr.bf16.mxu1 %v6359_v44  ;;  %v5525_v44 = vld [vmem:[%s8875_s9 + $0x388] sm:$0xff] }
 0x212   :  { %6482 = vmatpush1.bf16.msra.mxu0 %v6481_v43  ;;  %v6391_v55 = vpack.c.bf16 %v5527_v46, %v5525_v44  ;;  %v5574_v43 = vld [vmem:[%s8875_s9 + $0x510] sm:$0xff]  ;;  %v5577_v46 = vld [vmem:[%s8875_s9 + $0x528] sm:$0xff] }
 0x213   :  { %v6505_v44 = vpack.c.bf16 %v5574_v43, %v5572_v42 }
 0x214   :  { %6362 = vmatpush1.bf16.msra.mxu1 %v6361_v50  ;;  %v6483_v50 = vpack.c.bf16 %v5555_v48, %v5553_v47  ;;  %v5579_v47 = vld [vmem:[%s8875_s9 + $0x538] sm:$0xff] }
 0x215   :  { %6364 = vmatprep.subr.bf16.mxu1 %v6363_v51  ;;  %v5552_v51 = vld [vmem:[%s8875_s9 + $0x460] sm:$0xff]  ;;  %v6507_v48 = vpack.c.bf16 %v5579_v47, %v5577_v46 }
 0x216   :  { %6484 = vmatprep.subr.bf16.mxu0 %v6483_v50  ;;  %v5578_v50 = vld [vmem:[%s8875_s9 + $0x530] sm:$0xff]  ;;  %v4390_v47 = vld [vmem:[%s8875_s9] sm:$0xff] }
 0x218   :  { %6366 = vmatpush1.bf16.msra.mxu1 %v6365_v53  ;;  %v6485_v53 = vpack.c.bf16 %v5554_v52, %v5552_v51  ;;  %v5581_v52 = vld [vmem:[%s8875_s9 + $0x548] sm:$0xff] }
 0x219   :  { %6368 = vmatprep.subr.bf16.mxu1 %v6367_v58  ;;  %v5529_v58 = vld [vmem:[%s8875_s9 + $0x3a8] sm:$0xff] }
 0x21a   :  { %6486 = vmatpush1.bf16.msra.mxu0 %v6485_v53  ;;  %v6395_v3 = vpack.c.bf16 %v5531_v59, %v5529_v58  ;;  %v5582_v53 = vld [vmem:[%s8875_s9 + $0x550] sm:$0xff]  ;;  %v5585_v59 = vld [vmem:[%s8875_s9 + $0x568] sm:$0xff] }
 0x21b   :  { %v6513_v58 = vpack.c.bf16 %v5582_v53, %v5580_v57 }
 0x21c   :  { %6370 = vmatpush1.bf16.msra.mxu1 %v6369_v0  ;;  %v6487_v0 = vpack.c.bf16 %v5559_v61, %v5557_v60  ;;  %v5587_v60 = vld [vmem:[%s8875_s9 + $0x578] sm:$0xff] }
 0x21d   :  { %6372 = vmatprep.subr.bf16.mxu1 %v6371_v2  ;;  %v5556_v2 = vld [vmem:[%s8875_s9 + $0x480] sm:$0xff]  ;;  %v6515_v61 = vpack.c.bf16 %v5587_v60, %v5585_v59  ;;  %v4396_v59 = vld [vmem:[%s8875_s9 + $0x30] sm:$0xff] }
 0x21e   :  { %6488 = vmatprep.subr.bf16.mxu0 %v6487_v0  ;;  %v5586_v0 = vld [vmem:[%s8875_s9 + $0x570] sm:$0xff] }
 0x220   :  { %6374 = vmatpush1.bf16.msra.mxu1 %v6373_v5  ;;  %v6489_v5 = vpack.c.bf16 %v5558_v62, %v5556_v2  ;;  %v5589_v62 = vld [vmem:[%s8875_s9 + $0x588] sm:$0xff] }
 0x221   :  { %6376 = vmatprep.subr.bf16.mxu1 %v6375_v6  ;;  %v5533_v6 = vld [vmem:[%s8875_s9 + $0x3c8] sm:$0xff] }
 0x222   :  { %6490 = vmatpush1.bf16.msra.mxu0 %v6489_v5  ;;  %v6399_v8 = vpack.c.bf16 %v5535_v7, %v5533_v6  ;;  %v5590_v5 = vld [vmem:[%s8875_s9 + $0x590] sm:$0xff]  ;;  %v5593_v7 = vld [vmem:[%s8875_s9 + $0x5a8] sm:$0xff] }
 0x223   :  { %6492 = vmatprep.subr.bf16.mxu0 %v6491_v36  ;;  %v6521_v6 = vpack.c.bf16 %v5590_v5, %v5588_v4  ;;  %v6523_v12 = vpack.c.bf16 %v5595_v18, %v5593_v7  ;;  %v5594_v36 = vld [vmem:[%s8875_s9 + $0x5b0] sm:$0xff]  ;;  %v4405_v4 = vld [vmem:[%s8875_s9 + $0x78] sm:$0xff]  ;;  %v4402_v7 = vld [vmem:[%s8875_s9 + $0x60] sm:$0xff] }
 0x224   :  { %6378 = vmatpush1.bf16.msra.mxu1 %v6377_v10  ;;  %v5534_v10 = vld [vmem:[%s8875_s9 + $0x3d0] sm:$0xff] }
 0x225   :  { %6380 = vmatprep.subr.bf16.mxu1 %v6379_v11  ;;  %v5537_v11 = vld [vmem:[%s8875_s9 + $0x3e8] sm:$0xff]  ;;  %v6401_v19 = vpack.c.bf16 %v5534_v10, %v5532_v9  ;;  %v5596_v10 = vld [vmem:[%s8875_s9 + $0x5c0] sm:$0xff]  ;;  %v4404_v18 = vld [vmem:[%s8875_s9 + $0x70] sm:$0xff] }
 0x226   :  { %6494 = vmatpush1.bf16.msra.mxu0 %v6493_v25  ;;  %v6403_v23 = vpack.c.bf16 %v5539_v13, %v5537_v11  ;;  %v5598_v25 = vld [vmem:[%s8875_s9 + $0x5d0] sm:$0xff]  ;;  %v5601_v13 = vld [vmem:[%s8875_s9 + $0x5e8] sm:$0xff] }
 0x227   :  { %6496 = vmatprep.subr.bf16.mxu0 %v6495_v20  ;;  %v6529_v11 = vpack.c.bf16 %v5598_v25, %v5596_v10  ;;  %v6531_v15 = vpack.c.bf16 %v5603_v14, %v5601_v13  ;;  %v5602_v20 = vld [vmem:[%s8875_s9 + $0x5f0] sm:$0xff]  ;;  %v4413_v10 = vld [vmem:[%s8875_s9 + $0xb8] sm:$0xff]  ;;  %v4410_v13 = vld [vmem:[%s8875_s9 + $0xa0] sm:$0xff] }
 0x228   :  { %6382 = vmatpush1.bf16.msra.mxu1 %v6381_v22  ;;  %v5566_v22 = vld [vmem:[%s8875_s9 + $0x4d0] sm:$0xff] }
 0x229   :  { %6384 = vmatprep.subr.bf16.mxu1 %v6383_v29  ;;  %v6497_v29 = vpack.c.bf16 %v5566_v22, %v5564_v21  ;;  %v5605_v22 = vld [vmem:[%s8875_s9 + $0x608] sm:$0xff]  ;;  %v4412_v14 = vld [vmem:[%s8875_s9 + $0xb0] sm:$0xff] }
 0x22b   :  { %6498 = vmatpush1.bf16.msra.mxu0 %v6497_v29  ;;  %v4315_v29 = vpop.permute.xlu0 %4314 }
 0x22c   :  { %6386 = vmatpush1.bf16.msra.mxu1 %v6385_v24  ;;  %v5570_v24 = vld [vmem:[%s8875_s9 + $0x4f0] sm:$0xff]  ;;  %6500 = vmatprep.subr.bf16.mxu0 %v6499_v35 }
 0x22d   :  { %6388 = vmatprep.subr.bf16.mxu1 %v6387_v40  ;;  %v6501_v39 = vpack.c.bf16 %v5570_v24, %v5568_v37  ;;  %v5575_v40 = vld [vmem:[%s8875_s9 + $0x518] sm:$0xff] }
 0x22e   :  { %v6503_v41 = vpack.c.bf16 %v5575_v40, %v5573_v17 }
 0x22f   :  { %6502 = vmatpush1.bf16.msra.mxu0 %v6501_v39  ;;  %v4328_v45 = vpop.permute.xlu0 %4327 }
 0x230   :  { %6390 = vmatpush1.bf16.msra.mxu1 %v6389_v49  ;;  %6504 = vmatprep.subr.bf16.mxu0 %v6503_v41  ;;  %v5576_v49 = vld [vmem:[%s8875_s9 + $0x520] sm:$0xff] }
 0x231   :  { %6392 = vmatprep.subr.bf16.mxu1 %v6391_v55  ;;  %v6509_v51 = vpack.c.bf16 %v5578_v50, %v5576_v49  ;;  %v5583_v55 = vld [vmem:[%s8875_s9 + $0x558] sm:$0xff] }
 0x232   :  { %v6511_v56 = vpack.c.bf16 %v5583_v55, %v5581_v52  ;;  %v4397_v52 = vld [vmem:[%s8875_s9 + $0x38] sm:$0xff] }
 0x233   :  { %6506 = vmatpush1.bf16.msra.mxu0 %v6505_v44  ;;  %v3169_v30 = vpop.permute.xlu0 %3168 }
 0x234   :  { %6394 = vmatpush1.bf16.msra.mxu1 %v6393_v63  ;;  %6508 = vmatprep.subr.bf16.mxu0 %v6507_v48  ;;  %v5584_v63 = vld [vmem:[%s8875_s9 + $0x560] sm:$0xff]  ;;  %v4392_v48 = vld [vmem:[%s8875_s9 + $0x10] sm:$0xff] }
 0x235   :  { %6396 = vmatprep.subr.bf16.mxu1 %v6395_v3  ;;  %v6517_v2 = vpack.c.bf16 %v5586_v0, %v5584_v63  ;;  %v5591_v3 = vld [vmem:[%s8875_s9 + $0x598] sm:$0xff] }
 0x236   :  { %v6519_v32 = vpack.c.bf16 %v5591_v3, %v5589_v62  ;;  %v4401_v63 = vld [vmem:[%s8875_s9 + $0x58] sm:$0xff]  ;;  %v4398_v62 = vld [vmem:[%s8875_s9 + $0x40] sm:$0xff]  ;;  %v4400_v3 = vld [vmem:[%s8875_s9 + $0x50] sm:$0xff] }
 0x237   :  { %6510 = vmatpush1.bf16.msra.mxu0 %v6509_v51  ;;  %v4288_v31 = vpop.permute.xlu0 %4287  ;;  %v4395_v51 = vld [vmem:[%s8875_s9 + $0x28] sm:$0xff]  ;;  %v6417_v5 = vpack.c.bf16 %v4400_v3, %v4398_v62 }
 0x238   :  { %6398 = vmatpush1.bf16.msra.mxu1 %v6397_v27  ;;  %6512 = vmatprep.subr.bf16.mxu0 %v6511_v56  ;;  %v5592_v27 = vld [vmem:[%s8875_s9 + $0x5a0] sm:$0xff]  ;;  %v6409_v56 = vpack.c.bf16 %v4392_v48, %v4390_v47  ;;  %v6411_v53 = vpack.c.bf16 %v4397_v52, %v4395_v51  ;;  %v4428_v47 = vld [vmem:[%s8875_s9 + $0x130] sm:$0xff]  ;;  %v4431_v48 = vld [vmem:[%s8875_s9 + $0x148] sm:$0xff] }
 0x239   :  { %6400 = vmatprep.subr.bf16.mxu1 %v6399_v8  ;;  %v6525_v54 = vpack.c.bf16 %v5594_v36, %v5592_v27  ;;  %v5599_v8 = vld [vmem:[%s8875_s9 + $0x5d8] sm:$0xff]  ;;  %v6421_v36 = vpack.c.bf16 %v4404_v18, %v4402_v7 }
 0x23a   :  { %v6527_v9 = vpack.c.bf16 %v5599_v8, %v5597_v1  ;;  %v4409_v27 = vld [vmem:[%s8875_s9 + $0x98] sm:$0xff]  ;;  %v4406_v1 = vld [vmem:[%s8875_s9 + $0x80] sm:$0xff]  ;;  %v4408_v8 = vld [vmem:[%s8875_s9 + $0x90] sm:$0xff] }
 0x23b   :  { %6514 = vmatpush1.bf16.msra.mxu0 %v6513_v58  ;;  %v8462_v44 = vpop.permute.xlu0 %4299  ;;  %v4394_v58 = vld [vmem:[%s8875_s9 + $0x20] sm:$0xff]  ;;  %v6425_v25 = vpack.c.bf16 %v4408_v8, %v4406_v1  ;;  %v4449_v1 = vld [vmem:[%s8875_s9 + $0x1d8] sm:$0xff] }
 0x23c   :  { %6402 = vmatpush1.bf16.msra.mxu1 %v6401_v19  ;;  %6516 = vmatprep.subr.bf16.mxu0 %v6515_v61  ;;  %v5600_v19 = vld [vmem:[%s8875_s9 + $0x5e0] sm:$0xff]  ;;  %v4399_v61 = vld [vmem:[%s8875_s9 + $0x48] sm:$0xff]  ;;  %v6413_v0 = vpack.c.bf16 %v4396_v59, %v4394_v58 }
 0x23d   :  { %6404 = vmatprep.subr.bf16.mxu1 %v6403_v23  ;;  %v6533_v21 = vpack.c.bf16 %v5602_v20, %v5600_v19  ;;  %v5607_v23 = vld [vmem:[%s8875_s9 + $0x618] sm:$0xff]  ;;  %v6429_v20 = vpack.c.bf16 %v4412_v14, %v4410_v13 }
 0x23e   :  { %v6535_v26 = vpack.c.bf16 %v5607_v23, %v5605_v22  ;;  %v4417_v19 = vld [vmem:[%s8875_s9 + $0xd8] sm:$0xff]  ;;  %v4414_v22 = vld [vmem:[%s8875_s9 + $0xc0] sm:$0xff]  ;;  %v4416_v23 = vld [vmem:[%s8875_s9 + $0xd0] sm:$0xff] }
 0x23f   :  { %6518 = vmatpush1.bf16.msra.mxu0 %v6517_v2  ;;  %v6415_v2 = vpack.c.bf16 %v4401_v63, %v4399_v61  ;;  %v4436_v61 = vld [vmem:[%s8875_s9 + $0x170] sm:$0xff]  ;;  %v4439_v63 = vld [vmem:[%s8875_s9 + $0x188] sm:$0xff]  ;;  %v4453_v13 = vld [vmem:[%s8875_s9 + $0x1f8] sm:$0xff] }
 0x240   :  { %6406 = vmatpush1.bf16.msra.mxu1 %v6405_v34  ;;  %6520 = vmatprep.subr.bf16.mxu0 %v6519_v32  ;;  %v4403_v32 = vld [vmem:[%s8875_s9 + $0x68] sm:$0xff] }
 0x241   :  { %6408 = vmatprep.subr.bf16.mxu1 %v6407_v38 }
 0x243   :  { %6522 = vmatpush1.bf16.msra.mxu0 %v6521_v6  ;;  %v6419_v6 = vpack.c.bf16 %v4405_v4, %v4403_v32  ;;  %v4438_v32 = vld [vmem:[%s8875_s9 + $0x180] sm:$0xff]  ;;  %v4440_v4 = vld [vmem:[%s8875_s9 + $0x190] sm:$0xff] }
 0x244   :  { %6524 = vmatprep.subr.bf16.mxu0 %v6523_v12  ;;  %v4407_v12 = vld [vmem:[%s8875_s9 + $0x88] sm:$0xff]  ;;  %v6457_v7 = vpack.c.bf16 %v4440_v4, %v4438_v32  ;;  %v5623_v4 = vld [vmem:[%s8875_s9 + $0x698] sm:$0xff] }
 0x245   :  { %v5621_v32 = vld [vmem:[%s8875_s9 + $0x688] sm:$0xff] }
 0x247   :  { %6526 = vmatpush1.bf16.msra.mxu0 %v6525_v54  ;;  %v6423_v54 = vpack.c.bf16 %v4409_v27, %v4407_v12  ;;  %v4442_v27 = vld [vmem:[%s8875_s9 + $0x1a0] sm:$0xff] }
 0x248   :  { %6528 = vmatprep.subr.bf16.mxu0 %v6527_v9  ;;  %v4411_v9 = vld [vmem:[%s8875_s9 + $0xa8] sm:$0xff] }
 0x24b   :  { %6530 = vmatpush1.bf16.msra.mxu0 %v6529_v11  ;;  %v6427_v11 = vpack.c.bf16 %v4413_v10, %v4411_v9  ;;  %v4446_v10 = vld [vmem:[%s8875_s9 + $0x1c0] sm:$0xff] }
 0x24c   :  { %6532 = vmatprep.subr.bf16.mxu0 %v6531_v15  ;;  %v4415_v15 = vld [vmem:[%s8875_s9 + $0xc8] sm:$0xff] }
 0x24f   :  { %6534 = vmatpush1.bf16.msra.mxu0 %v6533_v21  ;;  %v6431_v21 = vpack.c.bf16 %v4417_v19, %v4415_v15 }
 0x250   :  { %6536 = vmatprep.subr.bf16.mxu0 %v6535_v26  ;;  %v4419_v26 = vld [vmem:[%s8875_s9 + $0xe8] sm:$0xff] }
 0x296   :  { %v3154_v33 = vpop.f32.mrb[32].mxu0  ;;  %v3522_v34 = vpop.f32.mrb[32].mxu1 }
 0x297   :  { %v3171_v35 = vadd.f32 %v3169_v30, %v3154_v33  ;;  %v3540_v37 = vadd.f32 %v3538_v28, %v3522_v34  ;;  %v3156_v24 = vpop.f32.mrb[33].mxu0  ;;  %v3524_v38 = vpop.f32.mrb[33].mxu1  ;;  %v4423_v33 = vld [vmem:[%s8875_s9 + $0x108] sm:$0xff]  ;;  %v4425_v34 = vld [vmem:[%s8875_s9 + $0x118] sm:$0xff] }
 0x298   :  { %v3172_v39 = vadd.f32 %v3169_v30, %v3156_v24  ;;  %v3541_v17 = vadd.f32 %v3538_v28, %v3524_v38  ;;  %v4421_v28 = vld [vmem:[%s8875_s9 + $0xf8] sm:$0xff]  ;;  %v4418_v30 = vld [vmem:[%s8875_s9 + $0xe0] sm:$0xff]  ;;  %v4424_v38 = vld [vmem:[%s8875_s9 + $0x110] sm:$0xff] }
 0x299   :  { %v8460_v40 = vmul.f32 %v4288_v31, %v3171_v35  ;;  %v4317_v41 = vmul.f32 %v4315_v29, %v3540_v37  ;;  %v6439_v37 = vpack.c.bf16 %v4425_v34, %v4423_v33  ;;  %v4422_v24 = vld [vmem:[%s8875_s9 + $0x100] sm:$0xff] }
 0x29a   :  { %v4291_v42 = vmul.f32 %v4288_v31, %v3172_v39  ;;  %v4318_v43 = vmul.f32 %v4315_v29, %v3541_v17  ;;  %v6433_v29 = vpack.c.bf16 %v4416_v23, %v4414_v22  ;;  %v4420_v31 = vld [vmem:[%s8875_s9 + $0xf0] sm:$0xff]  ;;  %v4427_v39 = vld [vmem:[%s8875_s9 + $0x128] sm:$0xff]  ;;  %v4429_v17 = vld [vmem:[%s8875_s9 + $0x138] sm:$0xff] }
 0x29b   :  { %v4330_v46 = vadd.f32 %v4328_v45, %v4317_v41  ;;  %v6437_v35 = vpack.c.bf16 %v4420_v31, %v4418_v30  ;;  %v8573_v41 = vpop.permute.xlu1 %3906 }
 0x29c   :  { %v4331_v49 = vadd.f32 %v4328_v45, %v4318_v43  ;;  %v4303_v50 = vadd.f32 %v8462_v44, %v4291_v42  ;;  %v6435_v45 = vpack.c.bf16 %v4421_v28, %v4419_v26  ;;  %v6441_v42 = vpack.c.bf16 %v4424_v38, %v4422_v24 }
 0x29d   :  { %v4332_v57 = vmax.f32 %v4330_v46, 0.0  ;;  %v6443_v43 = vpack.c.bf16 %v4429_v17, %v4427_v39  ;;  %v4426_v46 = vld [vmem:[%s8875_s9 + $0x120] sm:$0xff]  ;;  %v4302_v39 = vadd.f32 %v8462_v44, %v8460_v40  ;;  %v5611_v40 = vld [vmem:[%s8875_s9 + $0x638] sm:$0xff] }
 0x29e   :  { %v4333_v55 = vmax.f32 %v4331_v49, 0.0  ;;  %v4305_v60 = vmax.f32 %v4303_v50, 0.0  ;;  %v4433_v49 = vld [vmem:[%s8875_s9 + $0x158] sm:$0xff]  ;;  %v6445_v50 = vpack.c.bf16 %v4428_v47, %v4426_v46  ;;  %v5609_v47 = vld [vmem:[%s8875_s9 + $0x628] sm:$0xff] }
 0x29f   :  { %v4343_v51 = vpop.permute.xlu1 %4342  ;;  %v6447_v52 = vpack.c.bf16 %v4433_v49, %v4431_v48  ;;  %v4304_v49 = vmax.f32 %v4302_v39, 0.0  ;;  %v5640_v39 = vld [vmem:[%s8875_s9 + $0x720] sm:$0xff] }
 0x2a0   :  { %4583 = vmatprep.mubr.f32.mxu1 %v4333_v55  ;;  %v4430_v55 = vld [vmem:[%s8875_s9 + $0x140] sm:$0xff] }
 0x2a1   :  { %4584 = vmatmul.mubr.f32.vlgmr.msra.gmra.mrb[36].mxu1 %v4332_v57  ;;  %v4435_v57 = vld [vmem:[%s8875_s9 + $0x168] sm:$0xff] }
 0x2a2   :  { %6410 = vmatpush1.bf16.msra.mxu1 %v6409_v56  ;;  %4654 = vmatprep.mubr.f32.mxu1 %v4305_v60  ;;  %v4432_v56 = vld [vmem:[%s8875_s9 + $0x150] sm:$0xff]  ;;  %v4434_v60 = vld [vmem:[%s8875_s9 + $0x160] sm:$0xff] }
 0x2a3   :  { %6412 = vmatprep.subr.bf16.mxu1 %v6411_v53  ;;  %v4437_v53 = vld [vmem:[%s8875_s9 + $0x178] sm:$0xff]  ;;  %v6449_v58 = vpack.c.bf16 %v4432_v56, %v4430_v55  ;;  %v6453_v62 = vpack.c.bf16 %v4436_v61, %v4434_v60  ;;  %v5610_v55 = vld [vmem:[%s8875_s9 + $0x630] sm:$0xff]  ;;  %v5612_v60 = vld [vmem:[%s8875_s9 + $0x640] sm:$0xff] }
 0x2a4   :  { %v6451_v59 = vpack.c.bf16 %v4437_v53, %v4435_v57  ;;  %v5613_v57 = vld [vmem:[%s8875_s9 + $0x648] sm:$0xff]  ;;  %v5615_v53 = vld [vmem:[%s8875_s9 + $0x658] sm:$0xff]  ;;  %v5614_v61 = vld [vmem:[%s8875_s9 + $0x650] sm:$0xff] }
 0x2a6   :  { %6414 = vmatpush1.bf16.msra.mxu1 %v6413_v0  ;;  %v4441_v0 = vld [vmem:[%s8875_s9 + $0x198] sm:$0xff] }
 0x2a7   :  { %6416 = vmatprep.subr.bf16.mxu1 %v6415_v2  ;;  %v4356_v2 = vpop.permute.xlu1 %4355  ;;  %v6455_v3 = vpack.c.bf16 %v4441_v0, %v4439_v63  ;;  %v5617_v63 = vld [vmem:[%s8875_s9 + $0x668] sm:$0xff]  ;;  %v5619_v0 = vld [vmem:[%s8875_s9 + $0x678] sm:$0xff] }
 0x2aa   :  { %6418 = vmatpush1.bf16.msra.mxu1 %v6417_v5  ;;  %v4443_v5 = vld [vmem:[%s8875_s9 + $0x1a8] sm:$0xff] }
 0x2ab   :  { %6420 = vmatprep.subr.bf16.mxu1 %v6419_v6  ;;  %v4445_v6 = vld [vmem:[%s8875_s9 + $0x1b8] sm:$0xff]  ;;  %v4276_v18 = vpop.permute.xlu1 %4275 }
 0x2ac   :  { %v6459_v12 = vpack.c.bf16 %v4445_v6, %v4443_v5  ;;  %v6551_v6 = vpack.c.bf16 %v5623_v4, %v5621_v32 }
 0x2ae   :  { %6422 = vmatpush1.bf16.msra.mxu1 %v6421_v36  ;;  %v4444_v36 = vld [vmem:[%s8875_s9 + $0x1b0] sm:$0xff] }
 0x2af   :  { %6424 = vmatprep.subr.bf16.mxu1 %v6423_v54  ;;  %v4447_v54 = vld [vmem:[%s8875_s9 + $0x1c8] sm:$0xff]  ;;  %v6461_v8 = vpack.c.bf16 %v4444_v36, %v4442_v27  ;;  %v4371_v14 = vpop.permute.xlu1 %4370  ;;  %v5627_v27 = vld [vmem:[%s8875_s9 + $0x6b8] sm:$0xff] }
 0x2b0   :  { %v6463_v9 = vpack.c.bf16 %v4449_v1, %v4447_v54  ;;  %v5624_v1 = vld [vmem:[%s8875_s9 + $0x6a0] sm:$0xff] }
 0x2b2   :  { %6426 = vmatpush1.bf16.msra.mxu1 %v6425_v25  ;;  %v4448_v25 = vld [vmem:[%s8875_s9 + $0x1d0] sm:$0xff] }
 0x2b3   :  { %6428 = vmatprep.subr.bf16.mxu1 %v6427_v11  ;;  %v4451_v11 = vld [vmem:[%s8875_s9 + $0x1e8] sm:$0xff]  ;;  %v8657_v38 = vpop.permute.xlu1 %4383 }
 0x2b4   :  { %v6467_v28 = vpack.c.bf16 %v4453_v13, %v4451_v11  ;;  %v5628_v13 = vld [vmem:[%s8875_s9 + $0x6c0] sm:$0xff] }
 0x2b6   :  { %6430 = vmatpush1.bf16.msra.mxu1 %v6429_v20  ;;  %v6465_v20 = vpack.c.bf16 %v4448_v25, %v4446_v10  ;;  %v5631_v10 = vld [vmem:[%s8875_s9 + $0x6d8] sm:$0xff] }
 0x2b7   :  { %6432 = vmatprep.subr.bf16.mxu1 %v6431_v21 }
 0x2ba   :  { %6434 = vmatpush1.bf16.msra.mxu1 %v6433_v29  ;;  %v4450_v29 = vld [vmem:[%s8875_s9 + $0x1e0] sm:$0xff] }
 0x2bb   :  { %6436 = vmatprep.subr.bf16.mxu1 %v6435_v45  ;;  %v4452_v45 = vld [vmem:[%s8875_s9 + $0x1f0] sm:$0xff] }
 0x2bc   :  { %v6469_v24 = vpack.c.bf16 %v4452_v45, %v4450_v29 }
 0x2be   :  { %6438 = vmatpush1.bf16.msra.mxu1 %v6437_v35 }
 0x2bf   :  { %6440 = vmatprep.subr.bf16.mxu1 %v6439_v37 }
 0x2c2   :  { %6442 = vmatpush1.bf16.msra.mxu1 %v6441_v42  ;;  %v5604_v42 = vld [vmem:[%s8875_s9 + $0x600] sm:$0xff] }
 0x2c3   :  { %6444 = vmatprep.subr.bf16.mxu1 %v6443_v43 }
 0x2c6   :  { %6446 = vmatpush1.bf16.msra.mxu1 %v6445_v50 }
 0x2c7   :  { %6448 = vmatprep.subr.bf16.mxu1 %v6447_v52  ;;  %v5608_v52 = vld [vmem:[%s8875_s9 + $0x620] sm:$0xff] }
 0x2ca   :  { %6450 = vmatpush1.bf16.msra.mxu1 %v6449_v58  ;;  %v6541_v58 = vpack.c.bf16 %v5610_v55, %v5608_v52  ;;  %v5650_v52 = vld [vmem:[%s8875_s9 + $0x770] sm:$0xff]  ;;  %v5653_v55 = vld [vmem:[%s8875_s9 + $0x788] sm:$0xff] }
 0x2cb   :  { %6452 = vmatprep.subr.bf16.mxu1 %v6451_v59  ;;  %v6543_v59 = vpack.c.bf16 %v5615_v53, %v5613_v57 }
 0x2ce   :  { %6454 = vmatpush1.bf16.msra.mxu1 %v6453_v62  ;;  %v6547_v62 = vpack.c.bf16 %v5619_v0, %v5617_v63 }
 0x2cf   :  { %6456 = vmatprep.subr.bf16.mxu1 %v6455_v3  ;;  %v5616_v3 = vld [vmem:[%s8875_s9 + $0x660] sm:$0xff] }
 0x2d2   :  { %6458 = vmatpush1.bf16.msra.mxu1 %v6457_v7  ;;  %v5620_v7 = vld [vmem:[%s8875_s9 + $0x680] sm:$0xff] }
 0x2d3   :  { %6460 = vmatprep.subr.bf16.mxu1 %v6459_v12  ;;  %v5625_v12 = vld [vmem:[%s8875_s9 + $0x6a8] sm:$0xff] }
 0x2d4   :  { %v6555_v54 = vpack.c.bf16 %v5627_v27, %v5625_v12 }
 0x2d6   :  { %6462 = vmatpush1.bf16.msra.mxu1 %v6461_v8  ;;  %v3891_v15 = vpop.f32.mrb[34].mxu0  ;;  %v4260_v19 = vpop.f32.mrb[34].mxu1  ;;  %v5626_v8 = vld [vmem:[%s8875_s9 + $0x6b0] sm:$0xff] }
 0x2d7   :  { %v3909_v21 = vadd.f32 %v8573_v41, %v3891_v15  ;;  %v4278_v22 = vadd.f32 %v4276_v18, %v4260_v19  ;;  %v3893_v23 = vpop.f32.mrb[35].mxu0  ;;  %v4262_v26 = vpop.f32.mrb[35].mxu1  ;;  %6464 = vmatprep.subr.bf16.mxu1 %v6463_v9  ;;  %v5629_v9 = vld [vmem:[%s8875_s9 + $0x6c8] sm:$0xff]  ;;  %v6557_v25 = vpack.c.bf16 %v5626_v8, %v5624_v1  ;;  %v5635_v19 = vld [vmem:[%s8875_s9 + $0x6f8] sm:$0xff] }
 0x2d8   :  { %v3910_v30 = vadd.f32 %v8573_v41, %v3893_v23  ;;  %v4279_v31 = vadd.f32 %v4276_v18, %v4262_v26  ;;  %v5606_v41 = vld [vmem:[%s8875_s9 + $0x610] sm:$0xff]  ;;  %v6559_v11 = vpack.c.bf16 %v5631_v10, %v5629_v9  ;;  %v5633_v15 = vld [vmem:[%s8875_s9 + $0x6e8] sm:$0xff] }
 0x2d9   :  { %v4345_v33 = vmul.f32 %v4343_v51, %v3909_v21  ;;  %v8655_v34 = vmul.f32 %v4371_v14, %v4278_v22  ;;  %v6537_v48 = vpack.c.bf16 %v5606_v41, %v5604_v42  ;;  %v5622_v18 = vld [vmem:[%s8875_s9 + $0x690] sm:$0xff]  ;;  %v6563_v21 = vpack.c.bf16 %v5635_v19, %v5633_v15  ;;  %v5632_v22 = vld [vmem:[%s8875_s9 + $0x6e0] sm:$0xff]  ;;  %v5637_v26 = vld [vmem:[%s8875_s9 + $0x708] sm:$0xff]  ;;  %v4945_v15 = vpop.permute.xlu0 %4944 }
 0x2da   :  { %v4346_v35 = vmul.f32 %v4343_v51, %v3910_v30  ;;  %v4374_v37 = vmul.f32 %v4371_v14, %v4279_v31  ;;  %6466 = vmatpush1.bf16.msra.mxu1 %v6465_v20  ;;  %v6539_v51 = vpack.c.bf16 %v5611_v40, %v5609_v47  ;;  %v6553_v36 = vpack.c.bf16 %v5622_v18, %v5620_v7  ;;  %v5630_v14 = vld [vmem:[%s8875_s9 + $0x6d0] sm:$0xff]  ;;  %v5636_v30 = vld [vmem:[%s8875_s9 + $0x700] sm:$0xff]  ;;  %v5645_v42 = vld [vmem:[%s8875_s9 + $0x748] sm:$0xff] }
 0x2db   :  { %v4358_v17 = vadd.f32 %v4356_v2, %v4345_v33  ;;  %6468 = vmatprep.subr.bf16.mxu1 %v6467_v28  ;;  %v6561_v20 = vpack.c.bf16 %v5630_v14, %v5628_v13  ;;  %v5634_v23 = vld [vmem:[%s8875_s9 + $0x6f0] sm:$0xff]  ;;  %v5639_v28 = vld [vmem:[%s8875_s9 + $0x718] sm:$0xff]  ;;  %v5641_v33 = vld [vmem:[%s8875_s9 + $0x728] sm:$0xff]  ;;  %v4386_v8 = vadd.f32 %v8657_v38, %v8655_v34 }
 0x2dc   :  { %v4359_v43 = vadd.f32 %v4356_v2, %v4346_v35  ;;  %v4387_v46 = vadd.f32 %v8657_v38, %v4374_v37  ;;  %v6545_v2 = vpack.c.bf16 %v5614_v61, %v5612_v60  ;;  %v6565_v29 = vpack.c.bf16 %v5634_v23, %v5632_v22  ;;  %v5638_v31 = vld [vmem:[%s8875_s9 + $0x710] sm:$0xff]  ;;  %v5643_v35 = vld [vmem:[%s8875_s9 + $0x738] sm:$0xff]  ;;  %v5644_v47 = vld [vmem:[%s8875_s9 + $0x740] sm:$0xff] }
 0x2dd   :  { %v4360_v50 = vmax.f32 %v4358_v17, 0.0  ;;  %v6567_v45 = vpack.c.bf16 %v5639_v28, %v5637_v26  ;;  %v6569_v37 = vpack.c.bf16 %v5638_v31, %v5636_v30  ;;  %v5642_v17 = vld [vmem:[%s8875_s9 + $0x730] sm:$0xff]  ;;  %v5647_v41 = vld [vmem:[%s8875_s9 + $0x758] sm:$0xff]  ;;  %v5657_v60 = vld [vmem:[%s8875_s9 + $0x7a8] sm:$0xff]  ;;  %v4388_v9 = vmax.f32 %v4386_v8, 0.0 }
 0x2de   :  { %6470 = vmatpush1.bf16.msra.mxu1 %v6469_v24  ;;  %v4361_v44 = vmax.f32 %v4359_v43, 0.0  ;;  %v4389_v56 = vmax.f32 %v4387_v46, 0.0  ;;  %v6571_v24 = vpack.c.bf16 %v5643_v35, %v5641_v33  ;;  %v6573_v43 = vpack.c.bf16 %v5642_v17, %v5640_v39  ;;  %v5646_v40 = vld [vmem:[%s8875_s9 + $0x750] sm:$0xff]  ;;  %v5659_v61 = vld [vmem:[%s8875_s9 + $0x7b8] sm:$0xff]  ;;  %v5665_v7 = vld [vmem:[%s8875_s9 + $0x7e8] sm:$0xff] }
 0x2df   :  { %v6575_v46 = vpack.c.bf16 %v5647_v41, %v5645_v42  ;;  %v6587_v0 = vpack.c.bf16 %v5659_v61, %v5657_v60  ;;  %v5667_v18 = vld [vmem:[%s8875_s9 + $0x7f8] sm:$0xff]  ;;  %v4951_v34 = vld [vmem:[%s8877_s13] sm:$0x3] }
 0x2e0   :  { %4790 = vmatprep.mubr.f32.mxu0 %v4361_v44  ;;  %v5649_v44 = vld [vmem:[%s8875_s9 + $0x768] sm:$0xff]  ;;  %v6595_v27 = vpack.c.bf16 %v5667_v18, %v5665_v7 }
 0x2e1   :  { %4655 = vmatmul.mubr.f32.vlgmr.msra.gmra.mrb[36].mxu1 %v4304_v49  ;;  %4791 = vmatmul.mubr.f32.vlgmr.msra.gmra.mrb[36].mxu0 %v4360_v50  ;;  %v6577_v49 = vpack.c.bf16 %v5646_v40, %v5644_v47 }
 0x2e2   :  { %6538 = vmatpush1.bf16.msra.mxu0 %v6537_v48  ;;  %4928 = vmatprep.mubr.f32.mxu0 %v4389_v56  ;;  %v5651_v48 = vld [vmem:[%s8875_s9 + $0x778] sm:$0xff] }
 0x2e3   :  { %6540 = vmatprep.subr.bf16.mxu0 %v6539_v51  ;;  %5020 = vmatprep.mubr.f32.mxu1 %v6638_v16  ;;  %v5618_v16 = vld [vmem:[%s8875_s9 + $0x670] sm:$0xff]  ;;  %v6579_v50 = vpack.c.bf16 %v5651_v48, %v5649_v44  ;;  %v5648_v51 = vld [vmem:[%s8875_s9 + $0x760] sm:$0xff]  ;;  %v5655_v56 = vld [vmem:[%s8875_s9 + $0x798] sm:$0xff] }
 0x2e4   :  { %v6549_v5 = vpack.c.bf16 %v5618_v16, %v5616_v3  ;;  %v6581_v57 = vpack.c.bf16 %v5650_v52, %v5648_v51  ;;  %v6583_v53 = vpack.c.bf16 %v5655_v56, %v5653_v55  ;;  %v5661_v3 = vld [vmem:[%s8875_s9 + $0x7c8] sm:$0xff]  ;;  %v5663_v16 = vld [vmem:[%s8875_s9 + $0x7d8] sm:$0xff] }
 0x2e5   :  { %v6591_v4 = vpack.c.bf16 %v5663_v16, %v5661_v3 }
 0x2e6   :  { %6542 = vmatpush1.bf16.msra.mxu0 %v6541_v58  ;;  %v5652_v58 = vld [vmem:[%s8875_s9 + $0x780] sm:$0xff] }
 0x2e7   :  { %6544 = vmatprep.subr.bf16.mxu0 %v6543_v59  ;;  %v5654_v59 = vld [vmem:[%s8875_s9 + $0x790] sm:$0xff] }
 0x2e8   :  { %v6585_v63 = vpack.c.bf16 %v5654_v59, %v5652_v58 }
 0x2ea   :  { %6546 = vmatpush1.bf16.msra.mxu0 %v6545_v2  ;;  %v5656_v2 = vld [vmem:[%s8875_s9 + $0x7a0] sm:$0xff] }
 0x2eb   :  { %6548 = vmatprep.subr.bf16.mxu0 %v6547_v62  ;;  %v5658_v62 = vld [vmem:[%s8875_s9 + $0x7b0] sm:$0xff] }
 0x2ec   :  { %v6589_v32 = vpack.c.bf16 %v5658_v62, %v5656_v2 }
 0x2ee   :  { %6550 = vmatpush1.bf16.msra.mxu0 %v6549_v5  ;;  %v5660_v5 = vld [vmem:[%s8875_s9 + $0x7c0] sm:$0xff] }
 0x2ef   :  { %6552 = vmatprep.subr.bf16.mxu0 %v6551_v6  ;;  %v5662_v6 = vld [vmem:[%s8875_s9 + $0x7d0] sm:$0xff] }
 0x2f0   :  { %v6593_v12 = vpack.c.bf16 %v5662_v6, %v5660_v5 }
 0x2f2   :  { %6554 = vmatpush1.bf16.msra.mxu0 %v6553_v36  ;;  %v5664_v36 = vld [vmem:[%s8875_s9 + $0x7e0] sm:$0xff] }
 0x2f3   :  { %6556 = vmatprep.subr.bf16.mxu0 %v6555_v54  ;;  %v5666_v54 = vld [vmem:[%s8875_s9 + $0x7f0] sm:$0xff] }
 0x2f4   :  { %v6597_v1 = vpack.c.bf16 %v5666_v54, %v5664_v36 }
 0x2f6   :  { %6558 = vmatpush1.bf16.msra.mxu0 %v6557_v25 }
 0x2f7   :  { %6560 = vmatprep.subr.bf16.mxu0 %v6559_v11 }
 0x2fa   :  { %6562 = vmatpush1.bf16.msra.mxu0 %v6561_v20 }
 0x2fb   :  { %6564 = vmatprep.subr.bf16.mxu0 %v6563_v21 }
 0x2fe   :  { %6566 = vmatpush1.bf16.msra.mxu0 %v6565_v29 }
 0x2ff   :  { %6568 = vmatprep.subr.bf16.mxu0 %v6567_v45 }
 0x302   :  { %6570 = vmatpush1.bf16.msra.mxu0 %v6569_v37 }
 0x303   :  { %6572 = vmatprep.subr.bf16.mxu0 %v6571_v24 }
 0x306   :  { %6574 = vmatpush1.bf16.msra.mxu0 %v6573_v43 }
 0x307   :  { %6576 = vmatprep.subr.bf16.mxu0 %v6575_v46 }
 0x30a   :  { %6578 = vmatpush1.bf16.msra.mxu0 %v6577_v49 }
 0x30b   :  { %6580 = vmatprep.subr.bf16.mxu0 %v6579_v50 }
 0x30e   :  { %6582 = vmatpush1.bf16.msra.mxu0 %v6581_v57 }
 0x30f   :  { %6584 = vmatprep.subr.bf16.mxu0 %v6583_v53 }
 0x312   :  { %6586 = vmatpush1.bf16.msra.mxu0 %v6585_v63 }
 0x313   :  { %6588 = vmatprep.subr.bf16.mxu0 %v6587_v0 }
 0x316   :  { %6590 = vmatpush1.bf16.msra.mxu0 %v6589_v32 }
 0x317   :  { %6592 = vmatprep.subr.bf16.mxu0 %v6591_v4 }
 0x31a   :  { %6594 = vmatpush1.bf16.msra.mxu0 %v6593_v12 }
 0x31b   :  { %6596 = vmatprep.subr.bf16.mxu0 %v6595_v27 }
 0x31e   :  { %6598 = vmatpush1.bf16.msra.mxu0 %v6597_v1 }
 0x321   :  { %4929 = vmatmul.mubr.f32.vlgmr.msra.gmra.mrb[36].mxu0 %v4388_v9 }
 0x3b4   :  { %v4656_v10 = vpop.f32.mrb[36].mxu1 }
 0x3b5   :  { %v4658_v25 = vpop.f32.mrb[37].mxu1 }
 0x3f4   :  { %v4930_v11 = vpop.f32.mrb[36].mxu0 }
 0x3f5   :  { %v6599_v13 = vadd.f32 %v4930_v11, %v4656_v10  ;;  %v4932_v14 = vpop.f32.mrb[37].mxu0 }
 0x3f6   :  { %v6600_v19 = vadd.f32 %v4932_v14, %v4658_v25 }
 0x3f7   :  { %v4947_v20 = vadd.f32 %v6599_v13, %v4945_v15 }
 0x3f8   :  { %v4948_v21 = vadd.f32 %v6600_v19, %v4945_v15 }
 0x3f9   :  { %4949 = vst [vmem:[%s8876_s14] sm:$0xff] %v4947_v20 }
 0x3fa   :  { %4950 = vst [vmem:[%s8876_s14 + $0x8] sm:$0xff] %v4948_v21  ;;  %4956 = vmatprep.subr.mxu1 %v4948_v21 }
 0x3fb   :  { %4957 = vmatpush1.msra.mxu1 %v4947_v20 }
 0x3fc   :  { %5669 = vmatmul.mubr.msk.f32.vlgmr.msra.gmra.mrb[38].mxu1 %vm4952_vm3, %v4951_v34 }
 0x4cf   :  { %v5022_v38 = vpop.f32.mrb[38].mxu1 }
 0x4d0   :  { %v5024_v22 = vpop.f32.mrb[39].mxu1 }
 0x4d1   :  { %v5029_v23 = vcombine.low %v5022_v38, %v5024_v22 }
 0x4d3   :  { %5670 = vst.sshfl [vmem:[%s8878_s15] sm:$0x33 pattern:$0x76325410] %v5029_v23 }

</bundles_post_ra>
